<compile_context>
chip_gen: v7x
topology: tpu7x:2x2x1
jax: 0.10.0
libtpu: 0.0.40
codegen_flags: <defaults>
</compile_context>

<pallas_src>
import numpy as np
import jax
import jax.numpy as jnp
from jax import lax
from jax.experimental import pallas as pl
from jax.experimental.pallas import tpu as pltpu


def _round_up(n, m):
    return ((n + m - 1) // m) * m


def sentiment_rnn_kernel(x_ref,      # (T*Bp, Ep)   embedded inputs, time-major, flattened
                         wih0_ref,   # (Ep, 4Hp)    layer-0 input->gates weights
                         wihL_ref,   # (max(L-1,1), Hp, 4Hp) layers>=1 input->gates
                         whh_ref,    # (L, Hp, 4Hp) hidden->gates weights
                         b_ref,      # (L, 1, 4Hp)  b_ih + b_hh (per-gate padded)
                         h0_ref,     # (L, Bp, Hp)
                         c0_ref,     # (L, Bp, Hp)
                         wfc_ref,    # (Hp, Op)     fc weight (pre-transposed, padded)
                         bfc_ref,    # (1, Op)      fc bias
                         sig_ref,    # out: (Bp, Op) sigmoid(fc(h_T of last layer))
                         hn_ref,     # out: (L, Bp, Hp)
                         cn_ref,     # out: (L, Bp, Hp)
                         seq_buf,    # scratch VMEM (T*Bp, Hp)   layer outputs
                         gates_buf): # scratch VMEM (T*Bp, 4Hp)  precomputed x-projection
    TB, Hp = seq_buf.shape
    L = whh_ref.shape[0]
    Bp = h0_ref.shape[1]
    T = TB // Bp

    h_fin = None
    for layer in range(L):                      # L is small & static -> Python loop
        # ---- hoisted input projection: one big matmul, bias folded in ----
        if layer == 0:
            gates_buf[...] = (
                jnp.dot(x_ref[...], wih0_ref[...],
                        preferred_element_type=jnp.float32) + b_ref[layer])
        else:
            gates_buf[...] = (
                jnp.dot(seq_buf[...], wihL_ref[layer - 1],
                        preferred_element_type=jnp.float32) + b_ref[layer])

        # ---- serial recurrence: only h @ w_hh remains on the critical path ----
        def step(t, carry, layer=layer):
            h, c = carry
            off = pl.multiple_of(t * Bp, Bp)
            g = (gates_buf[pl.ds(off, Bp), :]
                 + jnp.dot(h, whh_ref[layer],
                           preferred_element_type=jnp.float32))   # (Bp, 4Hp)
            i_g = jax.nn.sigmoid(g[:, 0 * Hp:1 * Hp])   # PyTorch gate order i,f,g,o
            f_g = jax.nn.sigmoid(g[:, 1 * Hp:2 * Hp])
            g_g = jnp.tanh(g[:, 2 * Hp:3 * Hp])
            o_g = jax.nn.sigmoid(g[:, 3 * Hp:4 * Hp])
            c_new = f_g * c + i_g * g_g
            h_new = o_g * jnp.tanh(c_new)
            seq_buf[pl.ds(off, Bp), :] = h_new           # feeds the next layer
            return (h_new, c_new)

        h_fin, c_fin = lax.fori_loop(
            0, T, step, (h0_ref[layer], c0_ref[layer]),
            unroll=True if T <= 32 else 4)

        hn_ref[layer] = h_fin
        cn_ref[layer] = c_fin

    # FC + sigmoid on the last layer's final hidden state (only the last
    # timestep survives `sig_out[:, -1]` in the PyTorch forward).
    logits = (jnp.dot(h_fin, wfc_ref[...], preferred_element_type=jnp.float32)
              + bfc_ref[...])
    sig_ref[...] = jax.nn.sigmoid(logits)


def sentiment_rnn_forward(x_ids, params, hidden):
    """Mirrors SentimentRNN.forward: returns (sig_out[:, -1], (h_n, c_n))."""
    emb_table = params["embedding"]             # (V, E)
    w_ih_list = params["w_ih"]                  # list of (4H, E) / (4H, H)
    w_hh_list = params["w_hh"]                  # list of (4H, H)
    b_ih_list = params["b_ih"]                  # list of (4H,)
    b_hh_list = params["b_hh"]                  # list of (4H,)
    w_fc = params["w_fc"]                       # (O, H)
    b_fc = params["b_fc"]                       # (O,)
    h0, c0 = hidden                             # (L, B, H) each

    B, T = x_ids.shape
    V, E = emb_table.shape
    L = len(w_ih_list)
    H = w_hh_list[0].shape[1]
    O = w_fc.shape[0]

    LANE, SUB = 128, 8
    Hp = _round_up(H, LANE)                     # gate slices land on lane boundaries
    Ep = _round_up(E, LANE)
    Op = _round_up(O, LANE)                     # lane-dense output store
    Bp = _round_up(B, SUB)                      # full sublane utilization
    f32 = jnp.float32

    # --- JAX glue: embedding gather, padding, stacking, layout transforms ---
    emb = jnp.take(emb_table, x_ids, axis=0).astype(f32)        # (B, T, E)
    emb = jnp.transpose(emb, (1, 0, 2))                         # (T, B, E) time-major
    emb = jnp.pad(emb, ((0, 0), (0, Bp - B), (0, Ep - E)))      # (T, Bp, Ep)
    x2d = emb.reshape(T * Bp, Ep)                               # (T*Bp, Ep)

    def pack_gate_w(w, in_p):       # (4H, in) -> (in_p, 4Hp), per-gate zero padded
        in_dim = w.shape[1]
        w4 = w.reshape(4, H, in_dim).astype(f32)
        w4 = jnp.pad(w4, ((0, 0), (0, Hp - H), (0, in_p - in_dim)))
        return jnp.transpose(w4, (2, 0, 1)).reshape(in_p, 4 * Hp)

    def pack_bias(bi, bh):          # (4H,) -> (1, 4Hp)
        b4 = (bi + bh).reshape(4, H).astype(f32)
        b4 = jnp.pad(b4, ((0, 0), (0, Hp - H)))
        return b4.reshape(1, 4 * Hp)

    wih0 = pack_gate_w(w_ih_list[0], Ep)                        # (Ep, 4Hp)
    if L > 1:
        wihL = jnp.stack([pack_gate_w(w_ih_list[l], Hp) for l in range(1, L)])
    else:
        wihL = jnp.zeros((1, Hp, 4 * Hp), f32)                  # dummy, never read
    whh = jnp.stack([pack_gate_w(w, Hp) for w in w_hh_list])    # (L, Hp, 4Hp)
    b = jnp.stack([pack_bias(bi, bh)
                   for bi, bh in zip(b_ih_list, b_hh_list)])    # (L, 1, 4Hp)

    h0p = jnp.pad(h0.astype(f32), ((0, 0), (0, Bp - B), (0, Hp - H)))
    c0p = jnp.pad(c0.astype(f32), ((0, 0), (0, Bp - B), (0, Hp - H)))

    wfc = jnp.pad(w_fc.astype(f32), ((0, Op - O), (0, Hp - H))).T    # (Hp, Op)
    bfc = jnp.pad(b_fc.astype(f32), (0, Op - O)).reshape(1, Op)      # (1, Op)

    out_shape = (
        jax.ShapeDtypeStruct((Bp, Op), f32),                    # sigmoid(fc(h_T))
        jax.ShapeDtypeStruct((L, Bp, Hp), f32),                 # h_n (padded)
        jax.ShapeDtypeStruct((L, Bp, Hp), f32),                 # c_n (padded)
    )
    vmem = pl.BlockSpec(memory_space=pltpu.MemorySpace.VMEM)
    scratch_shapes = [
        pltpu.VMEM((T * Bp, Hp), f32),        # layer-output sequence
        pltpu.VMEM((T * Bp, 4 * Hp), f32),    # hoisted input projections
    ]

    ins = (x2d, wih0, wihL, whh, b, h0p, c0p, wfc, bfc)
    in_bytes = sum(int(a.size) * a.dtype.itemsize for a in ins)
    out_bytes = 4 * (Bp * Op + 2 * L * Bp * Hp)
    scratch_bytes = 4 * (T * Bp * Hp + T * Bp * 4 * Hp)
    needed = in_bytes + out_bytes + scratch_bytes
    vmem_limit = int(min(max(2 * needed + (2 << 20), 16 << 20), 64 << 20))

    sig_full, h_n, c_n = pl.pallas_call(
        sentiment_rnn_kernel,
        out_shape=out_shape,
        in_specs=[vmem] * len(ins),
        out_specs=(vmem, vmem, vmem),
        scratch_shapes=scratch_shapes,
        compiler_params=pltpu.CompilerParams(vmem_limit_bytes=vmem_limit),
    )(*ins)

    sig_out = sig_full[:B, :O][:, -1]                           # (B,)
    return sig_out, (h_n[:, :B, :H], c_n[:, :B, :H])


# ----------------------- pure-JAX reference (for checking) -----------------------
def ref_forward(x_ids, params, hidden):
    emb = jnp.take(params["embedding"], x_ids, axis=0)          # (B, T, E)
    h0, c0 = hidden
    L = len(params["w_ih"])
    B, T, _ = emb.shape
    H = params["w_hh"][0].shape[1]
    seq = emb
    hs, cs = [], []
    for l in range(L):
        w_ih, w_hh = params["w_ih"][l], params["w_hh"][l]
        bias = params["b_ih"][l] + params["b_hh"][l]
        h, c = h0[l], c0[l]
        outs = []
        for t in range(T):
            g = seq[:, t, :] @ w_ih.T + h @ w_hh.T + bias
            i = jax.nn.sigmoid(g[:, 0 * H:1 * H])
            f = jax.nn.sigmoid(g[:, 1 * H:2 * H])
            gg = jnp.tanh(g[:, 2 * H:3 * H])
            o = jax.nn.sigmoid(g[:, 3 * H:4 * H])
            c = f * c + i * gg
            h = o * jnp.tanh(c)
            outs.append(h)
        seq = jnp.stack(outs, axis=1)
        hs.append(h)
        cs.append(c)
    lstm_out = seq.reshape(-1, H)
    out = lstm_out @ params["w_fc"].T + params["b_fc"]
    sig = jax.nn.sigmoid(out).reshape(B, -1)
    return sig[:, -1], (jnp.stack(hs), jnp.stack(cs))


# ----------------------- deterministic parameter init -----------------------
def init_params(key, no_layers, vocab_size, hidden_dim, embedding_dim, output_dim):
    H = hidden_dim
    scale = 1.0 / np.sqrt(H)
    keys = iter(jax.random.split(key, 4 + 4 * no_layers))
    params = {
        "embedding": jax.random.normal(next(keys), (vocab_size, embedding_dim),
                                       jnp.float32),
        "w_ih": [], "w_hh": [], "b_ih": [], "b_hh": [],
    }
    for l in range(no_layers):
        in_dim = embedding_dim if l == 0 else H
        params["w_ih"].append(jax.random.uniform(next(keys), (4 * H, in_dim),
                                                 jnp.float32, -scale, scale))
        params["w_hh"].append(jax.random.uniform(next(keys), (4 * H, H),
                                                 jnp.float32, -scale, scale))
        params["b_ih"].append(jax.random.uniform(next(keys), (4 * H,),
                                                 jnp.float32, -scale, scale))
        params["b_hh"].append(jax.random.uniform(next(keys), (4 * H,),
                                                 jnp.float32, -scale, scale))
    params["w_fc"] = jax.random.uniform(next(keys), (output_dim, H),
                                        jnp.float32, -scale, scale)
    params["b_fc"] = jax.random.uniform(next(keys), (output_dim,),
                                        jnp.float32, -scale, scale)
    return params


if __name__ == "__main__":
    no_layers, vocab_size, hidden_dim, embedding_dim, output_dim = 2, 50, 32, 32, 1
    B, T = 2, 8

    key = jax.random.PRNGKey(0)
    k_param, k_data = jax.random.split(key)
    params = init_params(k_param, no_layers, vocab_size, hidden_dim,
                         embedding_dim, output_dim)
    x_ids = jax.random.randint(k_data, (B, T), 0, vocab_size, dtype=jnp.int32)

    # init_hidden
    h0 = jnp.zeros((no_layers, B, hidden_dim), jnp.float32)
    c0 = jnp.zeros((no_layers, B, hidden_dim), jnp.float32)

    sig_out, (h_n, c_n) = sentiment_rnn_forward(x_ids, params, (h0, c0))
    jax.block_until_ready((sig_out, h_n, c_n))

    ref_sig, (ref_h, ref_c) = ref_forward(x_ids, params, (h0, c0))
    np.testing.assert_allclose(np.asarray(sig_out), np.asarray(ref_sig),
                               rtol=1e-4, atol=1e-4)
    np.testing.assert_allclose(np.asarray(h_n), np.asarray(ref_h),
                               rtol=1e-4, atol=1e-4)
    np.testing.assert_allclose(np.asarray(c_n), np.asarray(ref_c),
                               rtol=1e-4, atol=1e-4)

    print("KERNEL_OK")
</pallas_src>

<mosaic_0001>
module attributes {stable_mosaic.version = 11 : i64} {
  func.func @sentiment_rnn_kernel(%arg0: memref<64x128xf32, #tpu.memory_space<vmem>>, %arg1: memref<128x512xf32, #tpu.memory_space<vmem>>, %arg2: memref<1x128x512xf32, #tpu.memory_space<vmem>>, %arg3: memref<2x128x512xf32, #tpu.memory_space<vmem>>, %arg4: memref<2x1x512xf32, #tpu.memory_space<vmem>>, %arg5: memref<2x8x128xf32, #tpu.memory_space<vmem>>, %arg6: memref<2x8x128xf32, #tpu.memory_space<vmem>>, %arg7: memref<128x128xf32, #tpu.memory_space<vmem>>, %arg8: memref<1x128xf32, #tpu.memory_space<vmem>>, %arg9: memref<8x128xf32, #tpu.memory_space<vmem>>, %arg10: memref<2x8x128xf32, #tpu.memory_space<vmem>>, %arg11: memref<2x8x128xf32, #tpu.memory_space<vmem>>, %arg12: memref<64x128xf32, #tpu.memory_space<vmem>>, %arg13: memref<64x512xf32, #tpu.memory_space<vmem>>) attributes {dimension_semantics = [], scalar_prefetch = 0 : i64, scratch_operands = 2 : i64, tpu.core_type = #tpu.core_type<tc>} {
    %c0 = arith.constant 0 : index
    %c0_0 = arith.constant 0 : index
    %0 = vector.load %arg0[%c0, %c0_0] : memref<64x128xf32, #tpu.memory_space<vmem>>, vector<64x128xf32>
    %c0_1 = arith.constant 0 : index
    %c0_2 = arith.constant 0 : index
    %1 = vector.load %arg1[%c0_1, %c0_2] : memref<128x512xf32, #tpu.memory_space<vmem>>, vector<128x512xf32>
    %cst = arith.constant dense<0.000000e+00> : vector<64x512xf32>
    %2 = tpu.matmul %0, %1, %cst {dimension_numbers = #tpu.dot_dimension_numbers<[1], [0], [0], [1], [0, 0, 1, 1], [], []>} : vector<64x128xf32>, vector<128x512xf32>, vector<64x512xf32> -> vector<64x512xf32>
    %c0_3 = arith.constant 0 : index
    %c0_4 = arith.constant 0 : index
    %c0_5 = arith.constant 0 : index
    %3 = vector.load %arg4[%c0_3, %c0_4, %c0_5] : memref<2x1x512xf32, #tpu.memory_space<vmem>>, vector<1x1x512xf32>
    %4 = vector.shape_cast %3 : vector<1x1x512xf32> to vector<1x512xf32>
    %5 = vector.broadcast %4 : vector<1x512xf32> to vector<64x512xf32>
    %6 = arith.addf %2, %5 : vector<64x512xf32>
    %c0_6 = arith.constant 0 : index
    %c0_7 = arith.constant 0 : index
    %7 = vector.load %arg13[%c0_6, %c0_7] : memref<64x512xf32, #tpu.memory_space<vmem>>, vector<64x512xf32>
    tpu.vector_store %arg13[%c0_6, %c0_7], %6 {strides = array<i32>} : memref<64x512xf32, #tpu.memory_space<vmem>>, vector<64x512xf32>,
    %c0_8 = arith.constant 0 : index
    %c0_9 = arith.constant 0 : index
    %c0_10 = arith.constant 0 : index
    %8 = vector.load %arg5[%c0_8, %c0_9, %c0_10] : memref<2x8x128xf32, #tpu.memory_space<vmem>>, vector<1x8x128xf32>
    %9 = vector.shape_cast %8 : vector<1x8x128xf32> to vector<8x128xf32>
    %c0_11 = arith.constant 0 : index
    %c0_12 = arith.constant 0 : index
    %c0_13 = arith.constant 0 : index
    %10 = vector.load %arg6[%c0_11, %c0_12, %c0_13] : memref<2x8x128xf32, #tpu.memory_space<vmem>>, vector<1x8x128xf32>
    %11 = vector.shape_cast %10 : vector<1x8x128xf32> to vector<8x128xf32>
    %c0_i32 = arith.constant 0 : i32
    %c8_i32 = arith.constant 8 : i32
    %12 = arith.muli %c0_i32, %c8_i32 : i32
    %13 = tpu.assume_multiple %12, 8 : i32
    %14 = arith.index_cast %13 : i32 to index
    %c0_14 = arith.constant 0 : index
    %15 = vector.load %arg13[%14, %c0_14] : memref<64x512xf32, #tpu.memory_space<vmem>>, vector<8x512xf32>
    %c0_15 = arith.constant 0 : index
    %c0_16 = arith.constant 0 : index
    %c0_17 = arith.constant 0 : index
    %16 = vector.load %arg3[%c0_15, %c0_16, %c0_17] : memref<2x128x512xf32, #tpu.memory_space<vmem>>, vector<1x128x512xf32>
    %17 = vector.shape_cast %16 : vector<1x128x512xf32> to vector<128x512xf32>
    %cst_18 = arith.constant dense<0.000000e+00> : vector<8x512xf32>
    %18 = tpu.matmul %9, %17, %cst_18 {dimension_numbers = #tpu.dot_dimension_numbers<[1], [0], [0], [1], [0, 0, 1, 1], [], []>} : vector<8x128xf32>, vector<128x512xf32>, vector<8x512xf32> -> vector<8x512xf32>
    %19 = arith.addf %15, %18 : vector<8x512xf32>
    %20 = vector.extract_strided_slice %19 {offsets = [0, 0], sizes = [8, 128], strides = [1, 1]} : vector<8x512xf32> to vector<8x128xf32>
    %21 = arith.negf %20 : vector<8x128xf32>
    %22 = math.exp %21 : vector<8x128xf32>
    %cst_19 = arith.constant 1.000000e+00 : f32
    %23 = vector.broadcast %cst_19 : f32 to vector<8x128xf32>
    %24 = arith.addf %23, %22 : vector<8x128xf32>
    %25 = arith.divf %23, %24 : vector<8x128xf32>
    %26 = vector.extract_strided_slice %19 {offsets = [0, 128], sizes = [8, 128], strides = [1, 1]} : vector<8x512xf32> to vector<8x128xf32>
    %27 = arith.negf %26 : vector<8x128xf32>
    %28 = math.exp %27 : vector<8x128xf32>
    %cst_20 = arith.constant 1.000000e+00 : f32
    %29 = vector.broadcast %cst_20 : f32 to vector<8x128xf32>
    %30 = arith.addf %29, %28 : vector<8x128xf32>
    %31 = arith.divf %29, %30 : vector<8x128xf32>
    %32 = vector.extract_strided_slice %19 {offsets = [0, 256], sizes = [8, 128], strides = [1, 1]} : vector<8x512xf32> to vector<8x128xf32>
    %33 = math.tanh %32 : vector<8x128xf32>
    %34 = vector.extract_strided_slice %19 {offsets = [0, 384], sizes = [8, 128], strides = [1, 1]} : vector<8x512xf32> to vector<8x128xf32>
    %35 = arith.negf %34 : vector<8x128xf32>
    %36 = math.exp %35 : vector<8x128xf32>
    %cst_21 = arith.constant 1.000000e+00 : f32
    %37 = vector.broadcast %cst_21 : f32 to vector<8x128xf32>
    %38 = arith.addf %37, %36 : vector<8x128xf32>
    %39 = arith.divf %37, %38 : vector<8x128xf32>
    %40 = arith.mulf %31, %11 : vector<8x128xf32>
    %41 = arith.mulf %25, %33 : vector<8x128xf32>
    %42 = arith.addf %40, %41 : vector<8x128xf32>
    %43 = math.tanh %42 : vector<8x128xf32>
    %44 = arith.mulf %39, %43 : vector<8x128xf32>
    %45 = arith.index_cast %13 : i32 to index
    %c0_22 = arith.constant 0 : index
    %46 = vector.load %arg12[%45, %c0_22] : memref<64x128xf32, #tpu.memory_space<vmem>>, vector<8x128xf32>
    tpu.vector_store %arg12[%45, %c0_22], %44 {strides = array<i32>} : memref<64x128xf32, #tpu.memory_space<vmem>>, vector<8x128xf32>,
    %c1_i32 = arith.constant 1 : i32
    %c8_i32_23 = arith.constant 8 : i32
    %47 = arith.muli %c1_i32, %c8_i32_23 : i32
    %48 = tpu.assume_multiple %47, 8 : i32
    %49 = arith.index_cast %48 : i32 to index
    %c0_24 = arith.constant 0 : index
    %50 = vector.load %arg13[%49, %c0_24] : memref<64x512xf32, #tpu.memory_space<vmem>>, vector<8x512xf32>
    %c0_25 = arith.constant 0 : index
    %c0_26 = arith.constant 0 : index
    %c0_27 = arith.constant 0 : index
    %51 = vector.load %arg3[%c0_25, %c0_26, %c0_27] : memref<2x128x512xf32, #tpu.memory_space<vmem>>, vector<1x128x512xf32>
    %52 = vector.shape_cast %51 : vector<1x128x512xf32> to vector<128x512xf32>
    %cst_28 = arith.constant dense<0.000000e+00> : vector<8x512xf32>
    %53 = tpu.matmul %44, %52, %cst_28 {dimension_numbers = #tpu.dot_dimension_numbers<[1], [0], [0], [1], [0, 0, 1, 1], [], []>} : vector<8x128xf32>, vector<128x512xf32>, vector<8x512xf32> -> vector<8x512xf32>
    %54 = arith.addf %50, %53 : vector<8x512xf32>
    %55 = vector.extract_strided_slice %54 {offsets = [0, 0], sizes = [8, 128], strides = [1, 1]} : vector<8x512xf32> to vector<8x128xf32>
    %56 = arith.negf %55 : vector<8x128xf32>
    %57 = math.exp %56 : vector<8x128xf32>
    %cst_29 = arith.constant 1.000000e+00 : f32
    %58 = vector.broadcast %cst_29 : f32 to vector<8x128xf32>
    %59 = arith.addf %58, %57 : vector<8x128xf32>
    %60 = arith.divf %58, %59 : vector<8x128xf32>
    %61 = vector.extract_strided_slice %54 {offsets = [0, 128], sizes = [8, 128], strides = [1, 1]} : vector<8x512xf32> to vector<8x128xf32>
    %62 = arith.negf %61 : vector<8x128xf32>
    %63 = math.exp %62 : vector<8x128xf32>
    %cst_30 = arith.constant 1.000000e+00 : f32
    %64 = vector.broadcast %cst_30 : f32 to vector<8x128xf32>
    %65 = arith.addf %64, %63 : vector<8x128xf32>
    %66 = arith.divf %64, %65 : vector<8x128xf32>
    %67 = vector.extract_strided_slice %54 {offsets = [0, 256], sizes = [8, 128], strides = [1, 1]} : vector<8x512xf32> to vector<8x128xf32>
    %68 = math.tanh %67 : vector<8x128xf32>
    %69 = vector.extract_strided_slice %54 {offsets = [0, 384], sizes = [8, 128], strides = [1, 1]} : vector<8x512xf32> to vector<8x128xf32>
    %70 = arith.negf %69 : vector<8x128xf32>
    %71 = math.exp %70 : vector<8x128xf32>
    %cst_31 = arith.constant 1.000000e+00 : f32
    %72 = vector.broadcast %cst_31 : f32 to vector<8x128xf32>
    %73 = arith.addf %72, %71 : vector<8x128xf32>
    %74 = arith.divf %72, %73 : vector<8x128xf32>
    %75 = arith.mulf %66, %42 : vector<8x128xf32>
    %76 = arith.mulf %60, %68 : vector<8x128xf32>
    %77 = arith.addf %75, %76 : vector<8x128xf32>
    %78 = math.tanh %77 : vector<8x128xf32>
    %79 = arith.mulf %74, %78 : vector<8x128xf32>
    %80 = arith.index_cast %48 : i32 to index
    %c0_32 = arith.constant 0 : index
    %81 = vector.load %arg12[%80, %c0_32] : memref<64x128xf32, #tpu.memory_space<vmem>>, vector<8x128xf32>
    tpu.vector_store %arg12[%80, %c0_32], %79 {strides = array<i32>} : memref<64x128xf32, #tpu.memory_space<vmem>>, vector<8x128xf32>,
    %c2_i32 = arith.constant 2 : i32
    %c8_i32_33 = arith.constant 8 : i32
    %82 = arith.muli %c2_i32, %c8_i32_33 : i32
    %83 = tpu.assume_multiple %82, 8 : i32
    %84 = arith.index_cast %83 : i32 to index
    %c0_34 = arith.constant 0 : index
    %85 = vector.load %arg13[%84, %c0_34] : memref<64x512xf32, #tpu.memory_space<vmem>>, vector<8x512xf32>
    %c0_35 = arith.constant 0 : index
    %c0_36 = arith.constant 0 : index
    %c0_37 = arith.constant 0 : index
    %86 = vector.load %arg3[%c0_35, %c0_36, %c0_37] : memref<2x128x512xf32, #tpu.memory_space<vmem>>, vector<1x128x512xf32>
    %87 = vector.shape_cast %86 : vector<1x128x512xf32> to vector<128x512xf32>
    %cst_38 = arith.constant dense<0.000000e+00> : vector<8x512xf32>
    %88 = tpu.matmul %79, %87, %cst_38 {dimension_numbers = #tpu.dot_dimension_numbers<[1], [0], [0], [1], [0, 0, 1, 1], [], []>} : vector<8x128xf32>, vector<128x512xf32>, vector<8x512xf32> -> vector<8x512xf32>
    %89 = arith.addf %85, %88 : vector<8x512xf32>
    %90 = vector.extract_strided_slice %89 {offsets = [0, 0], sizes = [8, 128], strides = [1, 1]} : vector<8x512xf32> to vector<8x128xf32>
    %91 = arith.negf %90 : vector<8x128xf32>
    %92 = math.exp %91 : vector<8x128xf32>
    %cst_39 = arith.constant 1.000000e+00 : f32
    %93 = vector.broadcast %cst_39 : f32 to vector<8x128xf32>
    %94 = arith.addf %93, %92 : vector<8x128xf32>
    %95 = arith.divf %93, %94 : vector<8x128xf32>
    %96 = vector.extract_strided_slice %89 {offsets = [0, 128], sizes = [8, 128], strides = [1, 1]} : vector<8x512xf32> to vector<8x128xf32>
    %97 = arith.negf %96 : vector<8x128xf32>
    %98 = math.exp %97 : vector<8x128xf32>
    %cst_40 = arith.constant 1.000000e+00 : f32
    %99 = vector.broadcast %cst_40 : f32 to vector<8x128xf32>
    %100 = arith.addf %99, %98 : vector<8x128xf32>
    %101 = arith.divf %99, %100 : vector<8x128xf32>
    %102 = vector.extract_strided_slice %89 {offsets = [0, 256], sizes = [8, 128], strides = [1, 1]} : vector<8x512xf32> to vector<8x128xf32>
    %103 = math.tanh %102 : vector<8x128xf32>
    %104 = vector.extract_strided_slice %89 {offsets = [0, 384], sizes = [8, 128], strides = [1, 1]} : vector<8x512xf32> to vector<8x128xf32>
    %105 = arith.negf %104 : vector<8x128xf32>
    %106 = math.exp %105 : vector<8x128xf32>
    %cst_41 = arith.constant 1.000000e+00 : f32
    %107 = vector.broadcast %cst_41 : f32 to vector<8x128xf32>
    %108 = arith.addf %107, %106 : vector<8x128xf32>
    %109 = arith.divf %107, %108 : vector<8x128xf32>
    %110 = arith.mulf %101, %77 : vector<8x128xf32>
    %111 = arith.mulf %95, %103 : vector<8x128xf32>
    %112 = arith.addf %110, %111 : vector<8x128xf32>
    %113 = math.tanh %112 : vector<8x128xf32>
    %114 = arith.mulf %109, %113 : vector<8x128xf32>
    %115 = arith.index_cast %83 : i32 to index
    %c0_42 = arith.constant 0 : index
    %116 = vector.load %arg12[%115, %c0_42] : memref<64x128xf32, #tpu.memory_space<vmem>>, vector<8x128xf32>
    tpu.vector_store %arg12[%115, %c0_42], %114 {strides = array<i32>} : memref<64x128xf32, #tpu.memory_space<vmem>>, vector<8x128xf32>,
    %c3_i32 = arith.constant 3 : i32
    %c8_i32_43 = arith.constant 8 : i32
    %117 = arith.muli %c3_i32, %c8_i32_43 : i32
    %118 = tpu.assume_multiple %117, 8 : i32
    %119 = arith.index_cast %118 : i32 to index
    %c0_44 = arith.constant 0 : index
    %120 = vector.load %arg13[%119, %c0_44] : memref<64x512xf32, #tpu.memory_space<vmem>>, vector<8x512xf32>
    %c0_45 = arith.constant 0 : index
    %c0_46 = arith.constant 0 : index
    %c0_47 = arith.constant 0 : index
    %121 = vector.load %arg3[%c0_45, %c0_46, %c0_47] : memref<2x128x512xf32, #tpu.memory_space<vmem>>, vector<1x128x512xf32>
    %122 = vector.shape_cast %121 : vector<1x128x512xf32> to vector<128x512xf32>
    %cst_48 = arith.constant dense<0.000000e+00> : vector<8x512xf32>
    %123 = tpu.matmul %114, %122, %cst_48 {dimension_numbers = #tpu.dot_dimension_numbers<[1], [0], [0], [1], [0, 0, 1, 1], [], []>} : vector<8x128xf32>, vector<128x512xf32>, vector<8x512xf32> -> vector<8x512xf32>
    %124 = arith.addf %120, %123 : vector<8x512xf32>
    %125 = vector.extract_strided_slice %124 {offsets = [0, 0], sizes = [8, 128], strides = [1, 1]} : vector<8x512xf32> to vector<8x128xf32>
    %126 = arith.negf %125 : vector<8x128xf32>
    %127 = math.exp %126 : vector<8x128xf32>
    %cst_49 = arith.constant 1.000000e+00 : f32
    %128 = vector.broadcast %cst_49 : f32 to vector<8x128xf32>
    %129 = arith.addf %128, %127 : vector<8x128xf32>
    %130 = arith.divf %128, %129 : vector<8x128xf32>
    %131 = vector.extract_strided_slice %124 {offsets = [0, 128], sizes = [8, 128], strides = [1, 1]} : vector<8x512xf32> to vector<8x128xf32>
    %132 = arith.negf %131 : vector<8x128xf32>
    %133 = math.exp %132 : vector<8x128xf32>
    %cst_50 = arith.constant 1.000000e+00 : f32
    %134 = vector.broadcast %cst_50 : f32 to vector<8x128xf32>
    %135 = arith.addf %134, %133 : vector<8x128xf32>
    %136 = arith.divf %134, %135 : vector<8x128xf32>
    %137 = vector.extract_strided_slice %124 {offsets = [0, 256], sizes = [8, 128], strides = [1, 1]} : vector<8x512xf32> to vector<8x128xf32>
    %138 = math.tanh %137 : vector<8x128xf32>
    %139 = vector.extract_strided_slice %124 {offsets = [0, 384], sizes = [8, 128], strides = [1, 1]} : vector<8x512xf32> to vector<8x128xf32>
    %140 = arith.negf %139 : vector<8x128xf32>
    %141 = math.exp %140 : vector<8x128xf32>
    %cst_51 = arith.constant 1.000000e+00 : f32
    %142 = vector.broadcast %cst_51 : f32 to vector<8x128xf32>
    %143 = arith.addf %142, %141 : vector<8x128xf32>
    %144 = arith.divf %142, %143 : vector<8x128xf32>
    %145 = arith.mulf %136, %112 : vector<8x128xf32>
    %146 = arith.mulf %130, %138 : vector<8x128xf32>
    %147 = arith.addf %145, %146 : vector<8x128xf32>
    %148 = math.tanh %147 : vector<8x128xf32>
    %149 = arith.mulf %144, %148 : vector<8x128xf32>
    %150 = arith.index_cast %118 : i32 to index
    %c0_52 = arith.constant 0 : index
    %151 = vector.load %arg12[%150, %c0_52] : memref<64x128xf32, #tpu.memory_space<vmem>>, vector<8x128xf32>
    tpu.vector_store %arg12[%150, %c0_52], %149 {strides = array<i32>} : memref<64x128xf32, #tpu.memory_space<vmem>>, vector<8x128xf32>,
    %c4_i32 = arith.constant 4 : i32
    %c8_i32_53 = arith.constant 8 : i32
    %152 = arith.muli %c4_i32, %c8_i32_53 : i32
    %153 = tpu.assume_multiple %152, 8 : i32
    %154 = arith.index_cast %153 : i32 to index
    %c0_54 = arith.constant 0 : index
    %155 = vector.load %arg13[%154, %c0_54] : memref<64x512xf32, #tpu.memory_space<vmem>>, vector<8x512xf32>
    %c0_55 = arith.constant 0 : index
    %c0_56 = arith.constant 0 : index
    %c0_57 = arith.constant 0 : index
    %156 = vector.load %arg3[%c0_55, %c0_56, %c0_57] : memref<2x128x512xf32, #tpu.memory_space<vmem>>, vector<1x128x512xf32>
    %157 = vector.shape_cast %156 : vector<1x128x512xf32> to vector<128x512xf32>
    %cst_58 = arith.constant dense<0.000000e+00> : vector<8x512xf32>
    %158 = tpu.matmul %149, %157, %cst_58 {dimension_numbers = #tpu.dot_dimension_numbers<[1], [0], [0], [1], [0, 0, 1, 1], [], []>} : vector<8x128xf32>, vector<128x512xf32>, vector<8x512xf32> -> vector<8x512xf32>
    %159 = arith.addf %155, %158 : vector<8x512xf32>
    %160 = vector.extract_strided_slice %159 {offsets = [0, 0], sizes = [8, 128], strides = [1, 1]} : vector<8x512xf32> to vector<8x128xf32>
    %161 = arith.negf %160 : vector<8x128xf32>
    %162 = math.exp %161 : vector<8x128xf32>
    %cst_59 = arith.constant 1.000000e+00 : f32
    %163 = vector.broadcast %cst_59 : f32 to vector<8x128xf32>
    %164 = arith.addf %163, %162 : vector<8x128xf32>
    %165 = arith.divf %163, %164 : vector<8x128xf32>
    %166 = vector.extract_strided_slice %159 {offsets = [0, 128], sizes = [8, 128], strides = [1, 1]} : vector<8x512xf32> to vector<8x128xf32>
    %167 = arith.negf %166 : vector<8x128xf32>
    %168 = math.exp %167 : vector<8x128xf32>
    %cst_60 = arith.constant 1.000000e+00 : f32
    %169 = vector.broadcast %cst_60 : f32 to vector<8x128xf32>
    %170 = arith.addf %169, %168 : vector<8x128xf32>
    %171 = arith.divf %169, %170 : vector<8x128xf32>
    %172 = vector.extract_strided_slice %159 {offsets = [0, 256], sizes = [8, 128], strides = [1, 1]} : vector<8x512xf32> to vector<8x128xf32>
    %173 = math.tanh %172 : vector<8x128xf32>
    %174 = vector.extract_strided_slice %159 {offsets = [0, 384], sizes = [8, 128], strides = [1, 1]} : vector<8x512xf32> to vector<8x128xf32>
    %175 = arith.negf %174 : vector<8x128xf32>
    %176 = math.exp %175 : vector<8x128xf32>
    %cst_61 = arith.constant 1.000000e+00 : f32
    %177 = vector.broadcast %cst_61 : f32 to vector<8x128xf32>
    %178 = arith.addf %177, %176 : vector<8x128xf32>
    %179 = arith.divf %177, %178 : vector<8x128xf32>
    %180 = arith.mulf %171, %147 : vector<8x128xf32>
    %181 = arith.mulf %165, %173 : vector<8x128xf32>
    %182 = arith.addf %180, %181 : vector<8x128xf32>
    %183 = math.tanh %182 : vector<8x128xf32>
    %184 = arith.mulf %179, %183 : vector<8x128xf32>
    %185 = arith.index_cast %153 : i32 to index
    %c0_62 = arith.constant 0 : index
    %186 = vector.load %arg12[%185, %c0_62] : memref<64x128xf32, #tpu.memory_space<vmem>>, vector<8x128xf32>
    tpu.vector_store %arg12[%185, %c0_62], %184 {strides = array<i32>} : memref<64x128xf32, #tpu.memory_space<vmem>>, vector<8x128xf32>,
    %c5_i32 = arith.constant 5 : i32
    %c8_i32_63 = arith.constant 8 : i32
    %187 = arith.muli %c5_i32, %c8_i32_63 : i32
    %188 = tpu.assume_multiple %187, 8 : i32
    %189 = arith.index_cast %188 : i32 to index
    %c0_64 = arith.constant 0 : index
    %190 = vector.load %arg13[%189, %c0_64] : memref<64x512xf32, #tpu.memory_space<vmem>>, vector<8x512xf32>
    %c0_65 = arith.constant 0 : index
    %c0_66 = arith.constant 0 : index
    %c0_67 = arith.constant 0 : index
    %191 = vector.load %arg3[%c0_65, %c0_66, %c0_67] : memref<2x128x512xf32, #tpu.memory_space<vmem>>, vector<1x128x512xf32>
    %192 = vector.shape_cast %191 : vector<1x128x512xf32> to vector<128x512xf32>
    %cst_68 = arith.constant dense<0.000000e+00> : vector<8x512xf32>
    %193 = tpu.matmul %184, %192, %cst_68 {dimension_numbers = #tpu.dot_dimension_numbers<[1], [0], [0], [1], [0, 0, 1, 1], [], []>} : vector<8x128xf32>, vector<128x512xf32>, vector<8x512xf32> -> vector<8x512xf32>
    %194 = arith.addf %190, %193 : vector<8x512xf32>
    %195 = vector.extract_strided_slice %194 {offsets = [0, 0], sizes = [8, 128], strides = [1, 1]} : vector<8x512xf32> to vector<8x128xf32>
    %196 = arith.negf %195 : vector<8x128xf32>
    %197 = math.exp %196 : vector<8x128xf32>
    %cst_69 = arith.constant 1.000000e+00 : f32
    %198 = vector.broadcast %cst_69 : f32 to vector<8x128xf32>
    %199 = arith.addf %198, %197 : vector<8x128xf32>
    %200 = arith.divf %198, %199 : vector<8x128xf32>
    %201 = vector.extract_strided_slice %194 {offsets = [0, 128], sizes = [8, 128], strides = [1, 1]} : vector<8x512xf32> to vector<8x128xf32>
    %202 = arith.negf %201 : vector<8x128xf32>
    %203 = math.exp %202 : vector<8x128xf32>
    %cst_70 = arith.constant 1.000000e+00 : f32
    %204 = vector.broadcast %cst_70 : f32 to vector<8x128xf32>
    %205 = arith.addf %204, %203 : vector<8x128xf32>
    %206 = arith.divf %204, %205 : vector<8x128xf32>
    %207 = vector.extract_strided_slice %194 {offsets = [0, 256], sizes = [8, 128], strides = [1, 1]} : vector<8x512xf32> to vector<8x128xf32>
    %208 = math.tanh %207 : vector<8x128xf32>
    %209 = vector.extract_strided_slice %194 {offsets = [0, 384], sizes = [8, 128], strides = [1, 1]} : vector<8x512xf32> to vector<8x128xf32>
    %210 = arith.negf %209 : vector<8x128xf32>
    %211 = math.exp %210 : vector<8x128xf32>
    %cst_71 = arith.constant 1.000000e+00 : f32
    %212 = vector.broadcast %cst_71 : f32 to vector<8x128xf32>
    %213 = arith.addf %212, %211 : vector<8x128xf32>
    %214 = arith.divf %212, %213 : vector<8x128xf32>
    %215 = arith.mulf %206, %182 : vector<8x128xf32>
    %216 = arith.mulf %200, %208 : vector<8x128xf32>
    %217 = arith.addf %215, %216 : vector<8x128xf32>
    %218 = math.tanh %217 : vector<8x128xf32>
    %219 = arith.mulf %214, %218 : vector<8x128xf32>
    %220 = arith.index_cast %188 : i32 to index
    %c0_72 = arith.constant 0 : index
    %221 = vector.load %arg12[%220, %c0_72] : memref<64x128xf32, #tpu.memory_space<vmem>>, vector<8x128xf32>
    tpu.vector_store %arg12[%220, %c0_72], %219 {strides = array<i32>} : memref<64x128xf32, #tpu.memory_space<vmem>>, vector<8x128xf32>,
    %c6_i32 = arith.constant 6 : i32
    %c8_i32_73 = arith.constant 8 : i32
    %222 = arith.muli %c6_i32, %c8_i32_73 : i32
    %223 = tpu.assume_multiple %222, 8 : i32
    %224 = arith.index_cast %223 : i32 to index
    %c0_74 = arith.constant 0 : index
    %225 = vector.load %arg13[%224, %c0_74] : memref<64x512xf32, #tpu.memory_space<vmem>>, vector<8x512xf32>
    %c0_75 = arith.constant 0 : index
    %c0_76 = arith.constant 0 : index
    %c0_77 = arith.constant 0 : index
    %226 = vector.load %arg3[%c0_75, %c0_76, %c0_77] : memref<2x128x512xf32, #tpu.memory_space<vmem>>, vector<1x128x512xf32>
    %227 = vector.shape_cast %226 : vector<1x128x512xf32> to vector<128x512xf32>
    %cst_78 = arith.constant dense<0.000000e+00> : vector<8x512xf32>
    %228 = tpu.matmul %219, %227, %cst_78 {dimension_numbers = #tpu.dot_dimension_numbers<[1], [0], [0], [1], [0, 0, 1, 1], [], []>} : vector<8x128xf32>, vector<128x512xf32>, vector<8x512xf32> -> vector<8x512xf32>
    %229 = arith.addf %225, %228 : vector<8x512xf32>
    %230 = vector.extract_strided_slice %229 {offsets = [0, 0], sizes = [8, 128], strides = [1, 1]} : vector<8x512xf32> to vector<8x128xf32>
    %231 = arith.negf %230 : vector<8x128xf32>
    %232 = math.exp %231 : vector<8x128xf32>
    %cst_79 = arith.constant 1.000000e+00 : f32
    %233 = vector.broadcast %cst_79 : f32 to vector<8x128xf32>
    %234 = arith.addf %233, %232 : vector<8x128xf32>
    %235 = arith.divf %233, %234 : vector<8x128xf32>
    %236 = vector.extract_strided_slice %229 {offsets = [0, 128], sizes = [8, 128], strides = [1, 1]} : vector<8x512xf32> to vector<8x128xf32>
    %237 = arith.negf %236 : vector<8x128xf32>
    %238 = math.exp %237 : vector<8x128xf32>
    %cst_80 = arith.constant 1.000000e+00 : f32
    %239 = vector.broadcast %cst_80 : f32 to vector<8x128xf32>
    %240 = arith.addf %239, %238 : vector<8x128xf32>
    %241 = arith.divf %239, %240 : vector<8x128xf32>
    %242 = vector.extract_strided_slice %229 {offsets = [0, 256], sizes = [8, 128], strides = [1, 1]} : vector<8x512xf32> to vector<8x128xf32>
    %243 = math.tanh %242 : vector<8x128xf32>
    %244 = vector.extract_strided_slice %229 {offsets = [0, 384], sizes = [8, 128], strides = [1, 1]} : vector<8x512xf32> to vector<8x128xf32>
    %245 = arith.negf %244 : vector<8x128xf32>
    %246 = math.exp %245 : vector<8x128xf32>
    %cst_81 = arith.constant 1.000000e+00 : f32
    %247 = vector.broadcast %cst_81 : f32 to vector<8x128xf32>
    %248 = arith.addf %247, %246 : vector<8x128xf32>
    %249 = arith.divf %247, %248 : vector<8x128xf32>
    %250 = arith.mulf %241, %217 : vector<8x128xf32>
    %251 = arith.mulf %235, %243 : vector<8x128xf32>
    %252 = arith.addf %250, %251 : vector<8x128xf32>
    %253 = math.tanh %252 : vector<8x128xf32>
    %254 = arith.mulf %249, %253 : vector<8x128xf32>
    %255 = arith.index_cast %223 : i32 to index
    %c0_82 = arith.constant 0 : index
    %256 = vector.load %arg12[%255, %c0_82] : memref<64x128xf32, #tpu.memory_space<vmem>>, vector<8x128xf32>
    tpu.vector_store %arg12[%255, %c0_82], %254 {strides = array<i32>} : memref<64x128xf32, #tpu.memory_space<vmem>>, vector<8x128xf32>,
    %c7_i32 = arith.constant 7 : i32
    %c8_i32_83 = arith.constant 8 : i32
    %257 = arith.muli %c7_i32, %c8_i32_83 : i32
    %258 = tpu.assume_multiple %257, 8 : i32
    %259 = arith.index_cast %258 : i32 to index
    %c0_84 = arith.constant 0 : index
    %260 = vector.load %arg13[%259, %c0_84] : memref<64x512xf32, #tpu.memory_space<vmem>>, vector<8x512xf32>
    %c0_85 = arith.constant 0 : index
    %c0_86 = arith.constant 0 : index
    %c0_87 = arith.constant 0 : index
    %261 = vector.load %arg3[%c0_85, %c0_86, %c0_87] : memref<2x128x512xf32, #tpu.memory_space<vmem>>, vector<1x128x512xf32>
    %262 = vector.shape_cast %261 : vector<1x128x512xf32> to vector<128x512xf32>
    %cst_88 = arith.constant dense<0.000000e+00> : vector<8x512xf32>
    %263 = tpu.matmul %254, %262, %cst_88 {dimension_numbers = #tpu.dot_dimension_numbers<[1], [0], [0], [1], [0, 0, 1, 1], [], []>} : vector<8x128xf32>, vector<128x512xf32>, vector<8x512xf32> -> vector<8x512xf32>
    %264 = arith.addf %260, %263 : vector<8x512xf32>
    %265 = vector.extract_strided_slice %264 {offsets = [0, 0], sizes = [8, 128], strides = [1, 1]} : vector<8x512xf32> to vector<8x128xf32>
    %266 = arith.negf %265 : vector<8x128xf32>
    %267 = math.exp %266 : vector<8x128xf32>
    %cst_89 = arith.constant 1.000000e+00 : f32
    %268 = vector.broadcast %cst_89 : f32 to vector<8x128xf32>
    %269 = arith.addf %268, %267 : vector<8x128xf32>
    %270 = arith.divf %268, %269 : vector<8x128xf32>
    %271 = vector.extract_strided_slice %264 {offsets = [0, 128], sizes = [8, 128], strides = [1, 1]} : vector<8x512xf32> to vector<8x128xf32>
    %272 = arith.negf %271 : vector<8x128xf32>
    %273 = math.exp %272 : vector<8x128xf32>
    %cst_90 = arith.constant 1.000000e+00 : f32
    %274 = vector.broadcast %cst_90 : f32 to vector<8x128xf32>
    %275 = arith.addf %274, %273 : vector<8x128xf32>
    %276 = arith.divf %274, %275 : vector<8x128xf32>
    %277 = vector.extract_strided_slice %264 {offsets = [0, 256], sizes = [8, 128], strides = [1, 1]} : vector<8x512xf32> to vector<8x128xf32>
    %278 = math.tanh %277 : vector<8x128xf32>
    %279 = vector.extract_strided_slice %264 {offsets = [0, 384], sizes = [8, 128], strides = [1, 1]} : vector<8x512xf32> to vector<8x128xf32>
    %280 = arith.negf %279 : vector<8x128xf32>
    %281 = math.exp %280 : vector<8x128xf32>
    %cst_91 = arith.constant 1.000000e+00 : f32
    %282 = vector.broadcast %cst_91 : f32 to vector<8x128xf32>
    %283 = arith.addf %282, %281 : vector<8x128xf32>
    %284 = arith.divf %282, %283 : vector<8x128xf32>
    %285 = arith.mulf %276, %252 : vector<8x128xf32>
    %286 = arith.mulf %270, %278 : vector<8x128xf32>
    %287 = arith.addf %285, %286 : vector<8x128xf32>
    %288 = math.tanh %287 : vector<8x128xf32>
    %289 = arith.mulf %284, %288 : vector<8x128xf32>
    %290 = arith.index_cast %258 : i32 to index
    %c0_92 = arith.constant 0 : index
    %291 = vector.load %arg12[%290, %c0_92] : memref<64x128xf32, #tpu.memory_space<vmem>>, vector<8x128xf32>
    tpu.vector_store %arg12[%290, %c0_92], %289 {strides = array<i32>} : memref<64x128xf32, #tpu.memory_space<vmem>>, vector<8x128xf32>,
    %c8_i32_93 = arith.constant 8 : i32
    %c0_94 = arith.constant 0 : index
    %c0_95 = arith.constant 0 : index
    %c0_96 = arith.constant 0 : index
    %292 = vector.load %arg10[%c0_94, %c0_95, %c0_96] : memref<2x8x128xf32, #tpu.memory_space<vmem>>, vector<1x8x128xf32>
    %293 = vector.shape_cast %292 : vector<1x8x128xf32> to vector<8x128xf32>
    %294 = vector.shape_cast %289 : vector<8x128xf32> to vector<1x8x128xf32>
    tpu.vector_store %arg10[%c0_94, %c0_95, %c0_96], %294 {strides = array<i32>} : memref<2x8x128xf32, #tpu.memory_space<vmem>>, vector<1x8x128xf32>,
    %c0_97 = arith.constant 0 : index
    %c0_98 = arith.constant 0 : index
    %c0_99 = arith.constant 0 : index
    %295 = vector.load %arg11[%c0_97, %c0_98, %c0_99] : memref<2x8x128xf32, #tpu.memory_space<vmem>>, vector<1x8x128xf32>
    %296 = vector.shape_cast %295 : vector<1x8x128xf32> to vector<8x128xf32>
    %297 = vector.shape_cast %287 : vector<8x128xf32> to vector<1x8x128xf32>
    tpu.vector_store %arg11[%c0_97, %c0_98, %c0_99], %297 {strides = array<i32>} : memref<2x8x128xf32, #tpu.memory_space<vmem>>, vector<1x8x128xf32>,
    %c0_100 = arith.constant 0 : index
    %c0_101 = arith.constant 0 : index
    %298 = vector.load %arg12[%c0_100, %c0_101] : memref<64x128xf32, #tpu.memory_space<vmem>>, vector<64x128xf32>
    %c0_102 = arith.constant 0 : index
    %c0_103 = arith.constant 0 : index
    %c0_104 = arith.constant 0 : index
    %299 = vector.load %arg2[%c0_102, %c0_103, %c0_104] : memref<1x128x512xf32, #tpu.memory_space<vmem>>, vector<1x128x512xf32>
    %300 = vector.shape_cast %299 : vector<1x128x512xf32> to vector<128x512xf32>
    %cst_105 = arith.constant dense<0.000000e+00> : vector<64x512xf32>
    %301 = tpu.matmul %298, %300, %cst_105 {dimension_numbers = #tpu.dot_dimension_numbers<[1], [0], [0], [1], [0, 0, 1, 1], [], []>} : vector<64x128xf32>, vector<128x512xf32>, vector<64x512xf32> -> vector<64x512xf32>
    %c1 = arith.constant 1 : index
    %c0_106 = arith.constant 0 : index
    %c0_107 = arith.constant 0 : index
    %302 = vector.load %arg4[%c1, %c0_106, %c0_107] : memref<2x1x512xf32, #tpu.memory_space<vmem>>, vector<1x1x512xf32>
    %303 = vector.shape_cast %302 : vector<1x1x512xf32> to vector<1x512xf32>
    %304 = vector.broadcast %303 : vector<1x512xf32> to vector<64x512xf32>
    %305 = arith.addf %301, %304 : vector<64x512xf32>
    %c0_108 = arith.constant 0 : index
    %c0_109 = arith.constant 0 : index
    %306 = vector.load %arg13[%c0_108, %c0_109] : memref<64x512xf32, #tpu.memory_space<vmem>>, vector<64x512xf32>
    tpu.vector_store %arg13[%c0_108, %c0_109], %305 {strides = array<i32>} : memref<64x512xf32, #tpu.memory_space<vmem>>, vector<64x512xf32>,
    %c1_110 = arith.constant 1 : index
    %c0_111 = arith.constant 0 : index
    %c0_112 = arith.constant 0 : index
    %307 = vector.load %arg5[%c1_110, %c0_111, %c0_112] : memref<2x8x128xf32, #tpu.memory_space<vmem>>, vector<1x8x128xf32>
    %308 = vector.shape_cast %307 : vector<1x8x128xf32> to vector<8x128xf32>
    %c1_113 = arith.constant 1 : index
    %c0_114 = arith.constant 0 : index
    %c0_115 = arith.constant 0 : index
    %309 = vector.load %arg6[%c1_113, %c0_114, %c0_115] : memref<2x8x128xf32, #tpu.memory_space<vmem>>, vector<1x8x128xf32>
    %310 = vector.shape_cast %309 : vector<1x8x128xf32> to vector<8x128xf32>
    %c0_i32_116 = arith.constant 0 : i32
    %c8_i32_117 = arith.constant 8 : i32
    %311 = arith.muli %c0_i32_116, %c8_i32_117 : i32
    %312 = tpu.assume_multiple %311, 8 : i32
    %313 = arith.index_cast %312 : i32 to index
    %c0_118 = arith.constant 0 : index
    %314 = vector.load %arg13[%313, %c0_118] : memref<64x512xf32, #tpu.memory_space<vmem>>, vector<8x512xf32>
    %c1_119 = arith.constant 1 : index
    %c0_120 = arith.constant 0 : index
    %c0_121 = arith.constant 0 : index
    %315 = vector.load %arg3[%c1_119, %c0_120, %c0_121] : memref<2x128x512xf32, #tpu.memory_space<vmem>>, vector<1x128x512xf32>
    %316 = vector.shape_cast %315 : vector<1x128x512xf32> to vector<128x512xf32>
    %cst_122 = arith.constant dense<0.000000e+00> : vector<8x512xf32>
    %317 = tpu.matmul %308, %316, %cst_122 {dimension_numbers = #tpu.dot_dimension_numbers<[1], [0], [0], [1], [0, 0, 1, 1], [], []>} : vector<8x128xf32>, vector<128x512xf32>, vector<8x512xf32> -> vector<8x512xf32>
    %318 = arith.addf %314, %317 : vector<8x512xf32>
    %319 = vector.extract_strided_slice %318 {offsets = [0, 0], sizes = [8, 128], strides = [1, 1]} : vector<8x512xf32> to vector<8x128xf32>
    %320 = arith.negf %319 : vector<8x128xf32>
    %321 = math.exp %320 : vector<8x128xf32>
    %cst_123 = arith.constant 1.000000e+00 : f32
    %322 = vector.broadcast %cst_123 : f32 to vector<8x128xf32>
    %323 = arith.addf %322, %321 : vector<8x128xf32>
    %324 = arith.divf %322, %323 : vector<8x128xf32>
    %325 = vector.extract_strided_slice %318 {offsets = [0, 128], sizes = [8, 128], strides = [1, 1]} : vector<8x512xf32> to vector<8x128xf32>
    %326 = arith.negf %325 : vector<8x128xf32>
    %327 = math.exp %326 : vector<8x128xf32>
    %cst_124 = arith.constant 1.000000e+00 : f32
    %328 = vector.broadcast %cst_124 : f32 to vector<8x128xf32>
    %329 = arith.addf %328, %327 : vector<8x128xf32>
    %330 = arith.divf %328, %329 : vector<8x128xf32>
    %331 = vector.extract_strided_slice %318 {offsets = [0, 256], sizes = [8, 128], strides = [1, 1]} : vector<8x512xf32> to vector<8x128xf32>
    %332 = math.tanh %331 : vector<8x128xf32>
    %333 = vector.extract_strided_slice %318 {offsets = [0, 384], sizes = [8, 128], strides = [1, 1]} : vector<8x512xf32> to vector<8x128xf32>
    %334 = arith.negf %333 : vector<8x128xf32>
    %335 = math.exp %334 : vector<8x128xf32>
    %cst_125 = arith.constant 1.000000e+00 : f32
    %336 = vector.broadcast %cst_125 : f32 to vector<8x128xf32>
    %337 = arith.addf %336, %335 : vector<8x128xf32>
    %338 = arith.divf %336, %337 : vector<8x128xf32>
    %339 = arith.mulf %330, %310 : vector<8x128xf32>
    %340 = arith.mulf %324, %332 : vector<8x128xf32>
    %341 = arith.addf %339, %340 : vector<8x128xf32>
    %342 = math.tanh %341 : vector<8x128xf32>
    %343 = arith.mulf %338, %342 : vector<8x128xf32>
    %344 = arith.index_cast %312 : i32 to index
    %c0_126 = arith.constant 0 : index
    %345 = vector.load %arg12[%344, %c0_126] : memref<64x128xf32, #tpu.memory_space<vmem>>, vector<8x128xf32>
    tpu.vector_store %arg12[%344, %c0_126], %343 {strides = array<i32>} : memref<64x128xf32, #tpu.memory_space<vmem>>, vector<8x128xf32>,
    %c1_i32_127 = arith.constant 1 : i32
    %c8_i32_128 = arith.constant 8 : i32
    %346 = arith.muli %c1_i32_127, %c8_i32_128 : i32
    %347 = tpu.assume_multiple %346, 8 : i32
    %348 = arith.index_cast %347 : i32 to index
    %c0_129 = arith.constant 0 : index
    %349 = vector.load %arg13[%348, %c0_129] : memref<64x512xf32, #tpu.memory_space<vmem>>, vector<8x512xf32>
    %c1_130 = arith.constant 1 : index
    %c0_131 = arith.constant 0 : index
    %c0_132 = arith.constant 0 : index
    %350 = vector.load %arg3[%c1_130, %c0_131, %c0_132] : memref<2x128x512xf32, #tpu.memory_space<vmem>>, vector<1x128x512xf32>
    %351 = vector.shape_cast %350 : vector<1x128x512xf32> to vector<128x512xf32>
    %cst_133 = arith.constant dense<0.000000e+00> : vector<8x512xf32>
    %352 = tpu.matmul %343, %351, %cst_133 {dimension_numbers = #tpu.dot_dimension_numbers<[1], [0], [0], [1], [0, 0, 1, 1], [], []>} : vector<8x128xf32>, vector<128x512xf32>, vector<8x512xf32> -> vector<8x512xf32>
    %353 = arith.addf %349, %352 : vector<8x512xf32>
    %354 = vector.extract_strided_slice %353 {offsets = [0, 0], sizes = [8, 128], strides = [1, 1]} : vector<8x512xf32> to vector<8x128xf32>
    %355 = arith.negf %354 : vector<8x128xf32>
    %356 = math.exp %355 : vector<8x128xf32>
    %cst_134 = arith.constant 1.000000e+00 : f32
    %357 = vector.broadcast %cst_134 : f32 to vector<8x128xf32>
    %358 = arith.addf %357, %356 : vector<8x128xf32>
    %359 = arith.divf %357, %358 : vector<8x128xf32>
    %360 = vector.extract_strided_slice %353 {offsets = [0, 128], sizes = [8, 128], strides = [1, 1]} : vector<8x512xf32> to vector<8x128xf32>
    %361 = arith.negf %360 : vector<8x128xf32>
    %362 = math.exp %361 : vector<8x128xf32>
    %cst_135 = arith.constant 1.000000e+00 : f32
    %363 = vector.broadcast %cst_135 : f32 to vector<8x128xf32>
    %364 = arith.addf %363, %362 : vector<8x128xf32>
    %365 = arith.divf %363, %364 : vector<8x128xf32>
    %366 = vector.extract_strided_slice %353 {offsets = [0, 256], sizes = [8, 128], strides = [1, 1]} : vector<8x512xf32> to vector<8x128xf32>
    %367 = math.tanh %366 : vector<8x128xf32>
    %368 = vector.extract_strided_slice %353 {offsets = [0, 384], sizes = [8, 128], strides = [1, 1]} : vector<8x512xf32> to vector<8x128xf32>
    %369 = arith.negf %368 : vector<8x128xf32>
    %370 = math.exp %369 : vector<8x128xf32>
    %cst_136 = arith.constant 1.000000e+00 : f32
    %371 = vector.broadcast %cst_136 : f32 to vector<8x128xf32>
    %372 = arith.addf %371, %370 : vector<8x128xf32>
    %373 = arith.divf %371, %372 : vector<8x128xf32>
    %374 = arith.mulf %365, %341 : vector<8x128xf32>
    %375 = arith.mulf %359, %367 : vector<8x128xf32>
    %376 = arith.addf %374, %375 : vector<8x128xf32>
    %377 = math.tanh %376 : vector<8x128xf32>
    %378 = arith.mulf %373, %377 : vector<8x128xf32>
    %379 = arith.index_cast %347 : i32 to index
    %c0_137 = arith.constant 0 : index
    %380 = vector.load %arg12[%379, %c0_137] : memref<64x128xf32, #tpu.memory_space<vmem>>, vector<8x128xf32>
    tpu.vector_store %arg12[%379, %c0_137], %378 {strides = array<i32>} : memref<64x128xf32, #tpu.memory_space<vmem>>, vector<8x128xf32>,
    %c2_i32_138 = arith.constant 2 : i32
    %c8_i32_139 = arith.constant 8 : i32
    %381 = arith.muli %c2_i32_138, %c8_i32_139 : i32
    %382 = tpu.assume_multiple %381, 8 : i32
    %383 = arith.index_cast %382 : i32 to index
    %c0_140 = arith.constant 0 : index
    %384 = vector.load %arg13[%383, %c0_140] : memref<64x512xf32, #tpu.memory_space<vmem>>, vector<8x512xf32>
    %c1_141 = arith.constant 1 : index
    %c0_142 = arith.constant 0 : index
    %c0_143 = arith.constant 0 : index
    %385 = vector.load %arg3[%c1_141, %c0_142, %c0_143] : memref<2x128x512xf32, #tpu.memory_space<vmem>>, vector<1x128x512xf32>
    %386 = vector.shape_cast %385 : vector<1x128x512xf32> to vector<128x512xf32>
    %cst_144 = arith.constant dense<0.000000e+00> : vector<8x512xf32>
    %387 = tpu.matmul %378, %386, %cst_144 {dimension_numbers = #tpu.dot_dimension_numbers<[1], [0], [0], [1], [0, 0, 1, 1], [], []>} : vector<8x128xf32>, vector<128x512xf32>, vector<8x512xf32> -> vector<8x512xf32>
    %388 = arith.addf %384, %387 : vector<8x512xf32>
    %389 = vector.extract_strided_slice %388 {offsets = [0, 0], sizes = [8, 128], strides = [1, 1]} : vector<8x512xf32> to vector<8x128xf32>
    %390 = arith.negf %389 : vector<8x128xf32>
    %391 = math.exp %390 : vector<8x128xf32>
    %cst_145 = arith.constant 1.000000e+00 : f32
    %392 = vector.broadcast %cst_145 : f32 to vector<8x128xf32>
    %393 = arith.addf %392, %391 : vector<8x128xf32>
    %394 = arith.divf %392, %393 : vector<8x128xf32>
    %395 = vector.extract_strided_slice %388 {offsets = [0, 128], sizes = [8, 128], strides = [1, 1]} : vector<8x512xf32> to vector<8x128xf32>
    %396 = arith.negf %395 : vector<8x128xf32>
    %397 = math.exp %396 : vector<8x128xf32>
    %cst_146 = arith.constant 1.000000e+00 : f32
    %398 = vector.broadcast %cst_146 : f32 to vector<8x128xf32>
    %399 = arith.addf %398, %397 : vector<8x128xf32>
    %400 = arith.divf %398, %399 : vector<8x128xf32>
    %401 = vector.extract_strided_slice %388 {offsets = [0, 256], sizes = [8, 128], strides = [1, 1]} : vector<8x512xf32> to vector<8x128xf32>
    %402 = math.tanh %401 : vector<8x128xf32>
    %403 = vector.extract_strided_slice %388 {offsets = [0, 384], sizes = [8, 128], strides = [1, 1]} : vector<8x512xf32> to vector<8x128xf32>
    %404 = arith.negf %403 : vector<8x128xf32>
    %405 = math.exp %404 : vector<8x128xf32>
    %cst_147 = arith.constant 1.000000e+00 : f32
    %406 = vector.broadcast %cst_147 : f32 to vector<8x128xf32>
    %407 = arith.addf %406, %405 : vector<8x128xf32>
    %408 = arith.divf %406, %407 : vector<8x128xf32>
    %409 = arith.mulf %400, %376 : vector<8x128xf32>
    %410 = arith.mulf %394, %402 : vector<8x128xf32>
    %411 = arith.addf %409, %410 : vector<8x128xf32>
    %412 = math.tanh %411 : vector<8x128xf32>
    %413 = arith.mulf %408, %412 : vector<8x128xf32>
    %414 = arith.index_cast %382 : i32 to index
    %c0_148 = arith.constant 0 : index
    %415 = vector.load %arg12[%414, %c0_148] : memref<64x128xf32, #tpu.memory_space<vmem>>, vector<8x128xf32>
    tpu.vector_store %arg12[%414, %c0_148], %413 {strides = array<i32>} : memref<64x128xf32, #tpu.memory_space<vmem>>, vector<8x128xf32>,
    %c3_i32_149 = arith.constant 3 : i32
    %c8_i32_150 = arith.constant 8 : i32
    %416 = arith.muli %c3_i32_149, %c8_i32_150 : i32
    %417 = tpu.assume_multiple %416, 8 : i32
    %418 = arith.index_cast %417 : i32 to index
    %c0_151 = arith.constant 0 : index
    %419 = vector.load %arg13[%418, %c0_151] : memref<64x512xf32, #tpu.memory_space<vmem>>, vector<8x512xf32>
    %c1_152 = arith.constant 1 : index
    %c0_153 = arith.constant 0 : index
    %c0_154 = arith.constant 0 : index
    %420 = vector.load %arg3[%c1_152, %c0_153, %c0_154] : memref<2x128x512xf32, #tpu.memory_space<vmem>>, vector<1x128x512xf32>
    %421 = vector.shape_cast %420 : vector<1x128x512xf32> to vector<128x512xf32>
    %cst_155 = arith.constant dense<0.000000e+00> : vector<8x512xf32>
    %422 = tpu.matmul %413, %421, %cst_155 {dimension_numbers = #tpu.dot_dimension_numbers<[1], [0], [0], [1], [0, 0, 1, 1], [], []>} : vector<8x128xf32>, vector<128x512xf32>, vector<8x512xf32> -> vector<8x512xf32>
    %423 = arith.addf %419, %422 : vector<8x512xf32>
    %424 = vector.extract_strided_slice %423 {offsets = [0, 0], sizes = [8, 128], strides = [1, 1]} : vector<8x512xf32> to vector<8x128xf32>
    %425 = arith.negf %424 : vector<8x128xf32>
    %426 = math.exp %425 : vector<8x128xf32>
    %cst_156 = arith.constant 1.000000e+00 : f32
    %427 = vector.broadcast %cst_156 : f32 to vector<8x128xf32>
    %428 = arith.addf %427, %426 : vector<8x128xf32>
    %429 = arith.divf %427, %428 : vector<8x128xf32>
    %430 = vector.extract_strided_slice %423 {offsets = [0, 128], sizes = [8, 128], strides = [1, 1]} : vector<8x512xf32> to vector<8x128xf32>
    %431 = arith.negf %430 : vector<8x128xf32>
    %432 = math.exp %431 : vector<8x128xf32>
    %cst_157 = arith.constant 1.000000e+00 : f32
    %433 = vector.broadcast %cst_157 : f32 to vector<8x128xf32>
    %434 = arith.addf %433, %432 : vector<8x128xf32>
    %435 = arith.divf %433, %434 : vector<8x128xf32>
    %436 = vector.extract_strided_slice %423 {offsets = [0, 256], sizes = [8, 128], strides = [1, 1]} : vector<8x512xf32> to vector<8x128xf32>
    %437 = math.tanh %436 : vector<8x128xf32>
    %438 = vector.extract_strided_slice %423 {offsets = [0, 384], sizes = [8, 128], strides = [1, 1]} : vector<8x512xf32> to vector<8x128xf32>
    %439 = arith.negf %438 : vector<8x128xf32>
    %440 = math.exp %439 : vector<8x128xf32>
    %cst_158 = arith.constant 1.000000e+00 : f32
    %441 = vector.broadcast %cst_158 : f32 to vector<8x128xf32>
    %442 = arith.addf %441, %440 : vector<8x128xf32>
    %443 = arith.divf %441, %442 : vector<8x128xf32>
    %444 = arith.mulf %435, %411 : vector<8x128xf32>
    %445 = arith.mulf %429, %437 : vector<8x128xf32>
    %446 = arith.addf %444, %445 : vector<8x128xf32>
    %447 = math.tanh %446 : vector<8x128xf32>
    %448 = arith.mulf %443, %447 : vector<8x128xf32>
    %449 = arith.index_cast %417 : i32 to index
    %c0_159 = arith.constant 0 : index
    %450 = vector.load %arg12[%449, %c0_159] : memref<64x128xf32, #tpu.memory_space<vmem>>, vector<8x128xf32>
    tpu.vector_store %arg12[%449, %c0_159], %448 {strides = array<i32>} : memref<64x128xf32, #tpu.memory_space<vmem>>, vector<8x128xf32>,
    %c4_i32_160 = arith.constant 4 : i32
    %c8_i32_161 = arith.constant 8 : i32
    %451 = arith.muli %c4_i32_160, %c8_i32_161 : i32
    %452 = tpu.assume_multiple %451, 8 : i32
    %453 = arith.index_cast %452 : i32 to index
    %c0_162 = arith.constant 0 : index
    %454 = vector.load %arg13[%453, %c0_162] : memref<64x512xf32, #tpu.memory_space<vmem>>, vector<8x512xf32>
    %c1_163 = arith.constant 1 : index
    %c0_164 = arith.constant 0 : index
    %c0_165 = arith.constant 0 : index
    %455 = vector.load %arg3[%c1_163, %c0_164, %c0_165] : memref<2x128x512xf32, #tpu.memory_space<vmem>>, vector<1x128x512xf32>
    %456 = vector.shape_cast %455 : vector<1x128x512xf32> to vector<128x512xf32>
    %cst_166 = arith.constant dense<0.000000e+00> : vector<8x512xf32>
    %457 = tpu.matmul %448, %456, %cst_166 {dimension_numbers = #tpu.dot_dimension_numbers<[1], [0], [0], [1], [0, 0, 1, 1], [], []>} : vector<8x128xf32>, vector<128x512xf32>, vector<8x512xf32> -> vector<8x512xf32>
    %458 = arith.addf %454, %457 : vector<8x512xf32>
    %459 = vector.extract_strided_slice %458 {offsets = [0, 0], sizes = [8, 128], strides = [1, 1]} : vector<8x512xf32> to vector<8x128xf32>
    %460 = arith.negf %459 : vector<8x128xf32>
    %461 = math.exp %460 : vector<8x128xf32>
    %cst_167 = arith.constant 1.000000e+00 : f32
    %462 = vector.broadcast %cst_167 : f32 to vector<8x128xf32>
    %463 = arith.addf %462, %461 : vector<8x128xf32>
    %464 = arith.divf %462, %463 : vector<8x128xf32>
    %465 = vector.extract_strided_slice %458 {offsets = [0, 128], sizes = [8, 128], strides = [1, 1]} : vector<8x512xf32> to vector<8x128xf32>
    %466 = arith.negf %465 : vector<8x128xf32>
    %467 = math.exp %466 : vector<8x128xf32>
    %cst_168 = arith.constant 1.000000e+00 : f32
    %468 = vector.broadcast %cst_168 : f32 to vector<8x128xf32>
    %469 = arith.addf %468, %467 : vector<8x128xf32>
    %470 = arith.divf %468, %469 : vector<8x128xf32>
    %471 = vector.extract_strided_slice %458 {offsets = [0, 256], sizes = [8, 128], strides = [1, 1]} : vector<8x512xf32> to vector<8x128xf32>
    %472 = math.tanh %471 : vector<8x128xf32>
    %473 = vector.extract_strided_slice %458 {offsets = [0, 384], sizes = [8, 128], strides = [1, 1]} : vector<8x512xf32> to vector<8x128xf32>
    %474 = arith.negf %473 : vector<8x128xf32>
    %475 = math.exp %474 : vector<8x128xf32>
    %cst_169 = arith.constant 1.000000e+00 : f32
    %476 = vector.broadcast %cst_169 : f32 to vector<8x128xf32>
    %477 = arith.addf %476, %475 : vector<8x128xf32>
    %478 = arith.divf %476, %477 : vector<8x128xf32>
    %479 = arith.mulf %470, %446 : vector<8x128xf32>
    %480 = arith.mulf %464, %472 : vector<8x128xf32>
    %481 = arith.addf %479, %480 : vector<8x128xf32>
    %482 = math.tanh %481 : vector<8x128xf32>
    %483 = arith.mulf %478, %482 : vector<8x128xf32>
    %484 = arith.index_cast %452 : i32 to index
    %c0_170 = arith.constant 0 : index
    %485 = vector.load %arg12[%484, %c0_170] : memref<64x128xf32, #tpu.memory_space<vmem>>, vector<8x128xf32>
    tpu.vector_store %arg12[%484, %c0_170], %483 {strides = array<i32>} : memref<64x128xf32, #tpu.memory_space<vmem>>, vector<8x128xf32>,
    %c5_i32_171 = arith.constant 5 : i32
    %c8_i32_172 = arith.constant 8 : i32
    %486 = arith.muli %c5_i32_171, %c8_i32_172 : i32
    %487 = tpu.assume_multiple %486, 8 : i32
    %488 = arith.index_cast %487 : i32 to index
    %c0_173 = arith.constant 0 : index
    %489 = vector.load %arg13[%488, %c0_173] : memref<64x512xf32, #tpu.memory_space<vmem>>, vector<8x512xf32>
    %c1_174 = arith.constant 1 : index
    %c0_175 = arith.constant 0 : index
    %c0_176 = arith.constant 0 : index
    %490 = vector.load %arg3[%c1_174, %c0_175, %c0_176] : memref<2x128x512xf32, #tpu.memory_space<vmem>>, vector<1x128x512xf32>
    %491 = vector.shape_cast %490 : vector<1x128x512xf32> to vector<128x512xf32>
    %cst_177 = arith.constant dense<0.000000e+00> : vector<8x512xf32>
    %492 = tpu.matmul %483, %491, %cst_177 {dimension_numbers = #tpu.dot_dimension_numbers<[1], [0], [0], [1], [0, 0, 1, 1], [], []>} : vector<8x128xf32>, vector<128x512xf32>, vector<8x512xf32> -> vector<8x512xf32>
    %493 = arith.addf %489, %492 : vector<8x512xf32>
    %494 = vector.extract_strided_slice %493 {offsets = [0, 0], sizes = [8, 128], strides = [1, 1]} : vector<8x512xf32> to vector<8x128xf32>
    %495 = arith.negf %494 : vector<8x128xf32>
    %496 = math.exp %495 : vector<8x128xf32>
    %cst_178 = arith.constant 1.000000e+00 : f32
    %497 = vector.broadcast %cst_178 : f32 to vector<8x128xf32>
    %498 = arith.addf %497, %496 : vector<8x128xf32>
    %499 = arith.divf %497, %498 : vector<8x128xf32>
    %500 = vector.extract_strided_slice %493 {offsets = [0, 128], sizes = [8, 128], strides = [1, 1]} : vector<8x512xf32> to vector<8x128xf32>
    %501 = arith.negf %500 : vector<8x128xf32>
    %502 = math.exp %501 : vector<8x128xf32>
    %cst_179 = arith.constant 1.000000e+00 : f32
    %503 = vector.broadcast %cst_179 : f32 to vector<8x128xf32>
    %504 = arith.addf %503, %502 : vector<8x128xf32>
    %505 = arith.divf %503, %504 : vector<8x128xf32>
    %506 = vector.extract_strided_slice %493 {offsets = [0, 256], sizes = [8, 128], strides = [1, 1]} : vector<8x512xf32> to vector<8x128xf32>
    %507 = math.tanh %506 : vector<8x128xf32>
    %508 = vector.extract_strided_slice %493 {offsets = [0, 384], sizes = [8, 128], strides = [1, 1]} : vector<8x512xf32> to vector<8x128xf32>
    %509 = arith.negf %508 : vector<8x128xf32>
    %510 = math.exp %509 : vector<8x128xf32>
    %cst_180 = arith.constant 1.000000e+00 : f32
    %511 = vector.broadcast %cst_180 : f32 to vector<8x128xf32>
    %512 = arith.addf %511, %510 : vector<8x128xf32>
    %513 = arith.divf %511, %512 : vector<8x128xf32>
    %514 = arith.mulf %505, %481 : vector<8x128xf32>
    %515 = arith.mulf %499, %507 : vector<8x128xf32>
    %516 = arith.addf %514, %515 : vector<8x128xf32>
    %517 = math.tanh %516 : vector<8x128xf32>
    %518 = arith.mulf %513, %517 : vector<8x128xf32>
    %519 = arith.index_cast %487 : i32 to index
    %c0_181 = arith.constant 0 : index
    %520 = vector.load %arg12[%519, %c0_181] : memref<64x128xf32, #tpu.memory_space<vmem>>, vector<8x128xf32>
    tpu.vector_store %arg12[%519, %c0_181], %518 {strides = array<i32>} : memref<64x128xf32, #tpu.memory_space<vmem>>, vector<8x128xf32>,
    %c6_i32_182 = arith.constant 6 : i32
    %c8_i32_183 = arith.constant 8 : i32
    %521 = arith.muli %c6_i32_182, %c8_i32_183 : i32
    %522 = tpu.assume_multiple %521, 8 : i32
    %523 = arith.index_cast %522 : i32 to index
    %c0_184 = arith.constant 0 : index
    %524 = vector.load %arg13[%523, %c0_184] : memref<64x512xf32, #tpu.memory_space<vmem>>, vector<8x512xf32>
    %c1_185 = arith.constant 1 : index
    %c0_186 = arith.constant 0 : index
    %c0_187 = arith.constant 0 : index
    %525 = vector.load %arg3[%c1_185, %c0_186, %c0_187] : memref<2x128x512xf32, #tpu.memory_space<vmem>>, vector<1x128x512xf32>
    %526 = vector.shape_cast %525 : vector<1x128x512xf32> to vector<128x512xf32>
    %cst_188 = arith.constant dense<0.000000e+00> : vector<8x512xf32>
    %527 = tpu.matmul %518, %526, %cst_188 {dimension_numbers = #tpu.dot_dimension_numbers<[1], [0], [0], [1], [0, 0, 1, 1], [], []>} : vector<8x128xf32>, vector<128x512xf32>, vector<8x512xf32> -> vector<8x512xf32>
    %528 = arith.addf %524, %527 : vector<8x512xf32>
    %529 = vector.extract_strided_slice %528 {offsets = [0, 0], sizes = [8, 128], strides = [1, 1]} : vector<8x512xf32> to vector<8x128xf32>
    %530 = arith.negf %529 : vector<8x128xf32>
    %531 = math.exp %530 : vector<8x128xf32>
    %cst_189 = arith.constant 1.000000e+00 : f32
    %532 = vector.broadcast %cst_189 : f32 to vector<8x128xf32>
    %533 = arith.addf %532, %531 : vector<8x128xf32>
    %534 = arith.divf %532, %533 : vector<8x128xf32>
    %535 = vector.extract_strided_slice %528 {offsets = [0, 128], sizes = [8, 128], strides = [1, 1]} : vector<8x512xf32> to vector<8x128xf32>
    %536 = arith.negf %535 : vector<8x128xf32>
    %537 = math.exp %536 : vector<8x128xf32>
    %cst_190 = arith.constant 1.000000e+00 : f32
    %538 = vector.broadcast %cst_190 : f32 to vector<8x128xf32>
    %539 = arith.addf %538, %537 : vector<8x128xf32>
    %540 = arith.divf %538, %539 : vector<8x128xf32>
    %541 = vector.extract_strided_slice %528 {offsets = [0, 256], sizes = [8, 128], strides = [1, 1]} : vector<8x512xf32> to vector<8x128xf32>
    %542 = math.tanh %541 : vector<8x128xf32>
    %543 = vector.extract_strided_slice %528 {offsets = [0, 384], sizes = [8, 128], strides = [1, 1]} : vector<8x512xf32> to vector<8x128xf32>
    %544 = arith.negf %543 : vector<8x128xf32>
    %545 = math.exp %544 : vector<8x128xf32>
    %cst_191 = arith.constant 1.000000e+00 : f32
    %546 = vector.broadcast %cst_191 : f32 to vector<8x128xf32>
    %547 = arith.addf %546, %545 : vector<8x128xf32>
    %548 = arith.divf %546, %547 : vector<8x128xf32>
    %549 = arith.mulf %540, %516 : vector<8x128xf32>
    %550 = arith.mulf %534, %542 : vector<8x128xf32>
    %551 = arith.addf %549, %550 : vector<8x128xf32>
    %552 = math.tanh %551 : vector<8x128xf32>
    %553 = arith.mulf %548, %552 : vector<8x128xf32>
    %554 = arith.index_cast %522 : i32 to index
    %c0_192 = arith.constant 0 : index
    %555 = vector.load %arg12[%554, %c0_192] : memref<64x128xf32, #tpu.memory_space<vmem>>, vector<8x128xf32>
    tpu.vector_store %arg12[%554, %c0_192], %553 {strides = array<i32>} : memref<64x128xf32, #tpu.memory_space<vmem>>, vector<8x128xf32>,
    %c7_i32_193 = arith.constant 7 : i32
    %c8_i32_194 = arith.constant 8 : i32
    %556 = arith.muli %c7_i32_193, %c8_i32_194 : i32
    %557 = tpu.assume_multiple %556, 8 : i32
    %558 = arith.index_cast %557 : i32 to index
    %c0_195 = arith.constant 0 : index
    %559 = vector.load %arg13[%558, %c0_195] : memref<64x512xf32, #tpu.memory_space<vmem>>, vector<8x512xf32>
    %c1_196 = arith.constant 1 : index
    %c0_197 = arith.constant 0 : index
    %c0_198 = arith.constant 0 : index
    %560 = vector.load %arg3[%c1_196, %c0_197, %c0_198] : memref<2x128x512xf32, #tpu.memory_space<vmem>>, vector<1x128x512xf32>
    %561 = vector.shape_cast %560 : vector<1x128x512xf32> to vector<128x512xf32>
    %cst_199 = arith.constant dense<0.000000e+00> : vector<8x512xf32>
    %562 = tpu.matmul %553, %561, %cst_199 {dimension_numbers = #tpu.dot_dimension_numbers<[1], [0], [0], [1], [0, 0, 1, 1], [], []>} : vector<8x128xf32>, vector<128x512xf32>, vector<8x512xf32> -> vector<8x512xf32>
    %563 = arith.addf %559, %562 : vector<8x512xf32>
    %564 = vector.extract_strided_slice %563 {offsets = [0, 0], sizes = [8, 128], strides = [1, 1]} : vector<8x512xf32> to vector<8x128xf32>
    %565 = arith.negf %564 : vector<8x128xf32>
    %566 = math.exp %565 : vector<8x128xf32>
    %cst_200 = arith.constant 1.000000e+00 : f32
    %567 = vector.broadcast %cst_200 : f32 to vector<8x128xf32>
    %568 = arith.addf %567, %566 : vector<8x128xf32>
    %569 = arith.divf %567, %568 : vector<8x128xf32>
    %570 = vector.extract_strided_slice %563 {offsets = [0, 128], sizes = [8, 128], strides = [1, 1]} : vector<8x512xf32> to vector<8x128xf32>
    %571 = arith.negf %570 : vector<8x128xf32>
    %572 = math.exp %571 : vector<8x128xf32>
    %cst_201 = arith.constant 1.000000e+00 : f32
    %573 = vector.broadcast %cst_201 : f32 to vector<8x128xf32>
    %574 = arith.addf %573, %572 : vector<8x128xf32>
    %575 = arith.divf %573, %574 : vector<8x128xf32>
    %576 = vector.extract_strided_slice %563 {offsets = [0, 256], sizes = [8, 128], strides = [1, 1]} : vector<8x512xf32> to vector<8x128xf32>
    %577 = math.tanh %576 : vector<8x128xf32>
    %578 = vector.extract_strided_slice %563 {offsets = [0, 384], sizes = [8, 128], strides = [1, 1]} : vector<8x512xf32> to vector<8x128xf32>
    %579 = arith.negf %578 : vector<8x128xf32>
    %580 = math.exp %579 : vector<8x128xf32>
    %cst_202 = arith.constant 1.000000e+00 : f32
    %581 = vector.broadcast %cst_202 : f32 to vector<8x128xf32>
    %582 = arith.addf %581, %580 : vector<8x128xf32>
    %583 = arith.divf %581, %582 : vector<8x128xf32>
    %584 = arith.mulf %575, %551 : vector<8x128xf32>
    %585 = arith.mulf %569, %577 : vector<8x128xf32>
    %586 = arith.addf %584, %585 : vector<8x128xf32>
    %587 = math.tanh %586 : vector<8x128xf32>
    %588 = arith.mulf %583, %587 : vector<8x128xf32>
    %589 = arith.index_cast %557 : i32 to index
    %c0_203 = arith.constant 0 : index
    %590 = vector.load %arg12[%589, %c0_203] : memref<64x128xf32, #tpu.memory_space<vmem>>, vector<8x128xf32>
    tpu.vector_store %arg12[%589, %c0_203], %588 {strides = array<i32>} : memref<64x128xf32, #tpu.memory_space<vmem>>, vector<8x128xf32>,
    %c8_i32_204 = arith.constant 8 : i32
    %c1_205 = arith.constant 1 : index
    %c0_206 = arith.constant 0 : index
    %c0_207 = arith.constant 0 : index
    %591 = vector.load %arg10[%c1_205, %c0_206, %c0_207] : memref<2x8x128xf32, #tpu.memory_space<vmem>>, vector<1x8x128xf32>
    %592 = vector.shape_cast %591 : vector<1x8x128xf32> to vector<8x128xf32>
    %593 = vector.shape_cast %588 : vector<8x128xf32> to vector<1x8x128xf32>
    tpu.vector_store %arg10[%c1_205, %c0_206, %c0_207], %593 {strides = array<i32>} : memref<2x8x128xf32, #tpu.memory_space<vmem>>, vector<1x8x128xf32>,
    %c1_208 = arith.constant 1 : index
    %c0_209 = arith.constant 0 : index
    %c0_210 = arith.constant 0 : index
    %594 = vector.load %arg11[%c1_208, %c0_209, %c0_210] : memref<2x8x128xf32, #tpu.memory_space<vmem>>, vector<1x8x128xf32>
    %595 = vector.shape_cast %594 : vector<1x8x128xf32> to vector<8x128xf32>
    %596 = vector.shape_cast %586 : vector<8x128xf32> to vector<1x8x128xf32>
    tpu.vector_store %arg11[%c1_208, %c0_209, %c0_210], %596 {strides = array<i32>} : memref<2x8x128xf32, #tpu.memory_space<vmem>>, vector<1x8x128xf32>,
    %c0_211 = arith.constant 0 : index
    %c0_212 = arith.constant 0 : index
    %597 = vector.load %arg7[%c0_211, %c0_212] : memref<128x128xf32, #tpu.memory_space<vmem>>, vector<128x128xf32>
    %cst_213 = arith.constant dense<0.000000e+00> : vector<8x128xf32>
    %598 = tpu.matmul %588, %597, %cst_213 {dimension_numbers = #tpu.dot_dimension_numbers<[1], [0], [0], [1], [0, 0, 1, 1], [], []>} : vector<8x128xf32>, vector<128x128xf32>, vector<8x128xf32> -> vector<8x128xf32>
    %c0_214 = arith.constant 0 : index
    %c0_215 = arith.constant 0 : index
    %599 = vector.load %arg8[%c0_214, %c0_215] : memref<1x128xf32, #tpu.memory_space<vmem>>, vector<1x128xf32>
    %600 = vector.broadcast %599 : vector<1x128xf32> to vector<8x128xf32>
    %601 = arith.addf %598, %600 : vector<8x128xf32>
    %602 = arith.negf %601 : vector<8x128xf32>
    %603 = math.exp %602 : vector<8x128xf32>
    %cst_216 = arith.constant 1.000000e+00 : f32
    %604 = vector.broadcast %cst_216 : f32 to vector<8x128xf32>
    %605 = arith.addf %604, %603 : vector<8x128xf32>
    %606 = arith.divf %604, %605 : vector<8x128xf32>
    %c0_217 = arith.constant 0 : index
    %c0_218 = arith.constant 0 : index
    %607 = vector.load %arg9[%c0_217, %c0_218] : memref<8x128xf32, #tpu.memory_space<vmem>>, vector<8x128xf32>
    tpu.vector_store %arg9[%c0_217, %c0_218], %606 {strides = array<i32>} : memref<8x128xf32, #tpu.memory_space<vmem>>, vector<8x128xf32>,
    return
  }
}

</mosaic_0001>

<bundles_post_ra>
// kernel: tpu_custom_call.1
= control target key start
LH: loop header
LB: loop body
LE: loop exit
PB: predicated region body
PF: predicated region fallthrough
CT: control target
= control target key end

     0   :  { %17 = vsyncpa [#allocation5], 0  ;;  %s8050_s0 = inlined_call_operand.hbm [shape: f32[64,128], index: 0, kind: input, shape index: {}]   ;;  %s8051_s1 = inlined_call_operand.hbm [shape: f32[128,512], index: 1, kind: input, shape index: {}]   ;;  %s8052_s2 = inlined_call_operand.hbm [shape: f32[1,128,512], index: 2, kind: input, shape index: {}]   ;;  %s8053_s3 = inlined_call_operand.hbm [shape: f32[2,128,512], index: 3, kind: input, shape index: {}]   ;;  %s8054_s4 = inlined_call_operand.hbm [shape: f32[2,1,512], index: 4, kind: input, shape index: {}]   ;;  %s8055_s5 = inlined_call_operand.vmem [shape: f32[2,8,128], index: 5, kind: input, shape index: {}]   ;;  %s8056_s6 = inlined_call_operand.hbm [shape: f32[2,8,128], index: 6, kind: input, shape index: {}]   ;;  %s8057_s7 = inlined_call_operand.hbm [shape: f32[128,128], index: 7, kind: input, shape index: {}]   ;;  %s8058_s8 = inlined_call_operand.vmem [shape: f32[1,128], index: 8, kind: input, shape index: {}]   ;;  %s8059_s9 = inlined_call_operand.hbm [shape: f32[8,128], index: 9, kind: output, shape index: {0}]   ;;  %s8060_s10 = inlined_call_operand.hbm [shape: f32[2,8,128], index: 10, kind: output, shape index: {1}]   ;;  %s8061_s11 = inlined_call_operand.hbm [shape: f32[2,8,128], index: 11, kind: output, shape index: {2}]  }
   0x1   :  { %18 = vsyncpa [#allocation8], 0 }
   0x2   :  { %19 = vsyncpa [#allocation11], 0 }
   0x3   :  { %20 = vsyncpa [#allocation14], 0 }
   0x4   :  { %21 = vsyncpa [#allocation6], 0 }
   0x5   :  { %22 = vsyncpa [#allocation18], 0  ;;  %s6779_s17 = smov [#allocation7]   ;;  %s6547_s21 = scalar_lea.hbm %s8051_s1, 8192 }
   0x6   :  { %s40_s18 = sshll.u32 %s6779_s17, 4  ;;  %p6548_p0 = scmp.ne.s32.totalorder %s8051_s1, %s6547_s21  ;;  %s41_s18 = int_to_ptr.vmem [resolvable:$true] %s40_s18 }
   0x7   :  { %p6551_p1 = scmp.lt.u32.totalorder %s6547_s21, %s8051_s1 }
   0x9   :  { %p6553_p2 = pnand %p6551_p1, %p6548_p0 }
   0xb   :  { %6556 = shalt.err (!%p6553_p2)
}
   0xc   :  { %s6557_s26 = scalar_lea.vmem %s41_s18, 8192  ;;  %p6562_p4 = scmp.lt.s32.totalorder %s41_s18, %s41_s18 }
   0xd   :  { %p6558_p3 = scmp.ne.s32.totalorder %s41_s18, %s6557_s26  ;;  %p6563_p5 = scmp.lt.s32.totalorder %s6557_s26, %s6557_s26 }
   0xf   :  { %p6564_p6 = por %p6563_p5, %p6562_p4 }
  0x11   :  { %p6565_p7 = pnand %p6564_p6, %p6558_p3 }
  0x13   :  { %6568 = shalt.err (!%p6565_p7)
}
  0x14   :  { %s6780_s27 = smov 512   ;;  %s6781_s28 = smov 32  }
  0x15   :  { %46 = dma.hbm_to_vmem [thread:$0]  %s8051_s1, 8192, %s41_s18, [#allocation8], %s6780_s27, %s6780_s27, %s6781_s28  }
  0x16   :  { %s6782_s12 = smov [#allocation10]   ;;  %s6569_s16 = scalar_lea.hbm %s8053_s3, 16384 }
  0x17   :  { %s64_s13 = sshll.u32 %s6782_s12, 4  ;;  %p6570_p8 = scmp.ne.s32.totalorder %s8053_s3, %s6569_s16  ;;  %s65_s13 = int_to_ptr.vmem [resolvable:$true] %s64_s13 }
  0x18   :  { %p6573_p9 = scmp.lt.u32.totalorder %s6569_s16, %s8053_s3 }
  0x1a   :  { %p6575_p10 = pnand %p6573_p9, %p6570_p8 }
  0x1c   :  { %6578 = shalt.err (!%p6575_p10)
}
  0x1d   :  { %s6579_s22 = scalar_lea.vmem %s65_s13, 16384  ;;  %p6584_p12 = scmp.lt.s32.totalorder %s65_s13, %s65_s13 }
  0x1e   :  { %p6580_p11 = scmp.ne.s32.totalorder %s65_s13, %s6579_s22  ;;  %p6585_p13 = scmp.lt.s32.totalorder %s6579_s22, %s6579_s22 }
  0x20   :  { %p6586_p0 = por %p6585_p13, %p6584_p12 }
  0x22   :  { %p6587_p1 = pnand %p6586_p0, %p6580_p11 }
  0x24   :  { %6590 = shalt.err (!%p6587_p1)
}
  0x25   :  { %70 = dma.hbm_to_vmem [thread:$0]  %s8053_s3, 16384, %s65_s13, [#allocation11], %s6780_s27, %s6780_s27, %s6781_s28  }
  0x26   :  { %s6783_s23 = smov [#allocation13]   ;;  %s6784_s25 = smov [#allocation4]  }
  0x27   :  { %s90_s24 = sshll.u32 %s6783_s23, 4  ;;  %s28_s26 = sshll.u32 %s6784_s25, 4  ;;  %s91_s24 = int_to_ptr.vmem [resolvable:$true] %s90_s24  ;;  %s6888_s26 = int_to_ptr.vmem [resolvable:$true] %s28_s26 }
  0x28   :  { %s6591_s12 = scalar_lea.hbm %s8056_s6, 256 }
  0x29   :  { %p6592_p2 = scmp.ne.s32.totalorder %s8056_s6, %s6591_s12  ;;  %p6595_p3 = scmp.lt.u32.totalorder %s6591_s12, %s8056_s6 }
  0x2b   :  { %p6597_p4 = pnand %p6595_p3, %p6592_p2 }
  0x2d   :  { %6600 = shalt.err (!%p6597_p4)
}
  0x2e   :  { %s6601_s3 = scalar_lea.vmem %s91_s24, 256  ;;  %p6606_p6 = scmp.lt.s32.totalorder %s91_s24, %s91_s24 }
  0x2f   :  { %p6602_p5 = scmp.ne.s32.totalorder %s91_s24, %s6601_s3  ;;  %p6607_p7 = scmp.lt.s32.totalorder %s6601_s3, %s6601_s3 }
  0x31   :  { %p6608_p8 = por %p6607_p7, %p6606_p6 }
  0x33   :  { %p6609_p9 = pnand %p6608_p8, %p6602_p5 }
  0x35   :  { %6612 = shalt.err (!%p6609_p9)
}
  0x36   :  { %s6785_s13 = smov 128   ;;  %s6786_s19 = smov 8  }
  0x37   :  { %96 = dma.hbm_to_vmem [thread:$0]  %s8056_s6, 256, %s91_s24, [#allocation14], %s6785_s13, %s6785_s13, %s6786_s19  }
  0x38   :  { %s6613_s18 = scalar_lea.hbm %s8050_s0, 1024 }
  0x39   :  { %p6614_p10 = scmp.ne.s32.totalorder %s8050_s0, %s6613_s18  ;;  %p6617_p11 = scmp.lt.u32.totalorder %s6613_s18, %s8050_s0 }
  0x3b   :  { %p6619_p12 = pnand %p6617_p11, %p6614_p10 }
  0x3d   :  { %6622 = shalt.err (!%p6619_p12)
}
  0x3e   :  { %s6623_s12 = scalar_lea.vmem %s6888_s26, 1024  ;;  %p6628_p0 = scmp.lt.s32.totalorder %s6888_s26, %s6888_s26 }
  0x3f   :  { %p6624_p13 = scmp.ne.s32.totalorder %s6888_s26, %s6623_s12  ;;  %p6629_p1 = scmp.lt.s32.totalorder %s6623_s12, %s6623_s12 }
  0x41   :  { %p6630_p2 = por %p6629_p1, %p6628_p0 }
  0x43   :  { %p6631_p3 = pnand %p6630_p2, %p6624_p13 }
  0x45   :  { %6634 = shalt.err (!%p6631_p3)
}
  0x46   :  { %34 = dma.hbm_to_vmem [thread:$0]  %s8050_s0, 1024, %s6888_s26, [#allocation5], %s6785_s13, %s6785_s13, %s6786_s19  }
  0x47   :  { %s6787_s14 = smov [#allocation9]   ;;  %s6788_s16 = smov [#allocation12]  }
  0x48   :  { %s52_s15 = sshll.u32 %s6787_s14, 4  ;;  %s76_s17 = sshll.u32 %s6788_s16, 4  ;;  %s53_s15 = int_to_ptr.vmem [resolvable:$true] %s52_s15  ;;  %s6925_s17 = int_to_ptr.vmem [resolvable:$true] %s76_s17 }
  0x49   :  { %s6635_s21 = scalar_lea.hbm %s8052_s2, 8192 }
  0x4a   :  { %p6636_p4 = scmp.ne.s32.totalorder %s8052_s2, %s6635_s21  ;;  %p6639_p5 = scmp.lt.u32.totalorder %s6635_s21, %s8052_s2 }
  0x4c   :  { %p6641_p6 = pnand %p6639_p5, %p6636_p4 }
  0x4e   :  { %6644 = shalt.err (!%p6641_p6)
}
  0x4f   :  { %s6645_s0 = scalar_lea.vmem %s53_s15, 8192  ;;  %p6650_p8 = scmp.lt.s32.totalorder %s53_s15, %s53_s15 }
  0x50   :  { %p6646_p7 = scmp.ne.s32.totalorder %s53_s15, %s6645_s0  ;;  %p6651_p9 = scmp.lt.s32.totalorder %s6645_s0, %s6645_s0 }
  0x52   :  { %p6652_p10 = por %p6651_p9, %p6650_p8 }
  0x54   :  { %p6653_p11 = pnand %p6652_p10, %p6646_p7 }
  0x56   :  { %6656 = shalt.err (!%p6653_p11)
}
  0x57   :  { %58 = dma.hbm_to_vmem [thread:$0]  %s8052_s2, 8192, %s53_s15, [#allocation8], %s6780_s27, %s6780_s27, %s6781_s28  }
  0x58   :  { %s6657_s12 = scalar_lea.hbm %s8054_s4, 128 }
  0x59   :  { %p6658_p12 = scmp.ne.s32.totalorder %s8054_s4, %s6657_s12  ;;  %p6661_p13 = scmp.lt.u32.totalorder %s6657_s12, %s8054_s4 }
  0x5b   :  { %p6663_p0 = pnand %p6661_p13, %p6658_p12 }
  0x5d   :  { %6666 = shalt.err (!%p6663_p0)
}
  0x5e   :  { %s6667_s3 = scalar_lea.vmem %s6925_s17, 128  ;;  %p6672_p2 = scmp.lt.s32.totalorder %s6925_s17, %s6925_s17 }
  0x5f   :  { %p6668_p1 = scmp.ne.s32.totalorder %s6925_s17, %s6667_s3  ;;  %p6673_p3 = scmp.lt.s32.totalorder %s6667_s3, %s6667_s3 }
  0x61   :  { %p6674_p4 = por %p6673_p3, %p6672_p2 }
  0x63   :  { %p6675_p5 = pnand %p6674_p4, %p6668_p1 }
  0x65   :  { %6678 = shalt.err (!%p6675_p5)
}
  0x66   :  { %s6789_s2 = smov 64   ;;  %s6790_s27 = smov 4  }
  0x67   :  { %82 = dma.hbm_to_vmem [thread:$0]  %s8054_s4, 128, %s6925_s17, [#allocation11], %s6789_s2, %s6789_s2, %s6790_s27  }
  0x68   :  { %s6791_s20 = smov [#allocation15]   ;;  %s6679_s18 = scalar_lea.hbm %s8057_s7, 2048 }
  0x69   :  { %s102_s21 = sshll.u32 %s6791_s20, 4  ;;  %p6680_p6 = scmp.ne.s32.totalorder %s8057_s7, %s6679_s18  ;;  %s103_s21 = int_to_ptr.vmem [resolvable:$true] %s102_s21 }
  0x6a   :  { %p6683_p7 = scmp.lt.u32.totalorder %s6679_s18, %s8057_s7 }
  0x6c   :  { %p6685_p8 = pnand %p6683_p7, %p6680_p6 }
  0x6e   :  { %6688 = shalt.err (!%p6685_p8)
}
  0x6f   :  { %s6689_s29 = scalar_lea.vmem %s103_s21, 2048  ;;  %p6694_p10 = scmp.lt.s32.totalorder %s103_s21, %s103_s21 }
  0x70   :  { %p6690_p9 = scmp.ne.s32.totalorder %s103_s21, %s6689_s29  ;;  %p6695_p11 = scmp.lt.s32.totalorder %s6689_s29, %s6689_s29 }
  0x72   :  { %p6696_p12 = por %p6695_p11, %p6694_p10 }
  0x74   :  { %p6697_p13 = pnand %p6696_p12, %p6690_p9 }
  0x76   :  { %6700 = shalt.err (!%p6697_p13)
}
  0x77   :  { %108 = dma.hbm_to_vmem [thread:$0]  %s8057_s7, 2048, %s103_s21, [#allocation14], %s6785_s13, %s6785_s13, %s6786_s19  }
  0x78   :  { %6767 = dma.done.wait [#allocation5], 1024  }
  0x79   :  { %6768 = vsyncadd [#allocation5], 4294966272 }
  0x7a   :  { %6769 = dma.done.wait [#allocation8], 16384  }
  0x7b   :  { %6770 = vsyncadd [#allocation8], 4294950912 }
  0x7c   :  { %6771 = dma.done.wait [#allocation11], 16512  }
  0x7d   :  { %6772 = vsyncadd [#allocation11], 4294950784 }
  0x7e   :  { %6773 = dma.done.wait [#allocation14], 2304  }
  0x7f   :  { %6774 = vsyncadd [#allocation14], 4294964992  ;;  %v6792_v0 = vmov 0.0   ;;  %v141_v1 = vld [vmem:[#allocation7 + $0x8] sm:$0xff]  ;;  %v143_v3 = vld [vmem:[#allocation7 + $0x18] sm:$0xff]  ;;  %vm6794_vm0 = vmmov 0  }
  0x80   :  { %290 = vmatprep.mubr.f32.mxu0 %v6792_v0  ;;  %403 = vmatprep.mubr.f32.mxu1 %v6792_v0  ;;  %v145_v2 = vld [vmem:[#allocation7 + $0x28] sm:$0xff]  ;;  %v147_v5 = vld [vmem:[#allocation7 + $0x38] sm:$0xff]  ;;  %v140_v6 = vld [vmem:[#allocation7] sm:$0xff] }
  0x81   :  { %v4964_v4 = vpack.c.bf16 %v145_v2, %v141_v1  ;;  %v144_v7 = vld [vmem:[#allocation7 + $0x20] sm:$0xff]  ;;  %v4996_v8 = vpack.c.bf16 %v147_v5, %v143_v3  ;;  %v142_v10 = vld [vmem:[#allocation7 + $0x10] sm:$0xff]  ;;  %v149_v12 = vld [vmem:[#allocation7 + $0x48] sm:$0xff] }
  0x82   :  { %v4966_v9 = vpack.c.bf16 %v144_v7, %v140_v6  ;;  %v146_v11 = vld [vmem:[#allocation7 + $0x30] sm:$0xff]  ;;  %v153_v14 = vld [vmem:[#allocation7 + $0x68] sm:$0xff]  ;;  %v151_v15 = vld [vmem:[#allocation7 + $0x58] sm:$0xff] }
  0x83   :  { %4965 = vmatprep.subr.bf16.mxu0 %v4964_v4  ;;  %v4998_v13 = vpack.c.bf16 %v146_v11, %v142_v10  ;;  %v155_v16 = vld [vmem:[#allocation7 + $0x78] sm:$0xff]  ;;  %4997 = vmatprep.subr.bf16.mxu1 %v4996_v8  ;;  %v4968_v17 = vpack.c.bf16 %v153_v14, %v149_v12  ;;  %v148_v19 = vld [vmem:[#allocation7 + $0x40] sm:$0xff]  ;;  %v150_v21 = vld [vmem:[#allocation7 + $0x50] sm:$0xff] }
  0x84   :  { %4967 = vmatpush1.bf16.msra.mxu0 %v4966_v9  ;;  %v5000_v18 = vpack.c.bf16 %v155_v16, %v151_v15  ;;  %v152_v20 = vld [vmem:[#allocation7 + $0x60] sm:$0xff]  ;;  %v154_v23 = vld [vmem:[#allocation7 + $0x70] sm:$0xff]  ;;  %v157_v24 = vld [vmem:[#allocation7 + $0x88] sm:$0xff] }
  0x85   :  { %4999 = vmatpush1.bf16.msra.mxu1 %v4998_v13  ;;  %v4970_v22 = vpack.c.bf16 %v152_v20, %v148_v19  ;;  %v161_v25 = vld [vmem:[#allocation7 + $0xa8] sm:$0xff]  ;;  %4969 = vmatprep.subr.bf16.mxu0 %v4968_v17  ;;  %v5002_v26 = vpack.c.bf16 %v154_v23, %v150_v21  ;;  %v159_v28 = vld [vmem:[#allocation7 + $0x98] sm:$0xff]  ;;  %v156_v30 = vld [vmem:[#allocation7 + $0x80] sm:$0xff] }
  0x86   :  { %5001 = vmatprep.subr.bf16.mxu1 %v5000_v18  ;;  %v4972_v27 = vpack.c.bf16 %v161_v25, %v157_v24  ;;  %v163_v29 = vld [vmem:[#allocation7 + $0xb8] sm:$0xff]  ;;  %v160_v32 = vld [vmem:[#allocation7 + $0xa0] sm:$0xff]  ;;  %v158_v33 = vld [vmem:[#allocation7 + $0x90] sm:$0xff] }
  0x87   :  { %v5004_v31 = vpack.c.bf16 %v163_v29, %v159_v28  ;;  %v162_v34 = vld [vmem:[#allocation7 + $0xb0] sm:$0xff]  ;;  %v4974_v35 = vpack.c.bf16 %v160_v32, %v156_v30  ;;  %v165_v36 = vld [vmem:[#allocation7 + $0xc8] sm:$0xff]  ;;  %v167_v38 = vld [vmem:[#allocation7 + $0xd8] sm:$0xff] }
  0x88   :  { %4971 = vmatpush1.bf16.msra.mxu0 %v4970_v22  ;;  %v169_v37 = vld [vmem:[#allocation7 + $0xe8] sm:$0xff]  ;;  %v5006_v39 = vpack.c.bf16 %v162_v34, %v158_v33  ;;  %v171_v41 = vld [vmem:[#allocation7 + $0xf8] sm:$0xff]  ;;  %v164_v42 = vld [vmem:[#allocation7 + $0xc0] sm:$0xff] }
  0x89   :  { %5003 = vmatpush1.bf16.msra.mxu1 %v5002_v26  ;;  %4973 = vmatprep.subr.bf16.mxu0 %v4972_v27  ;;  %v4976_v40 = vpack.c.bf16 %v169_v37, %v165_v36  ;;  %v168_v43 = vld [vmem:[#allocation7 + $0xe0] sm:$0xff]  ;;  %v5008_v44 = vpack.c.bf16 %v171_v41, %v167_v38  ;;  %v166_v45 = vld [vmem:[#allocation7 + $0xd0] sm:$0xff]  ;;  %v173_v47 = vld [vmem:[#allocation7 + $0x108] sm:$0xff] }
  0x8a   :  { %5005 = vmatprep.subr.bf16.mxu1 %v5004_v31  ;;  %v170_v46 = vld [vmem:[#allocation7 + $0xf0] sm:$0xff]  ;;  %v177_v48 = vld [vmem:[#allocation7 + $0x128] sm:$0xff]  ;;  %v175_v49 = vld [vmem:[#allocation7 + $0x118] sm:$0xff]  ;;  %v4978_v51 = vpack.c.bf16 %v168_v43, %v164_v42 }
  0x8b   :  { %v179_v50 = vld [vmem:[#allocation7 + $0x138] sm:$0xff]  ;;  %v5010_v52 = vpack.c.bf16 %v170_v46, %v166_v45  ;;  %v4980_v53 = vpack.c.bf16 %v177_v48, %v173_v47  ;;  %v172_v54 = vld [vmem:[#allocation7 + $0x100] sm:$0xff]  ;;  %v174_v56 = vld [vmem:[#allocation7 + $0x110] sm:$0xff] }
  0x8c   :  { %4975 = vmatpush1.bf16.msra.mxu0 %v4974_v35  ;;  %v176_v55 = vld [vmem:[#allocation7 + $0x120] sm:$0xff]  ;;  %v5012_v57 = vpack.c.bf16 %v179_v50, %v175_v49  ;;  %v178_v58 = vld [vmem:[#allocation7 + $0x130] sm:$0xff]  ;;  %v181_v59 = vld [vmem:[#allocation7 + $0x148] sm:$0xff] }
  0x8d   :  { %5007 = vmatpush1.bf16.msra.mxu1 %v5006_v39  ;;  %4977 = vmatprep.subr.bf16.mxu0 %v4976_v40  ;;  %v185_v60 = vld [vmem:[#allocation7 + $0x168] sm:$0xff]  ;;  %v183_v61 = vld [vmem:[#allocation7 + $0x158] sm:$0xff]  ;;  %v4982_v63 = vpack.c.bf16 %v176_v55, %v172_v54  ;;  %v5014_v1 = vpack.c.bf16 %v178_v58, %v174_v56  ;;  %v180_v3 = vld [vmem:[#allocation7 + $0x140] sm:$0xff] }
  0x8e   :  { %5009 = vmatprep.subr.bf16.mxu1 %v5008_v44  ;;  %v187_v62 = vld [vmem:[#allocation7 + $0x178] sm:$0xff]  ;;  %v4984_v2 = vpack.c.bf16 %v185_v60, %v181_v59  ;;  %v184_v4 = vld [vmem:[#allocation7 + $0x160] sm:$0xff]  ;;  %v182_v5 = vld [vmem:[#allocation7 + $0x150] sm:$0xff] }
  0x8f   :  { %v5016_v6 = vpack.c.bf16 %v187_v62, %v183_v61  ;;  %v186_v7 = vld [vmem:[#allocation7 + $0x170] sm:$0xff]  ;;  %v189_v8 = vld [vmem:[#allocation7 + $0x188] sm:$0xff]  ;;  %v191_v10 = vld [vmem:[#allocation7 + $0x198] sm:$0xff]  ;;  %v4986_v12 = vpack.c.bf16 %v184_v4, %v180_v3 }
  0x90   :  { %4979 = vmatpush1.bf16.msra.mxu0 %v4978_v51  ;;  %v193_v9 = vld [vmem:[#allocation7 + $0x1a8] sm:$0xff]  ;;  %v195_v11 = vld [vmem:[#allocation7 + $0x1b8] sm:$0xff]  ;;  %v5018_v13 = vpack.c.bf16 %v186_v7, %v182_v5  ;;  %v188_v15 = vld [vmem:[#allocation7 + $0x180] sm:$0xff] }
  0x91   :  { %5011 = vmatpush1.bf16.msra.mxu1 %v5010_v52  ;;  %4981 = vmatprep.subr.bf16.mxu0 %v4980_v53  ;;  %v4988_v14 = vpack.c.bf16 %v193_v9, %v189_v8  ;;  %v192_v16 = vld [vmem:[#allocation7 + $0x1a0] sm:$0xff]  ;;  %v190_v17 = vld [vmem:[#allocation7 + $0x190] sm:$0xff]  ;;  %v5020_v18 = vpack.c.bf16 %v195_v11, %v191_v10  ;;  %v197_v20 = vld [vmem:[#allocation7 + $0x1c8] sm:$0xff] }
  0x92   :  { %5013 = vmatprep.subr.bf16.mxu1 %v5012_v57  ;;  %v194_v19 = vld [vmem:[#allocation7 + $0x1b0] sm:$0xff]  ;;  %v201_v21 = vld [vmem:[#allocation7 + $0x1e8] sm:$0xff]  ;;  %v199_v22 = vld [vmem:[#allocation7 + $0x1d8] sm:$0xff]  ;;  %v4990_v24 = vpack.c.bf16 %v192_v16, %v188_v15 }
  0x93   :  { %v203_v23 = vld [vmem:[#allocation7 + $0x1f8] sm:$0xff]  ;;  %v5022_v25 = vpack.c.bf16 %v194_v19, %v190_v17  ;;  %v4992_v26 = vpack.c.bf16 %v201_v21, %v197_v20  ;;  %v196_v27 = vld [vmem:[#allocation7 + $0x1c0] sm:$0xff]  ;;  %v198_v29 = vld [vmem:[#allocation7 + $0x1d0] sm:$0xff] }
  0x94   :  { %4983 = vmatpush1.bf16.msra.mxu0 %v4982_v63  ;;  %v200_v28 = vld [vmem:[#allocation7 + $0x1e0] sm:$0xff]  ;;  %v5024_v30 = vpack.c.bf16 %v203_v23, %v199_v22  ;;  %v202_v31 = vld [vmem:[#allocation7 + $0x1f0] sm:$0xff]  ;;  %v494_v32 = vld [vmem:[#allocation10 + $0x8] sm:$0xff] }
  0x95   :  { %5015 = vmatpush1.bf16.msra.mxu1 %v5014_v1  ;;  %4985 = vmatprep.subr.bf16.mxu0 %v4984_v2  ;;  %v498_v33 = vld [vmem:[#allocation10 + $0x28] sm:$0xff]  ;;  %v496_v34 = vld [vmem:[#allocation10 + $0x18] sm:$0xff]  ;;  %v4994_v36 = vpack.c.bf16 %v200_v28, %v196_v27  ;;  %v5026_v37 = vpack.c.bf16 %v202_v31, %v198_v29  ;;  %v493_v39 = vld [vmem:[#allocation10] sm:$0xff] }
  0x96   :  { %5017 = vmatprep.subr.bf16.mxu1 %v5016_v6  ;;  %v500_v35 = vld [vmem:[#allocation10 + $0x38] sm:$0xff]  ;;  %v6976_v38 = vpack.c.bf16 %v498_v33, %v494_v32  ;;  %v497_v40 = vld [vmem:[#allocation10 + $0x20] sm:$0xff]  ;;  %v495_v42 = vld [vmem:[#allocation10 + $0x10] sm:$0xff] }
  0x97   :  { %v6978_v41 = vpack.c.bf16 %v500_v35, %v496_v34  ;;  %v499_v43 = vld [vmem:[#allocation10 + $0x30] sm:$0xff]  ;;  %v502_v44 = vld [vmem:[#allocation10 + $0x48] sm:$0xff]  ;;  %v132_v46 = vld [vmem:[#allocation4] sm:$0xff]  ;;  %v6980_v47 = vpack.c.bf16 %v497_v40, %v493_v39 }
  0x98   :  { %4987 = vmatpush1.bf16.msra.mxu0 %v4986_v12  ;;  %v506_v45 = vld [vmem:[#allocation10 + $0x68] sm:$0xff]  ;;  %v504_v48 = vld [vmem:[#allocation10 + $0x58] sm:$0xff]  ;;  %v6983_v50 = vpack.c.bf16 %v499_v43, %v495_v42  ;;  %v501_v51 = vld [vmem:[#allocation10 + $0x40] sm:$0xff] }
  0x99   :  { %5019 = vmatpush1.bf16.msra.mxu1 %v5018_v13  ;;  %4989 = vmatprep.subr.bf16.mxu0 %v4988_v14  ;;  %v508_v49 = vld [vmem:[#allocation10 + $0x78] sm:$0xff]  ;;  %v505_v52 = vld [vmem:[#allocation10 + $0x60] sm:$0xff]  ;;  %v6986_v53 = vpack.c.bf16 %v506_v45, %v502_v44  ;;  %v503_v54 = vld [vmem:[#allocation10 + $0x50] sm:$0xff] }
  0x9a   :  { %5021 = vmatprep.subr.bf16.mxu1 %v5020_v18  ;;  %v507_v55 = vld [vmem:[#allocation10 + $0x70] sm:$0xff]  ;;  %v6988_v56 = vpack.c.bf16 %v508_v49, %v504_v48  ;;  %v510_v57 = vld [vmem:[#allocation10 + $0x88] sm:$0xff]  ;;  %v6991_v60 = vpack.c.bf16 %v505_v52, %v501_v51  ;;  %v512_v61 = vld [vmem:[#allocation10 + $0x98] sm:$0xff] }
  0x9b   :  { %v514_v58 = vld [vmem:[#allocation10 + $0xa8] sm:$0xff]  ;;  %v516_v62 = vld [vmem:[#allocation10 + $0xb8] sm:$0xff]  ;;  %v6995_v63 = vpack.c.bf16 %v507_v55, %v503_v54  ;;  %v509_v1 = vld [vmem:[#allocation10 + $0x80] sm:$0xff] }
  0x9c   :  { %4991 = vmatpush1.bf16.msra.mxu0 %v4990_v24  ;;  %v133_v59 = vld [vmem:[#allocation4 + $0x8] sm:$0xff]  ;;  %v513_v2 = vld [vmem:[#allocation10 + $0xa0] sm:$0xff]  ;;  %v6999_v3 = vpack.c.bf16 %v514_v58, %v510_v57  ;;  %v511_v4 = vld [vmem:[#allocation10 + $0x90] sm:$0xff]  ;;  %v7002_v6 = vpack.c.bf16 %v516_v62, %v512_v61 }
  0x9d   :  { %5023 = vmatpush1.bf16.msra.mxu1 %v5022_v25  ;;  %4993 = vmatprep.subr.bf16.mxu0 %v4992_v26  ;;  %v515_v5 = vld [vmem:[#allocation10 + $0xb0] sm:$0xff]  ;;  %v518_v7 = vld [vmem:[#allocation10 + $0xc8] sm:$0xff]  ;;  %v7005_v10 = vpack.c.bf16 %v513_v2, %v509_v1  ;;  %v520_v11 = vld [vmem:[#allocation10 + $0xd8] sm:$0xff] }
  0x9e   :  { %5025 = vmatprep.subr.bf16.mxu1 %v5024_v30  ;;  %v522_v8 = vld [vmem:[#allocation10 + $0xe8] sm:$0xff]  ;;  %v134_v9 = vld [vmem:[#allocation4 + $0x10] sm:$0xff]  ;;  %v524_v12 = vld [vmem:[#allocation10 + $0xf8] sm:$0xff]  ;;  %v7009_v13 = vpack.c.bf16 %v515_v5, %v511_v4 }
  0x9f   :  { %v517_v14 = vld [vmem:[#allocation10 + $0xc0] sm:$0xff]  ;;  %v7013_v16 = vpack.c.bf16 %v522_v8, %v518_v7  ;;  %v519_v17 = vld [vmem:[#allocation10 + $0xd0] sm:$0xff]  ;;  %v7016_v19 = vpack.c.bf16 %v524_v12, %v520_v11  ;;  %v526_v20 = vld [vmem:[#allocation10 + $0x108] sm:$0xff] }
  0xa0   :  { %4995 = vmatpush1.bf16.msra.mxu0 %v4994_v36  ;;  %v521_v15 = vld [vmem:[#allocation10 + $0xe0] sm:$0xff]  ;;  %v523_v18 = vld [vmem:[#allocation10 + $0xf0] sm:$0xff]  ;;  %v530_v21 = vld [vmem:[#allocation10 + $0x128] sm:$0xff] }
  0xa1   :  { %5027 = vmatpush1.bf16.msra.mxu1 %v5026_v37  ;;  %5029 = vmatprep.subr.bf16.mxu0 %v6976_v38  ;;  %v135_v22 = vld [vmem:[#allocation4 + $0x18] sm:$0xff]  ;;  %v7019_v23 = vpack.c.bf16 %v521_v15, %v517_v14  ;;  %v7023_v26 = vpack.c.bf16 %v523_v18, %v519_v17  ;;  %v525_v27 = vld [vmem:[#allocation10 + $0x100] sm:$0xff]  ;;  %v7027_v29 = vpack.c.bf16 %v530_v21, %v526_v20  ;;  %v527_v30 = vld [vmem:[#allocation10 + $0x110] sm:$0xff] }
  0xa2   :  { %5061 = vmatprep.subr.bf16.mxu1 %v6978_v41  ;;  %v528_v24 = vld [vmem:[#allocation10 + $0x118] sm:$0xff]  ;;  %v529_v28 = vld [vmem:[#allocation10 + $0x120] sm:$0xff]  ;;  %v531_v31 = vld [vmem:[#allocation10 + $0x130] sm:$0xff] }
  0xa3   :  { %291 = vmatmul.mubr.f32.vlgmr.msra.gmra.mrb[0].mxu0 %v132_v46  ;;  %v532_v25 = vld [vmem:[#allocation10 + $0x138] sm:$0xff]  ;;  %v534_v33 = vld [vmem:[#allocation10 + $0x148] sm:$0xff]  ;;  %v136_v35 = vld [vmem:[#allocation4 + $0x20] sm:$0xff]  ;;  %v7033_v36 = vpack.c.bf16 %v529_v28, %v525_v27  ;;  %v7037_v40 = vpack.c.bf16 %v531_v31, %v527_v30  ;;  %v206_v30 = vlaneseq }
  0xa4   :  { %404 = vmatmul.mubr.f32.vlgmr.msra.gmra.mrb[0].mxu1 %v132_v46  ;;  %5031 = vmatpush1.bf16.msra.mxu0 %v6980_v47  ;;  %v7030_v32 = vpack.c.bf16 %v532_v25, %v528_v24  ;;  %v538_v34 = vld [vmem:[#allocation10 + $0x168] sm:$0xff]  ;;  %v536_v37 = vld [vmem:[#allocation10 + $0x158] sm:$0xff]  ;;  %v533_v42 = vld [vmem:[#allocation10 + $0x140] sm:$0xff] }
  0xa5   :  { %5063 = vmatpush1.bf16.msra.mxu1 %v6983_v50  ;;  %296 = vmatprep.mubr.f32.mxu0 %v6792_v0  ;;  %v540_v39 = vld [vmem:[#allocation10 + $0x178] sm:$0xff]  ;;  %v537_v43 = vld [vmem:[#allocation10 + $0x160] sm:$0xff]  ;;  %v7041_v44 = vpack.c.bf16 %v538_v34, %v534_v33  ;;  %v535_v45 = vld [vmem:[#allocation10 + $0x150] sm:$0xff]  ;;  %v7127_v31 = vshrl.u32 %v206_v30, 7 }
  0xa6   :  { %409 = vmatprep.mubr.f32.mxu1 %v6792_v0  ;;  %5033 = vmatprep.subr.bf16.mxu0 %v6986_v53  ;;  %v539_v46 = vld [vmem:[#allocation10 + $0x170] sm:$0xff]  ;;  %v7044_v48 = vpack.c.bf16 %v540_v39, %v536_v37  ;;  %v542_v49 = vld [vmem:[#allocation10 + $0x188] sm:$0xff]  ;;  %v7047_v54 = vpack.c.bf16 %v537_v43, %v533_v42  ;;  %v544_v55 = vld [vmem:[#allocation10 + $0x198] sm:$0xff] }
  0xa7   :  { %297 = vmatmul.mubr.f32.gmra.mrb[2].mxu0 %v133_v59  ;;  %5065 = vmatprep.subr.bf16.mxu1 %v6988_v56  ;;  %v546_v51 = vld [vmem:[#allocation10 + $0x1a8] sm:$0xff]  ;;  %v548_v57 = vld [vmem:[#allocation10 + $0x1b8] sm:$0xff]  ;;  %v7051_v58 = vpack.c.bf16 %v539_v46, %v535_v45  ;;  %v545_v61 = vld [vmem:[#allocation10 + $0x1a0] sm:$0xff]  ;;  %v208_v33 = vsub.s32 0, %v7127_v31 }
  0xa8   :  { %410 = vmatmul.mubr.f32.gmra.mrb[2].mxu1 %v133_v59  ;;  %5035 = vmatpush1.bf16.msra.mxu0 %v6991_v60  ;;  %v137_v52 = vld [vmem:[#allocation4 + $0x28] sm:$0xff]  ;;  %v541_v59 = vld [vmem:[#allocation10 + $0x180] sm:$0xff]  ;;  %v7055_v62 = vpack.c.bf16 %v546_v51, %v542_v49  ;;  %v543_v1 = vld [vmem:[#allocation10 + $0x190] sm:$0xff]  ;;  %v7058_v4 = vpack.c.bf16 %v548_v57, %v544_v55  ;;  %v216_v57 = vsub.s32 2, %v7127_v31 }
  0xa9   :  { %5067 = vmatpush1.bf16.msra.mxu1 %v6995_v63  ;;  %302 = vmatprep.mubr.f32.mxu0 %v6792_v0  ;;  %v547_v2 = vld [vmem:[#allocation10 + $0x1b0] sm:$0xff]  ;;  %v550_v5 = vld [vmem:[#allocation10 + $0x1c8] sm:$0xff]  ;;  %v552_v11 = vld [vmem:[#allocation10 + $0x1d8] sm:$0xff] }
  0xaa   :  { %415 = vmatprep.mubr.f32.mxu1 %v6792_v0  ;;  %5037 = vmatprep.subr.bf16.mxu0 %v6999_v3  ;;  %v554_v7 = vld [vmem:[#allocation10 + $0x1e8] sm:$0xff]  ;;  %v138_v8 = vld [vmem:[#allocation4 + $0x30] sm:$0xff]  ;;  %v556_v12 = vld [vmem:[#allocation10 + $0x1f8] sm:$0xff]  ;;  %v7065_v14 = vpack.c.bf16 %v547_v2, %v543_v1 }
  0xab   :  { %303 = vmatmul.mubr.f32.gmra.mrb[4].mxu0 %v134_v9  ;;  %5069 = vmatprep.subr.bf16.mxu1 %v7002_v6  ;;  %v549_v15 = vld [vmem:[#allocation10 + $0x1c0] sm:$0xff]  ;;  %v7069_v18 = vpack.c.bf16 %v554_v7, %v550_v5  ;;  %v551_v20 = vld [vmem:[#allocation10 + $0x1d0] sm:$0xff]  ;;  %v139_v24 = vld [vmem:[#allocation4 + $0x38] sm:$0xff] }
  0xac   :  { %416 = vmatmul.mubr.f32.gmra.mrb[4].mxu1 %v134_v9  ;;  %5039 = vmatpush1.bf16.msra.mxu0 %v7005_v10  ;;  %v7061_v9 = vpack.c.bf16 %v545_v61, %v541_v59  ;;  %v553_v17 = vld [vmem:[#allocation10 + $0x1e0] sm:$0xff]  ;;  %v555_v21 = vld [vmem:[#allocation10 + $0x1f0] sm:$0xff] }
  0xad   :  { %5071 = vmatpush1.bf16.msra.mxu1 %v7009_v13  ;;  %308 = vmatprep.mubr.f32.mxu0 %v6792_v0  ;;  %v7075_v25 = vpack.c.bf16 %v553_v17, %v549_v15  ;;  %v7079_v27 = vpack.c.bf16 %v555_v21, %v551_v20  ;;  %v484_v28 = vld [vmem:[%s8055_s5] sm:$0xff]  ;;  %v485_v17 = vld [vmem:[#allocation13] sm:$0xff] }
  0xae   :  { %421 = vmatprep.mubr.f32.mxu1 %v6792_v0  ;;  %5041 = vmatprep.subr.bf16.mxu0 %v7013_v16  ;;  %v204_v34 = vld [vmem:[#allocation12] sm:$0xf] }
  0xaf   :  { %309 = vmatmul.mubr.f32.gmra.mrb[6].mxu0 %v135_v22  ;;  %5073 = vmatprep.subr.bf16.mxu1 %v7016_v19  ;;  %v7133_v37 = vrot.slane %v204_v34, %v208_v33  ;;  %v7150_v61 = vrot.slane %v204_v34, %v216_v57 }
  0xb0   :  { %422 = vmatmul.mubr.f32.gmra.mrb[6].mxu1 %v135_v22  ;;  %5043 = vmatpush1.bf16.msra.mxu0 %v7019_v23  ;;  %v7072_v22 = vpack.c.bf16 %v556_v12, %v552_v11 }
  0xb1   :  { %5075 = vmatpush1.bf16.msra.mxu1 %v7023_v26  ;;  %314 = vmatprep.mubr.f32.mxu0 %v6792_v0 }
  0xb2   :  { %427 = vmatprep.mubr.f32.mxu1 %v6792_v0  ;;  %5045 = vmatprep.subr.bf16.mxu0 %v7027_v29 }
  0xb3   :  { %315 = vmatmul.mubr.f32.gmra.mrb[8].mxu0 %v136_v35  ;;  %5077 = vmatprep.subr.bf16.mxu1 %v7030_v32 }
  0xb4   :  { %428 = vmatmul.mubr.f32.gmra.mrb[8].mxu1 %v136_v35  ;;  %5047 = vmatpush1.bf16.msra.mxu0 %v7033_v36  ;;  %v212_v35 = vsub.s32 1, %v7127_v31 }
  0xb5   :  { %5079 = vmatpush1.bf16.msra.mxu1 %v7037_v40  ;;  %320 = vmatprep.mubr.f32.mxu0 %v6792_v0 }
  0xb6   :  { %433 = vmatprep.mubr.f32.mxu1 %v6792_v0  ;;  %5049 = vmatprep.subr.bf16.mxu0 %v7041_v44  ;;  %v7137_v39 = vrot.slane %v204_v34, %v212_v35 }
  0xb7   :  { %321 = vmatmul.mubr.f32.gmra.mrb[10].mxu0 %v137_v52  ;;  %5081 = vmatprep.subr.bf16.mxu1 %v7044_v48 }
  0xb8   :  { %434 = vmatmul.mubr.f32.gmra.mrb[10].mxu1 %v137_v52  ;;  %5051 = vmatpush1.bf16.msra.mxu0 %v7047_v54 }
  0xb9   :  { %5083 = vmatpush1.bf16.msra.mxu1 %v7051_v58  ;;  %326 = vmatprep.mubr.f32.mxu0 %v6792_v0 }
  0xba   :  { %439 = vmatprep.mubr.f32.mxu1 %v6792_v0  ;;  %5053 = vmatprep.subr.bf16.mxu0 %v7055_v62 }
  0xbb   :  { %327 = vmatmul.mubr.f32.gmra.mrb[12].mxu0 %v138_v8  ;;  %5085 = vmatprep.subr.bf16.mxu1 %v7058_v4 }
  0xbc   :  { %440 = vmatmul.mubr.f32.gmra.mrb[12].mxu1 %v138_v8  ;;  %5055 = vmatpush1.bf16.msra.mxu0 %v7061_v9 }
  0xbd   :  { %5087 = vmatpush1.bf16.msra.mxu1 %v7065_v14  ;;  %332 = vmatprep.mubr.f32.mxu0 %v6792_v0 }
  0xbe   :  { %445 = vmatprep.mubr.f32.mxu1 %v6792_v0  ;;  %5057 = vmatprep.subr.bf16.mxu0 %v7069_v18 }
  0xbf   :  { %333 = vmatmul.mubr.f32.gmra.mrb[14].mxu0 %v139_v24  ;;  %5089 = vmatprep.subr.bf16.mxu1 %v7072_v22 }
  0xc0   :  { %446 = vmatmul.mubr.f32.gmra.mrb[14].mxu1 %v139_v24  ;;  %5059 = vmatpush1.bf16.msra.mxu0 %v7075_v25 }
  0xc1   :  { %5091 = vmatpush1.bf16.msra.mxu1 %v7079_v27  ;;  %621 = vmatprep.mubr.f32.mxu0 %v6792_v0 }
  0xc2   :  { %692 = vmatprep.mubr.f32.mxu1 %v6792_v0  ;;  %5093 = vmatprep.subr.bf16.mxu0 %v6976_v38 }
  0xc3   :  { %622 = vmatmul.mubr.f32.vlgmr.msra.gmra.mrb[0].mxu0 %v484_v28  ;;  %5125 = vmatprep.subr.bf16.mxu1 %v6978_v41 }
  0xc4   :  { %693 = vmatmul.mubr.f32.vlgmr.msra.gmra.mrb[0].mxu1 %v484_v28  ;;  %5095 = vmatpush1.bf16.msra.mxu0 %v6980_v47 }
  0xc5   :  { %5127 = vmatpush1.bf16.msra.mxu1 %v6983_v50  ;;  %5097 = vmatprep.subr.bf16.mxu0 %v6986_v53 }
  0xc6   :  { %5129 = vmatprep.subr.bf16.mxu1 %v6988_v56  ;;  %863 = vmatprep.mubr.f32.mxu0 %v6792_v0 }
  0xc7   :  { %934 = vmatprep.mubr.f32.mxu1 %v6792_v0 }
  0xc8   :  { %5099 = vmatpush1.bf16.msra.mxu0 %v6991_v60 }
  0xc9   :  { %5131 = vmatpush1.bf16.msra.mxu1 %v6995_v63  ;;  %5101 = vmatprep.subr.bf16.mxu0 %v6999_v3 }
  0xca   :  { %5133 = vmatprep.subr.bf16.mxu1 %v7002_v6 }
  0xcc   :  { %5103 = vmatpush1.bf16.msra.mxu0 %v7005_v10 }
  0xcd   :  { %5135 = vmatpush1.bf16.msra.mxu1 %v7009_v13  ;;  %5105 = vmatprep.subr.bf16.mxu0 %v7013_v16 }
  0xce   :  { %5137 = vmatprep.subr.bf16.mxu1 %v7016_v19 }
  0xd0   :  { %5107 = vmatpush1.bf16.msra.mxu0 %v7019_v23 }
  0xd1   :  { %5139 = vmatpush1.bf16.msra.mxu1 %v7023_v26  ;;  %5109 = vmatprep.subr.bf16.mxu0 %v7027_v29 }
  0xd2   :  { %5141 = vmatprep.subr.bf16.mxu1 %v7030_v32 }
  0xd4   :  { %5111 = vmatpush1.bf16.msra.mxu0 %v7033_v36 }
  0xd5   :  { %5143 = vmatpush1.bf16.msra.mxu1 %v7037_v40  ;;  %5113 = vmatprep.subr.bf16.mxu0 %v7041_v44 }
  0xd6   :  { %5145 = vmatprep.subr.bf16.mxu1 %v7044_v48 }
  0xd8   :  { %5115 = vmatpush1.bf16.msra.mxu0 %v7047_v54 }
  0xd9   :  { %5147 = vmatpush1.bf16.msra.mxu1 %v7051_v58  ;;  %5117 = vmatprep.subr.bf16.mxu0 %v7055_v62 }
  0xda   :  { %5149 = vmatprep.subr.bf16.mxu1 %v7058_v4 }
  0xdc   :  { %5119 = vmatpush1.bf16.msra.mxu0 %v7061_v9 }
  0xdd   :  { %5151 = vmatpush1.bf16.msra.mxu1 %v7065_v14  ;;  %5121 = vmatprep.subr.bf16.mxu0 %v7069_v18 }
  0xde   :  { %5153 = vmatprep.subr.bf16.mxu1 %v7072_v22 }
  0xe0   :  { %5123 = vmatpush1.bf16.msra.mxu0 %v7075_v25 }
  0xe1   :  { %5155 = vmatpush1.bf16.msra.mxu1 %v7079_v27  ;;  %5157 = vmatprep.subr.bf16.mxu0 %v6976_v38  ;;  %v220_v38 = vsub.s32 3, %v7127_v31 }
  0xe2   :  { %5189 = vmatprep.subr.bf16.mxu1 %v6978_v41 }
  0xe3   :  { %v7144_v55 = vrot.slane %v204_v34, %v220_v38 }
 0x196   :  { %v623_v42 = vpop.f32.mrb[0].mxu0 }
 0x197   :  { %v6140_v41 = vadd.f32 %v623_v42, %v7133_v37  ;;  %v694_v43 = vpop.f32.mrb[0].mxu1  ;;  %v625_v45 = vpop.f32.mrb[1].mxu0 }
 0x198   :  { %v6141_v46 = vadd.f32 %v625_v45, %v7137_v39  ;;  %v696_v49 = vpop.f32.mrb[1].mxu1  ;;  %v6156_v2 = vadd.f32 %v694_v43, %v7150_v61 }
 0x199   :  { %v4861_v51 = vmul.f32 -1.442695, %v6140_v41  ;;  %v6157_v59 = vadd.f32 %v696_v49, %v7144_v55 }
 0x19a   :  { %v4862_v52 = vmul.f32 -1.442695, %v6141_v46 }
 0x19b   :  { %6287 = vpow2.f32 %v4861_v51  ;;  %v4863_v1 = vmul.f32 -1.442695, %v6157_v59 }
 0x19c   :  { %6289 = vpow2.f32 %v4862_v52 }
 0x19d   :  { %6291 = vpow2.f32 %v4863_v1 }
 0x19e   :  { %6293 = vtanh.f32 %v6156_v2 }
 0x1a5   :  { %v6288_v5 = vpop.eup %6287 }
 0x1a6   :  { %v6290_v7 = vpop.eup %6289  ;;  %v706_v8 = vadd.f32 1.0, %v6288_v5 }
 0x1a7   :  { %v712_v11 = vadd.f32 1.0, %v6290_v7  ;;  %v6292_v12 = vpop.eup %6291 }
 0x1a8   :  { %6295 = vrcp.f32 %v706_v8  ;;  %v6294_v15 = vpop.eup %6293  ;;  %v719_v28 = vadd.f32 1.0, %v6292_v12 }
 0x1a9   :  { %6297 = vrcp.f32 %v712_v11 }
 0x1aa   :  { %6299 = vrcp.f32 %v719_v28 }
 0x1b2   :  { %v6296_v20 = vpop.eup %6295 }
 0x1b3   :  { %v6298_v21 = vpop.eup %6297  ;;  %v723_v24 = vmul.f32 %v6296_v20, %v6294_v15 }
 0x1b4   :  { %v722_v30 = vmul.f32 %v6298_v21, %v485_v17  ;;  %v6300_v42 = vpop.eup %6299 }
 0x1b6   :  { %v7153_v34 = vadd.f32 %v723_v24, %v722_v30 }
 0x1b8   :  { %6301 = vtanh.f32 %v7153_v34 }
 0x1c2   :  { %v6302_v41 = vpop.eup %6301 }
 0x1c3   :  { %v7156_v43 = vmul.f32 %v6302_v41, %v6300_v42  ;;  %v1222_v42 = vld [vmem:[#allocation10 + $0x8] sm:$0xff] }
 0x1c4   :  { %v1226_v41 = vld [vmem:[#allocation10 + $0x28] sm:$0xff] }
 0x1c5   :  { %864 = vmatmul.mubr.f32.vlgmr.msra.gmra.mrb[2].mxu0 %v7156_v43  ;;  %935 = vmatmul.mubr.f32.vlgmr.msra.gmra.mrb[2].mxu1 %v7156_v43 }
 0x1c6   :  { %5159 = vmatpush1.bf16.msra.mxu0 %v6980_v47  ;;  %5191 = vmatpush1.bf16.msra.mxu1 %v6983_v50 }
 0x1c7   :  { %5161 = vmatprep.subr.bf16.mxu0 %v6986_v53  ;;  %5193 = vmatprep.subr.bf16.mxu1 %v6988_v56 }
 0x1c8   :  { %1106 = vmatprep.mubr.f32.mxu0 %v6792_v0  ;;  %1177 = vmatprep.mubr.f32.mxu1 %v6792_v0 }
 0x1ca   :  { %5163 = vmatpush1.bf16.msra.mxu0 %v6991_v60  ;;  %5195 = vmatpush1.bf16.msra.mxu1 %v6995_v63 }
 0x1cb   :  { %5165 = vmatprep.subr.bf16.mxu0 %v6999_v3  ;;  %5197 = vmatprep.subr.bf16.mxu1 %v7002_v6 }
 0x1ce   :  { %5167 = vmatpush1.bf16.msra.mxu0 %v7005_v10  ;;  %5199 = vmatpush1.bf16.msra.mxu1 %v7009_v13 }
 0x1cf   :  { %5169 = vmatprep.subr.bf16.mxu0 %v7013_v16  ;;  %5201 = vmatprep.subr.bf16.mxu1 %v7016_v19 }
 0x1d2   :  { %5171 = vmatpush1.bf16.msra.mxu0 %v7019_v23  ;;  %5203 = vmatpush1.bf16.msra.mxu1 %v7023_v26 }
 0x1d3   :  { %5173 = vmatprep.subr.bf16.mxu0 %v7027_v29  ;;  %5205 = vmatprep.subr.bf16.mxu1 %v7030_v32 }
 0x1d6   :  { %5175 = vmatpush1.bf16.msra.mxu0 %v7033_v36  ;;  %5207 = vmatpush1.bf16.msra.mxu1 %v7037_v40 }
 0x1d7   :  { %5177 = vmatprep.subr.bf16.mxu0 %v7041_v44  ;;  %5209 = vmatprep.subr.bf16.mxu1 %v7044_v48 }
 0x1da   :  { %5179 = vmatpush1.bf16.msra.mxu0 %v7047_v54  ;;  %5211 = vmatpush1.bf16.msra.mxu1 %v7051_v58 }
 0x1db   :  { %5181 = vmatprep.subr.bf16.mxu0 %v7055_v62  ;;  %5213 = vmatprep.subr.bf16.mxu1 %v7058_v4 }
 0x1de   :  { %5183 = vmatpush1.bf16.msra.mxu0 %v7061_v9  ;;  %5215 = vmatpush1.bf16.msra.mxu1 %v7065_v14 }
 0x1df   :  { %5185 = vmatprep.subr.bf16.mxu0 %v7069_v18  ;;  %5217 = vmatprep.subr.bf16.mxu1 %v7072_v22 }
 0x1e2   :  { %5187 = vmatpush1.bf16.msra.mxu0 %v7075_v25  ;;  %5219 = vmatpush1.bf16.msra.mxu1 %v7079_v27 }
 0x298   :  { %v865_v47 = vpop.f32.mrb[2].mxu0  ;;  %v936_v50 = vpop.f32.mrb[2].mxu1 }
 0x299   :  { %v6142_v53 = vadd.f32 %v865_v47, %v7133_v37  ;;  %v867_v56 = vpop.f32.mrb[3].mxu0  ;;  %v938_v60 = vpop.f32.mrb[3].mxu1  ;;  %v6158_v52 = vadd.f32 %v936_v50, %v7150_v61  ;;  %v7206_v47 = vpack.c.bf16 %v1226_v41, %v1222_v42  ;;  %v1228_v50 = vld [vmem:[#allocation10 + $0x38] sm:$0xff] }
 0x29a   :  { %v6143_v63 = vadd.f32 %v867_v56, %v7137_v39  ;;  %v6159_v49 = vadd.f32 %v938_v60, %v7144_v55  ;;  %v1225_v56 = vld [vmem:[#allocation10 + $0x20] sm:$0xff]  ;;  %v1483_v42 = vld [vmem:[#allocation10 + $0x98] sm:$0xff] }
 0x29b   :  { %v4864_v45 = vmul.f32 -1.442695, %v6142_v53  ;;  %v1221_v53 = vld [vmem:[#allocation10] sm:$0xff]  ;;  %5221 = vmatprep.subr.bf16.mxu0 %v7206_v47 }
 0x29c   :  { %v4865_v46 = vmul.f32 -1.442695, %v6143_v63  ;;  %v4866_v51 = vmul.f32 -1.442695, %v6159_v49  ;;  %v7210_v63 = vpack.c.bf16 %v1225_v56, %v1221_v53  ;;  %v1484_v53 = vld [vmem:[#allocation10 + $0xa0] sm:$0xff] }
 0x29d   :  { %6303 = vpow2.f32 %v4864_v45  ;;  %v1223_v45 = vld [vmem:[#allocation10 + $0x10] sm:$0xff] }
 0x29e   :  { %6305 = vpow2.f32 %v4865_v46  ;;  %v1227_v46 = vld [vmem:[#allocation10 + $0x30] sm:$0xff] }
 0x29f   :  { %6307 = vpow2.f32 %v4866_v51  ;;  %v7213_v49 = vpack.c.bf16 %v1227_v46, %v1223_v45  ;;  %v1230_v51 = vld [vmem:[#allocation10 + $0x48] sm:$0xff]  ;;  %v1482_v46 = vld [vmem:[#allocation10 + $0x90] sm:$0xff] }
 0x2a0   :  { %6309 = vtanh.f32 %v6158_v52  ;;  %v1234_v52 = vld [vmem:[#allocation10 + $0x68] sm:$0xff] }
 0x2a7   :  { %v6304_v59 = vpop.eup %6303 }
 0x2a8   :  { %v6306_v1 = vpop.eup %6305  ;;  %v948_v2 = vadd.f32 1.0, %v6304_v59  ;;  %v1232_v59 = vld [vmem:[#allocation10 + $0x58] sm:$0xff] }
 0x2a9   :  { %v954_v5 = vadd.f32 1.0, %v6306_v1  ;;  %v6308_v7 = vpop.eup %6307  ;;  %v7218_v1 = vpack.c.bf16 %v1234_v52, %v1230_v51  ;;  %v1486_v51 = vld [vmem:[#allocation10 + $0xb0] sm:$0xff] }
 0x2aa   :  { %6311 = vrcp.f32 %v948_v2  ;;  %v6310_v8 = vpop.eup %6309  ;;  %v961_v17 = vadd.f32 1.0, %v6308_v7  ;;  %v1236_v2 = vld [vmem:[#allocation10 + $0x78] sm:$0xff]  ;;  %v1233_v7 = vld [vmem:[#allocation10 + $0x60] sm:$0xff]  ;;  %v7283_v52 = vpack.c.bf16 %v1486_v51, %v1482_v46  ;;  %v1517_v51 = vld [vmem:[#allocation10 + $0x1a8] sm:$0xff] }
 0x2ab   :  { %6313 = vrcp.f32 %v954_v5  ;;  %v1229_v5 = vld [vmem:[#allocation10 + $0x40] sm:$0xff] }
 0x2ac   :  { %6315 = vrcp.f32 %v961_v17 }
 0x2b4   :  { %v6312_v11 = vpop.eup %6311 }
 0x2b5   :  { %v6314_v12 = vpop.eup %6313  ;;  %v965_v15 = vmul.f32 %v6312_v11, %v6310_v8  ;;  %v7220_v8 = vpack.c.bf16 %v1236_v2, %v1232_v59  ;;  %v7222_v11 = vpack.c.bf16 %v1233_v7, %v1229_v5  ;;  %v1489_v59 = vld [vmem:[#allocation10 + $0xc8] sm:$0xff]  ;;  %v1491_v5 = vld [vmem:[#allocation10 + $0xd8] sm:$0xff] }
 0x2b6   :  { %v964_v20 = vmul.f32 %v6314_v12, %v7153_v34  ;;  %v6316_v24 = vpop.eup %6315  ;;  %v1224_v34 = vld [vmem:[#allocation10 + $0x18] sm:$0xff]  ;;  %v1231_v12 = vld [vmem:[#allocation10 + $0x50] sm:$0xff]  ;;  %v1493_v2 = vld [vmem:[#allocation10 + $0xe8] sm:$0xff] }
 0x2b7   :  { %v7208_v60 = vpack.c.bf16 %v1228_v50, %v1224_v34  ;;  %v1487_v34 = vld [vmem:[#allocation10 + $0xb8] sm:$0xff]  ;;  %v1480_v50 = vld [vmem:[#allocation10 + $0x80] sm:$0xff]  ;;  %v7288_v7 = vpack.c.bf16 %v1493_v2, %v1489_v59 }
 0x2b8   :  { %v7197_v21 = vadd.f32 %v965_v15, %v964_v20  ;;  %v1235_v15 = vld [vmem:[#allocation10 + $0x70] sm:$0xff]  ;;  %v7278_v56 = vpack.c.bf16 %v1487_v34, %v1483_v42  ;;  %v7280_v45 = vpack.c.bf16 %v1484_v53, %v1480_v50  ;;  %v1513_v53 = vld [vmem:[#allocation10 + $0x188] sm:$0xff]  ;;  %v1515_v59 = vld [vmem:[#allocation10 + $0x198] sm:$0xff] }
 0x2b9   :  { %5253 = vmatprep.subr.bf16.mxu1 %v7208_v60  ;;  %v7225_v17 = vpack.c.bf16 %v1235_v15, %v1231_v12  ;;  %v1495_v12 = vld [vmem:[#allocation10 + $0xf8] sm:$0xff]  ;;  %v1488_v15 = vld [vmem:[#allocation10 + $0xc0] sm:$0xff]  ;;  %v1506_v34 = vld [vmem:[#allocation10 + $0x150] sm:$0xff] }
 0x2ba   :  { %6317 = vtanh.f32 %v7197_v21  ;;  %v1510_v50 = vld [vmem:[#allocation10 + $0x170] sm:$0xff]  ;;  %v1519_v2 = vld [vmem:[#allocation10 + $0x1b8] sm:$0xff] }
 0x2bb   :  { %v7319_v46 = vpack.c.bf16 %v1510_v50, %v1506_v34 }
 0x2c4   :  { %v6318_v28 = vpop.eup %6317 }
 0x2c5   :  { %v7200_v30 = vmul.f32 %v6318_v28, %v6316_v24  ;;  %v1485_v28 = vld [vmem:[#allocation10 + $0xa8] sm:$0xff] }
 0x2c7   :  { %1107 = vmatmul.mubr.f32.vlgmr.msra.gmra.mrb[4].mxu0 %v7200_v30  ;;  %1178 = vmatmul.mubr.f32.vlgmr.msra.gmra.mrb[4].mxu1 %v7200_v30 }
 0x2c8   :  { %1349 = vmatprep.mubr.f32.mxu0 %v6792_v0  ;;  %1420 = vmatprep.mubr.f32.mxu1 %v6792_v0 }
 0x2c9   :  { %5223 = vmatpush1.bf16.msra.mxu0 %v7210_v63  ;;  %5255 = vmatpush1.bf16.msra.mxu1 %v7213_v49 }
 0x2ca   :  { %5225 = vmatprep.subr.bf16.mxu0 %v7218_v1  ;;  %5257 = vmatprep.subr.bf16.mxu1 %v7220_v8 }
 0x2cd   :  { %5227 = vmatpush1.bf16.msra.mxu0 %v7222_v11  ;;  %5259 = vmatpush1.bf16.msra.mxu1 %v7225_v17 }
 0x2ce   :  { %5229 = vmatprep.subr.bf16.mxu0 %v6999_v3  ;;  %5261 = vmatprep.subr.bf16.mxu1 %v7002_v6 }
 0x2d1   :  { %5231 = vmatpush1.bf16.msra.mxu0 %v7005_v10  ;;  %5263 = vmatpush1.bf16.msra.mxu1 %v7009_v13 }
 0x2d2   :  { %5233 = vmatprep.subr.bf16.mxu0 %v7013_v16  ;;  %5265 = vmatprep.subr.bf16.mxu1 %v7016_v19 }
 0x2d5   :  { %5235 = vmatpush1.bf16.msra.mxu0 %v7019_v23  ;;  %5267 = vmatpush1.bf16.msra.mxu1 %v7023_v26 }
 0x2d6   :  { %5237 = vmatprep.subr.bf16.mxu0 %v7027_v29  ;;  %5269 = vmatprep.subr.bf16.mxu1 %v7030_v32 }
 0x2d9   :  { %5239 = vmatpush1.bf16.msra.mxu0 %v7033_v36  ;;  %5271 = vmatpush1.bf16.msra.mxu1 %v7037_v40 }
 0x2da   :  { %5241 = vmatprep.subr.bf16.mxu0 %v7041_v44  ;;  %5273 = vmatprep.subr.bf16.mxu1 %v7044_v48 }
 0x2dd   :  { %5243 = vmatpush1.bf16.msra.mxu0 %v7047_v54  ;;  %5275 = vmatpush1.bf16.msra.mxu1 %v7051_v58 }
 0x2de   :  { %5245 = vmatprep.subr.bf16.mxu0 %v7055_v62  ;;  %5277 = vmatprep.subr.bf16.mxu1 %v7058_v4 }
 0x2e1   :  { %5247 = vmatpush1.bf16.msra.mxu0 %v7061_v9  ;;  %5279 = vmatpush1.bf16.msra.mxu1 %v7065_v14 }
 0x2e2   :  { %5249 = vmatprep.subr.bf16.mxu0 %v7069_v18  ;;  %5281 = vmatprep.subr.bf16.mxu1 %v7072_v22 }
 0x2e5   :  { %5251 = vmatpush1.bf16.msra.mxu0 %v7075_v25  ;;  %5283 = vmatpush1.bf16.msra.mxu1 %v7079_v27 }
 0x2e6   :  { %5285 = vmatprep.subr.bf16.mxu0 %v7206_v47  ;;  %5317 = vmatprep.subr.bf16.mxu1 %v7208_v60 }
 0x39a   :  { %v1108_v3 = vpop.f32.mrb[4].mxu0  ;;  %v1179_v6 = vpop.f32.mrb[4].mxu1 }
 0x39b   :  { %v6144_v10 = vadd.f32 %v1108_v3, %v7133_v37  ;;  %v1110_v13 = vpop.f32.mrb[5].mxu0  ;;  %v1181_v16 = vpop.f32.mrb[5].mxu1  ;;  %v6160_v36 = vadd.f32 %v1179_v6, %v7150_v61  ;;  %v1492_v3 = vld [vmem:[#allocation10 + $0xe0] sm:$0xff]  ;;  %v7290_v6 = vpack.c.bf16 %v1495_v12, %v1491_v5  ;;  %v7322_v5 = vpack.c.bf16 %v1517_v51, %v1513_v53 }
 0x39c   :  { %v6145_v19 = vadd.f32 %v1110_v13, %v7137_v39  ;;  %v6161_v29 = vadd.f32 %v1181_v16, %v7144_v55  ;;  %v1490_v13 = vld [vmem:[#allocation10 + $0xd0] sm:$0xff]  ;;  %v7324_v12 = vpack.c.bf16 %v1519_v2, %v1515_v59 }
 0x39d   :  { %v4867_v23 = vmul.f32 -1.442695, %v6144_v10  ;;  %v7292_v10 = vpack.c.bf16 %v1492_v3, %v1488_v15  ;;  %v1494_v16 = vld [vmem:[#allocation10 + $0xf0] sm:$0xff]  ;;  %v1512_v15 = vld [vmem:[#allocation10 + $0x180] sm:$0xff] }
 0x39e   :  { %v4868_v26 = vmul.f32 -1.442695, %v6145_v19  ;;  %v4869_v32 = vmul.f32 -1.442695, %v6161_v29  ;;  %v7295_v19 = vpack.c.bf16 %v1494_v16, %v1490_v13  ;;  %v1499_v29 = vld [vmem:[#allocation10 + $0x118] sm:$0xff]  ;;  %v1516_v3 = vld [vmem:[#allocation10 + $0x1a0] sm:$0xff] }
 0x39f   :  { %6319 = vpow2.f32 %v4867_v23  ;;  %v1497_v23 = vld [vmem:[#allocation10 + $0x108] sm:$0xff]  ;;  %v1514_v13 = vld [vmem:[#allocation10 + $0x190] sm:$0xff]  ;;  %v7327_v16 = vpack.c.bf16 %v1516_v3, %v1512_v15 }
 0x3a0   :  { %6321 = vpow2.f32 %v4868_v26  ;;  %v1501_v26 = vld [vmem:[#allocation10 + $0x128] sm:$0xff] }
 0x3a1   :  { %6323 = vpow2.f32 %v4869_v32  ;;  %v7300_v32 = vpack.c.bf16 %v1501_v26, %v1497_v23  ;;  %v1518_v23 = vld [vmem:[#allocation10 + $0x1b0] sm:$0xff]  ;;  %v1521_v26 = vld [vmem:[#allocation10 + $0x1c8] sm:$0xff] }
 0x3a2   :  { %6325 = vtanh.f32 %v6160_v36  ;;  %v1503_v36 = vld [vmem:[#allocation10 + $0x138] sm:$0xff] }
 0x3a9   :  { %v6320_v40 = vpop.eup %6319 }
 0x3aa   :  { %v6322_v44 = vpop.eup %6321  ;;  %v1191_v48 = vadd.f32 1.0, %v6320_v40  ;;  %v1496_v40 = vld [vmem:[#allocation10 + $0x100] sm:$0xff] }
 0x3ab   :  { %v1197_v54 = vadd.f32 1.0, %v6322_v44  ;;  %v6324_v58 = vpop.eup %6323  ;;  %v1500_v44 = vld [vmem:[#allocation10 + $0x120] sm:$0xff] }
 0x3ac   :  { %6327 = vrcp.f32 %v1191_v48  ;;  %v6326_v62 = vpop.eup %6325  ;;  %v1204_v18 = vadd.f32 1.0, %v6324_v58  ;;  %v7302_v48 = vpack.c.bf16 %v1503_v36, %v1499_v29  ;;  %v1498_v58 = vld [vmem:[#allocation10 + $0x110] sm:$0xff]  ;;  %v1525_v29 = vld [vmem:[#allocation10 + $0x1e8] sm:$0xff]  ;;  %v7331_v36 = vpack.c.bf16 %v1518_v23, %v1514_v13 }
 0x3ad   :  { %6329 = vrcp.f32 %v1197_v54  ;;  %v7304_v54 = vpack.c.bf16 %v1500_v44, %v1496_v40  ;;  %v7333_v40 = vpack.c.bf16 %v1525_v29, %v1521_v26  ;;  %v1523_v44 = vld [vmem:[#allocation10 + $0x1d8] sm:$0xff] }
 0x3ae   :  { %6331 = vrcp.f32 %v1204_v18  ;;  %v1507_v18 = vld [vmem:[#allocation10 + $0x158] sm:$0xff] }
 0x3b6   :  { %v6328_v4 = vpop.eup %6327 }
 0x3b7   :  { %v6330_v9 = vpop.eup %6329  ;;  %v1208_v14 = vmul.f32 %v6328_v4, %v6326_v62  ;;  %v1502_v62 = vld [vmem:[#allocation10 + $0x130] sm:$0xff] }
 0x3b8   :  { %v1207_v22 = vmul.f32 %v6330_v9, %v7197_v21  ;;  %v6332_v27 = vpop.eup %6331  ;;  %v1481_v21 = vld [vmem:[#allocation10 + $0x88] sm:$0xff]  ;;  %v7307_v4 = vpack.c.bf16 %v1502_v62, %v1498_v58  ;;  %v1527_v58 = vld [vmem:[#allocation10 + $0x1f8] sm:$0xff]  ;;  %v1520_v62 = vld [vmem:[#allocation10 + $0x1c0] sm:$0xff] }
 0x3b9   :  { %v7276_v41 = vpack.c.bf16 %v1485_v28, %v1481_v21  ;;  %v1505_v9 = vld [vmem:[#allocation10 + $0x148] sm:$0xff]  ;;  %v1508_v21 = vld [vmem:[#allocation10 + $0x160] sm:$0xff] }
 0x3ba   :  { %v7261_v25 = vadd.f32 %v1208_v14, %v1207_v22  ;;  %v1509_v14 = vld [vmem:[#allocation10 + $0x168] sm:$0xff] }
 0x3bb   :  { %v7311_v22 = vpack.c.bf16 %v1509_v14, %v1505_v9  ;;  %v7336_v9 = vpack.c.bf16 %v1527_v58, %v1523_v44  ;;  %v1524_v14 = vld [vmem:[#allocation10 + $0x1e0] sm:$0xff] }
 0x3bc   :  { %6333 = vtanh.f32 %v7261_v25 }
 0x3c6   :  { %v6334_v20 = vpop.eup %6333 }
 0x3c7   :  { %v7264_v24 = vmul.f32 %v6334_v20, %v6332_v27  ;;  %v1511_v27 = vld [vmem:[#allocation10 + $0x178] sm:$0xff]  ;;  %v1504_v20 = vld [vmem:[#allocation10 + $0x140] sm:$0xff] }
 0x3c8   :  { %v7314_v28 = vpack.c.bf16 %v1511_v27, %v1507_v18  ;;  %v7316_v42 = vpack.c.bf16 %v1508_v21, %v1504_v20  ;;  %v1522_v18 = vld [vmem:[#allocation10 + $0x1d0] sm:$0xff]  ;;  %v7339_v20 = vpack.c.bf16 %v1524_v14, %v1520_v62 }
 0x3c9   :  { %1350 = vmatmul.mubr.f32.vlgmr.msra.gmra.mrb[6].mxu0 %v7264_v24  ;;  %1421 = vmatmul.mubr.f32.vlgmr.msra.gmra.mrb[6].mxu1 %v7264_v24  ;;  %v1526_v27 = vld [vmem:[#allocation10 + $0x1f0] sm:$0xff] }
 0x3ca   :  { %5287 = vmatpush1.bf16.msra.mxu0 %v7210_v63  ;;  %5319 = vmatpush1.bf16.msra.mxu1 %v7213_v49  ;;  %v7343_v21 = vpack.c.bf16 %v1526_v27, %v1522_v18 }
 0x3cb   :  { %5289 = vmatprep.subr.bf16.mxu0 %v7218_v1  ;;  %5321 = vmatprep.subr.bf16.mxu1 %v7220_v8 }
 0x3cc   :  { %1592 = vmatprep.mubr.f32.mxu0 %v6792_v0  ;;  %1663 = vmatprep.mubr.f32.mxu1 %v6792_v0 }
 0x3ce   :  { %5291 = vmatpush1.bf16.msra.mxu0 %v7222_v11  ;;  %5323 = vmatpush1.bf16.msra.mxu1 %v7225_v17 }
 0x3cf   :  { %5293 = vmatprep.subr.bf16.mxu0 %v7276_v41  ;;  %5325 = vmatprep.subr.bf16.mxu1 %v7278_v56 }
 0x3d2   :  { %5295 = vmatpush1.bf16.msra.mxu0 %v7280_v45  ;;  %5327 = vmatpush1.bf16.msra.mxu1 %v7283_v52 }
 0x3d3   :  { %5297 = vmatprep.subr.bf16.mxu0 %v7288_v7  ;;  %5329 = vmatprep.subr.bf16.mxu1 %v7290_v6 }
 0x3d6   :  { %5299 = vmatpush1.bf16.msra.mxu0 %v7292_v10  ;;  %5331 = vmatpush1.bf16.msra.mxu1 %v7295_v19 }
 0x3d7   :  { %5301 = vmatprep.subr.bf16.mxu0 %v7300_v32  ;;  %5333 = vmatprep.subr.bf16.mxu1 %v7302_v48 }
 0x3da   :  { %5303 = vmatpush1.bf16.msra.mxu0 %v7304_v54  ;;  %5335 = vmatpush1.bf16.msra.mxu1 %v7307_v4 }
 0x3db   :  { %5305 = vmatprep.subr.bf16.mxu0 %v7311_v22  ;;  %5337 = vmatprep.subr.bf16.mxu1 %v7314_v28 }
 0x3de   :  { %5307 = vmatpush1.bf16.msra.mxu0 %v7316_v42  ;;  %5339 = vmatpush1.bf16.msra.mxu1 %v7319_v46 }
 0x3df   :  { %5309 = vmatprep.subr.bf16.mxu0 %v7322_v5  ;;  %5341 = vmatprep.subr.bf16.mxu1 %v7324_v12 }
 0x3e2   :  { %5311 = vmatpush1.bf16.msra.mxu0 %v7327_v16  ;;  %5343 = vmatpush1.bf16.msra.mxu1 %v7331_v36 }
 0x3e3   :  { %5313 = vmatprep.subr.bf16.mxu0 %v7333_v40  ;;  %5345 = vmatprep.subr.bf16.mxu1 %v7336_v9 }
 0x3e6   :  { %5315 = vmatpush1.bf16.msra.mxu0 %v7339_v20  ;;  %5347 = vmatpush1.bf16.msra.mxu1 %v7343_v21 }
 0x3e7   :  { %5349 = vmatprep.subr.bf16.mxu0 %v7206_v47  ;;  %5381 = vmatprep.subr.bf16.mxu1 %v7208_v60 }
 0x49c   :  { %v1351_v34 = vpop.f32.mrb[6].mxu0  ;;  %v1422_v50 = vpop.f32.mrb[6].mxu1 }
 0x49d   :  { %v6146_v53 = vadd.f32 %v1351_v34, %v7133_v37  ;;  %v1353_v51 = vpop.f32.mrb[7].mxu0  ;;  %v1424_v59 = vpop.f32.mrb[7].mxu1  ;;  %v6162_v26 = vadd.f32 %v1422_v50, %v7150_v61 }
 0x49e   :  { %v6147_v2 = vadd.f32 %v1353_v51, %v7137_v39  ;;  %v6163_v13 = vadd.f32 %v1424_v59, %v7144_v55 }
 0x49f   :  { %v4870_v15 = vmul.f32 -1.442695, %v6146_v53 }
 0x4a0   :  { %v4871_v3 = vmul.f32 -1.442695, %v6147_v2  ;;  %v4872_v23 = vmul.f32 -1.442695, %v6163_v13 }
 0x4a1   :  { %6335 = vpow2.f32 %v4870_v15 }
 0x4a2   :  { %6337 = vpow2.f32 %v4871_v3 }
 0x4a3   :  { %6339 = vpow2.f32 %v4872_v23 }
 0x4a4   :  { %6341 = vtanh.f32 %v6162_v26 }
 0x4ab   :  { %v6336_v29 = vpop.eup %6335 }
 0x4ac   :  { %v6338_v44 = vpop.eup %6337  ;;  %v1434_v58 = vadd.f32 1.0, %v6336_v29 }
 0x4ad   :  { %v1440_v62 = vadd.f32 1.0, %v6338_v44  ;;  %v6340_v14 = vpop.eup %6339 }
 0x4ae   :  { %6343 = vrcp.f32 %v1434_v58  ;;  %v6342_v18 = vpop.eup %6341  ;;  %v1447_v51 = vadd.f32 1.0, %v6340_v14 }
 0x4af   :  { %6345 = vrcp.f32 %v1440_v62 }
 0x4b0   :  { %6347 = vrcp.f32 %v1447_v51 }
 0x4b8   :  { %v6344_v27 = vpop.eup %6343 }
 0x4b9   :  { %v6346_v34 = vpop.eup %6345  ;;  %v1451_v53 = vmul.f32 %v6344_v27, %v6342_v18 }
 0x4ba   :  { %v1450_v2 = vmul.f32 %v6346_v34, %v7261_v25  ;;  %v6348_v50 = vpop.eup %6347 }
 0x4bc   :  { %v7355_v59 = vadd.f32 %v1451_v53, %v1450_v2 }
 0x4be   :  { %6349 = vtanh.f32 %v7355_v59 }
 0x4c8   :  { %v6350_v15 = vpop.eup %6349 }
 0x4c9   :  { %v7358_v3 = vmul.f32 %v6350_v15, %v6348_v50 }
 0x4cb   :  { %1593 = vmatmul.mubr.f32.vlgmr.msra.gmra.mrb[8].mxu0 %v7358_v3  ;;  %1664 = vmatmul.mubr.f32.vlgmr.msra.gmra.mrb[8].mxu1 %v7358_v3 }
 0x4cc   :  { %5351 = vmatpush1.bf16.msra.mxu0 %v7210_v63  ;;  %5383 = vmatpush1.bf16.msra.mxu1 %v7213_v49 }
 0x4cd   :  { %5353 = vmatprep.subr.bf16.mxu0 %v7218_v1  ;;  %5385 = vmatprep.subr.bf16.mxu1 %v7220_v8 }
 0x4ce   :  { %1835 = vmatprep.mubr.f32.mxu0 %v6792_v0  ;;  %1906 = vmatprep.mubr.f32.mxu1 %v6792_v0 }
 0x4d0   :  { %5355 = vmatpush1.bf16.msra.mxu0 %v7222_v11  ;;  %5387 = vmatpush1.bf16.msra.mxu1 %v7225_v17 }
 0x4d1   :  { %5357 = vmatprep.subr.bf16.mxu0 %v7276_v41  ;;  %5389 = vmatprep.subr.bf16.mxu1 %v7278_v56 }
 0x4d4   :  { %5359 = vmatpush1.bf16.msra.mxu0 %v7280_v45  ;;  %5391 = vmatpush1.bf16.msra.mxu1 %v7283_v52 }
 0x4d5   :  { %5361 = vmatprep.subr.bf16.mxu0 %v7288_v7  ;;  %5393 = vmatprep.subr.bf16.mxu1 %v7290_v6 }
 0x4d8   :  { %5363 = vmatpush1.bf16.msra.mxu0 %v7292_v10  ;;  %5395 = vmatpush1.bf16.msra.mxu1 %v7295_v19 }
 0x4d9   :  { %5365 = vmatprep.subr.bf16.mxu0 %v7300_v32  ;;  %5397 = vmatprep.subr.bf16.mxu1 %v7302_v48 }
 0x4dc   :  { %5367 = vmatpush1.bf16.msra.mxu0 %v7304_v54  ;;  %5399 = vmatpush1.bf16.msra.mxu1 %v7307_v4 }
 0x4dd   :  { %5369 = vmatprep.subr.bf16.mxu0 %v7311_v22  ;;  %5401 = vmatprep.subr.bf16.mxu1 %v7314_v28 }
 0x4e0   :  { %5371 = vmatpush1.bf16.msra.mxu0 %v7316_v42  ;;  %5403 = vmatpush1.bf16.msra.mxu1 %v7319_v46 }
 0x4e1   :  { %5373 = vmatprep.subr.bf16.mxu0 %v7322_v5  ;;  %5405 = vmatprep.subr.bf16.mxu1 %v7324_v12 }
 0x4e4   :  { %5375 = vmatpush1.bf16.msra.mxu0 %v7327_v16  ;;  %5407 = vmatpush1.bf16.msra.mxu1 %v7331_v36 }
 0x4e5   :  { %5377 = vmatprep.subr.bf16.mxu0 %v7333_v40  ;;  %5409 = vmatprep.subr.bf16.mxu1 %v7336_v9 }
 0x4e8   :  { %5379 = vmatpush1.bf16.msra.mxu0 %v7339_v20  ;;  %5411 = vmatpush1.bf16.msra.mxu1 %v7343_v21 }
 0x4e9   :  { %5413 = vmatprep.subr.bf16.mxu0 %v7206_v47  ;;  %5445 = vmatprep.subr.bf16.mxu1 %v7208_v60 }
 0x59e   :  { %v1594_v25 = vpop.f32.mrb[8].mxu0  ;;  %v1665_v13 = vpop.f32.mrb[8].mxu1 }
 0x59f   :  { %v6148_v23 = vadd.f32 %v1594_v25, %v7133_v37  ;;  %v1596_v26 = vpop.f32.mrb[9].mxu0  ;;  %v1667_v29 = vpop.f32.mrb[9].mxu1  ;;  %v6164_v27 = vadd.f32 %v1665_v13, %v7150_v61 }
 0x5a0   :  { %v6149_v44 = vadd.f32 %v1596_v26, %v7137_v39  ;;  %v6165_v14 = vadd.f32 %v1667_v29, %v7144_v55 }
 0x5a1   :  { %v4873_v58 = vmul.f32 -1.442695, %v6148_v23 }
 0x5a2   :  { %v4874_v62 = vmul.f32 -1.442695, %v6149_v44  ;;  %v4875_v18 = vmul.f32 -1.442695, %v6165_v14 }
 0x5a3   :  { %6351 = vpow2.f32 %v4873_v58 }
 0x5a4   :  { %6353 = vpow2.f32 %v4874_v62 }
 0x5a5   :  { %6355 = vpow2.f32 %v4875_v18 }
 0x5a6   :  { %6357 = vtanh.f32 %v6164_v27 }
 0x5ad   :  { %v6352_v47 = vpop.eup %6351 }
 0x5ae   :  { %v6354_v34 = vpop.eup %6353  ;;  %v1677_v60 = vadd.f32 1.0, %v6352_v47 }
 0x5af   :  { %v1683_v53 = vadd.f32 1.0, %v6354_v34  ;;  %v6356_v51 = vpop.eup %6355 }
 0x5b0   :  { %6359 = vrcp.f32 %v1677_v60  ;;  %v6358_v2 = vpop.eup %6357  ;;  %v1690_v23 = vadd.f32 1.0, %v6356_v51 }
 0x5b1   :  { %6361 = vrcp.f32 %v1683_v53 }
 0x5b2   :  { %6363 = vrcp.f32 %v1690_v23 }
 0x5ba   :  { %v6360_v50 = vpop.eup %6359 }
 0x5bb   :  { %v6362_v15 = vpop.eup %6361  ;;  %v1694_v25 = vmul.f32 %v6360_v50, %v6358_v2 }
 0x5bc   :  { %v1693_v26 = vmul.f32 %v6362_v15, %v7355_v59  ;;  %v6364_v13 = vpop.eup %6363 }
 0x5be   :  { %v7401_v29 = vadd.f32 %v1694_v25, %v1693_v26 }
 0x5c0   :  { %6365 = vtanh.f32 %v7401_v29 }
 0x5ca   :  { %v6366_v44 = vpop.eup %6365 }
 0x5cb   :  { %v7404_v58 = vmul.f32 %v6366_v44, %v6364_v13 }
 0x5cd   :  { %1836 = vmatmul.mubr.f32.vlgmr.msra.gmra.mrb[10].mxu0 %v7404_v58  ;;  %1907 = vmatmul.mubr.f32.vlgmr.msra.gmra.mrb[10].mxu1 %v7404_v58 }
 0x5ce   :  { %5415 = vmatpush1.bf16.msra.mxu0 %v7210_v63  ;;  %5447 = vmatpush1.bf16.msra.mxu1 %v7213_v49 }
 0x5cf   :  { %5417 = vmatprep.subr.bf16.mxu0 %v7218_v1  ;;  %5449 = vmatprep.subr.bf16.mxu1 %v7220_v8 }
 0x5d0   :  { %2078 = vmatprep.mubr.f32.mxu0 %v6792_v0  ;;  %2149 = vmatprep.mubr.f32.mxu1 %v6792_v0 }
 0x5d2   :  { %5419 = vmatpush1.bf16.msra.mxu0 %v7222_v11  ;;  %5451 = vmatpush1.bf16.msra.mxu1 %v7225_v17 }
 0x5d3   :  { %5421 = vmatprep.subr.bf16.mxu0 %v7276_v41  ;;  %5453 = vmatprep.subr.bf16.mxu1 %v7278_v56 }
 0x5d6   :  { %5423 = vmatpush1.bf16.msra.mxu0 %v7280_v45  ;;  %5455 = vmatpush1.bf16.msra.mxu1 %v7283_v52 }
 0x5d7   :  { %5425 = vmatprep.subr.bf16.mxu0 %v7288_v7  ;;  %5457 = vmatprep.subr.bf16.mxu1 %v7290_v6 }
 0x5da   :  { %5427 = vmatpush1.bf16.msra.mxu0 %v7292_v10  ;;  %5459 = vmatpush1.bf16.msra.mxu1 %v7295_v19 }
 0x5db   :  { %5429 = vmatprep.subr.bf16.mxu0 %v7300_v32  ;;  %5461 = vmatprep.subr.bf16.mxu1 %v7302_v48 }
 0x5de   :  { %5431 = vmatpush1.bf16.msra.mxu0 %v7304_v54  ;;  %5463 = vmatpush1.bf16.msra.mxu1 %v7307_v4 }
 0x5df   :  { %5433 = vmatprep.subr.bf16.mxu0 %v7311_v22  ;;  %5465 = vmatprep.subr.bf16.mxu1 %v7314_v28 }
 0x5e2   :  { %5435 = vmatpush1.bf16.msra.mxu0 %v7316_v42  ;;  %5467 = vmatpush1.bf16.msra.mxu1 %v7319_v46 }
 0x5e3   :  { %5437 = vmatprep.subr.bf16.mxu0 %v7322_v5  ;;  %5469 = vmatprep.subr.bf16.mxu1 %v7324_v12 }
 0x5e6   :  { %5439 = vmatpush1.bf16.msra.mxu0 %v7327_v16  ;;  %5471 = vmatpush1.bf16.msra.mxu1 %v7331_v36 }
 0x5e7   :  { %5441 = vmatprep.subr.bf16.mxu0 %v7333_v40  ;;  %5473 = vmatprep.subr.bf16.mxu1 %v7336_v9 }
 0x5ea   :  { %5443 = vmatpush1.bf16.msra.mxu0 %v7339_v20  ;;  %5475 = vmatpush1.bf16.msra.mxu1 %v7343_v21 }
 0x6a0   :  { %v1837_v63 = vpop.f32.mrb[10].mxu0  ;;  %v1908_v49 = vpop.f32.mrb[10].mxu1 }
 0x6a1   :  { %v6150_v1 = vadd.f32 %v1837_v63, %v7133_v37  ;;  %v1839_v8 = vpop.f32.mrb[11].mxu0  ;;  %v1910_v11 = vpop.f32.mrb[11].mxu1  ;;  %v6166_v27 = vadd.f32 %v1908_v49, %v7150_v61 }
 0x6a2   :  { %v6151_v17 = vadd.f32 %v1839_v8, %v7137_v39  ;;  %v6167_v14 = vadd.f32 %v1910_v11, %v7144_v55  ;;  %v2198_v8 = vld [vmem:[#allocation10 + $0x28] sm:$0xff] }
 0x6a3   :  { %v4876_v59 = vmul.f32 -1.442695, %v6150_v1  ;;  %v2194_v1 = vld [vmem:[#allocation10 + $0x8] sm:$0xff] }
 0x6a4   :  { %v4877_v62 = vmul.f32 -1.442695, %v6151_v17  ;;  %v4878_v18 = vmul.f32 -1.442695, %v6167_v14  ;;  %v5476_v11 = vpack.c.bf16 %v2198_v8, %v2194_v1  ;;  %v2200_v17 = vld [vmem:[#allocation10 + $0x38] sm:$0xff] }
 0x6a5   :  { %6367 = vpow2.f32 %v4876_v59  ;;  %v2193_v59 = vld [vmem:[#allocation10] sm:$0xff] }
 0x6a6   :  { %6369 = vpow2.f32 %v4877_v62  ;;  %v2197_v62 = vld [vmem:[#allocation10 + $0x20] sm:$0xff]  ;;  %5477 = vmatprep.subr.bf16.mxu0 %v5476_v11 }
 0x6a7   :  { %6371 = vpow2.f32 %v4878_v18  ;;  %v5478_v18 = vpack.c.bf16 %v2197_v62, %v2193_v59  ;;  %v2439_v62 = vld [vmem:[#allocation9] sm:$0xff] }
 0x6a8   :  { %6373 = vtanh.f32 %v6166_v27  ;;  %v2195_v27 = vld [vmem:[#allocation10 + $0x10] sm:$0xff] }
 0x6af   :  { %v6368_v47 = vpop.eup %6367 }
 0x6b0   :  { %v6370_v34 = vpop.eup %6369  ;;  %v1920_v60 = vadd.f32 1.0, %v6368_v47  ;;  %v2199_v47 = vld [vmem:[#allocation10 + $0x30] sm:$0xff] }
 0x6b1   :  { %v1926_v53 = vadd.f32 1.0, %v6370_v34  ;;  %v6372_v51 = vpop.eup %6371  ;;  %v5510_v34 = vpack.c.bf16 %v2199_v47, %v2195_v27  ;;  %v2445_v27 = vld [vmem:[#allocation9 + $0x30] sm:$0xff]  ;;  %v2448_v47 = vld [vmem:[#allocation9 + $0x48] sm:$0xff] }
 0x6b2   :  { %6375 = vrcp.f32 %v1920_v60  ;;  %v6374_v2 = vpop.eup %6373  ;;  %v1933_v23 = vadd.f32 1.0, %v6372_v51  ;;  %v2202_v60 = vld [vmem:[#allocation10 + $0x48] sm:$0xff]  ;;  %v2204_v51 = vld [vmem:[#allocation10 + $0x58] sm:$0xff] }
 0x6b3   :  { %6377 = vrcp.f32 %v1926_v53  ;;  %v2206_v53 = vld [vmem:[#allocation10 + $0x68] sm:$0xff] }
 0x6b4   :  { %6379 = vrcp.f32 %v1933_v23 }
 0x6bc   :  { %v6376_v50 = vpop.eup %6375 }
 0x6bd   :  { %v6378_v15 = vpop.eup %6377  ;;  %v1937_v25 = vmul.f32 %v6376_v50, %v6374_v2  ;;  %v5480_v2 = vpack.c.bf16 %v2206_v53, %v2202_v60  ;;  %v2208_v50 = vld [vmem:[#allocation10 + $0x78] sm:$0xff] }
 0x6be   :  { %v1936_v26 = vmul.f32 %v6378_v15, %v7401_v29  ;;  %v6380_v44 = vpop.eup %6379  ;;  %v2196_v29 = vld [vmem:[#allocation10 + $0x18] sm:$0xff]  ;;  %v2201_v15 = vld [vmem:[#allocation10 + $0x40] sm:$0xff]  ;;  %v5512_v23 = vpack.c.bf16 %v2208_v50, %v2204_v51 }
 0x6bf   :  { %v5508_v14 = vpack.c.bf16 %v2200_v17, %v2196_v29  ;;  %v2450_v60 = vld [vmem:[#allocation9 + $0x58] sm:$0xff] }
 0x6c0   :  { %v7445_v13 = vadd.f32 %v1937_v25, %v1936_v26  ;;  %v2205_v25 = vld [vmem:[#allocation10 + $0x60] sm:$0xff]  ;;  %v2454_v53 = vld [vmem:[#allocation9 + $0x78] sm:$0xff] }
 0x6c1   :  { %5509 = vmatprep.subr.bf16.mxu1 %v5508_v14  ;;  %v5482_v26 = vpack.c.bf16 %v2205_v25, %v2201_v15  ;;  %v2443_v14 = vld [vmem:[#allocation9 + $0x20] sm:$0xff] }
 0x6c2   :  { %6381 = vtanh.f32 %v7445_v13  ;;  %v5542_v50 = vpack.c.bf16 %v2443_v14, %v2439_v62  ;;  %v2447_v25 = vld [vmem:[#allocation9 + $0x40] sm:$0xff] }
 0x6cc   :  { %v6382_v63 = vpop.eup %6381 }
 0x6cd   :  { %v7448_v49 = vmul.f32 %v6382_v63, %v6380_v44  ;;  %v2203_v44 = vld [vmem:[#allocation10 + $0x50] sm:$0xff] }
 0x6ce   :  { %v2207_v63 = vld [vmem:[#allocation10 + $0x70] sm:$0xff] }
 0x6cf   :  { %2079 = vmatmul.mubr.f32.vlgmr.msra.gmra.mrb[12].mxu0 %v7448_v49  ;;  %2150 = vmatmul.mubr.f32.vlgmr.msra.gmra.mrb[12].mxu1 %v7448_v49  ;;  %v5514_v1 = vpack.c.bf16 %v2207_v63, %v2203_v44  ;;  %v5576_v44 = vpack.c.bf16 %v2454_v53, %v2450_v60  ;;  %v2449_v63 = vld [vmem:[#allocation9 + $0x50] sm:$0xff] }
 0x6d0   :  { %2321 = vmatprep.mubr.f32.mxu0 %v6792_v0  ;;  %2392 = vmatprep.mubr.f32.mxu1 %v6792_v0  ;;  %v2473_v60 = vld [vmem:[#allocation9 + $0x110] sm:$0xff] }
 0x6d1   :  { %5479 = vmatpush1.bf16.msra.mxu0 %v5478_v18  ;;  %5511 = vmatpush1.bf16.msra.mxu1 %v5510_v34  ;;  %v2441_v18 = vld [vmem:[#allocation9 + $0x10] sm:$0xff]  ;;  %v2452_v34 = vld [vmem:[#allocation9 + $0x68] sm:$0xff] }
 0x6d2   :  { %5481 = vmatprep.subr.bf16.mxu0 %v5480_v2  ;;  %5513 = vmatprep.subr.bf16.mxu1 %v5512_v23  ;;  %v5574_v15 = vpack.c.bf16 %v2445_v27, %v2441_v18  ;;  %v2451_v23 = vld [vmem:[#allocation9 + $0x60] sm:$0xff]  ;;  %v2477_v53 = vld [vmem:[#allocation9 + $0x130] sm:$0xff] }
 0x6d3   :  { %v2471_v18 = vld [vmem:[#allocation9 + $0x100] sm:$0xff] }
 0x6d4   :  { %v2475_v27 = vld [vmem:[#allocation9 + $0x120] sm:$0xff] }
 0x6d5   :  { %5483 = vmatpush1.bf16.msra.mxu0 %v5482_v26  ;;  %5515 = vmatpush1.bf16.msra.mxu1 %v5514_v1  ;;  %v5544_v26 = vpack.c.bf16 %v2452_v34, %v2448_v47  ;;  %v2453_v1 = vld [vmem:[#allocation9 + $0x70] sm:$0xff] }
 0x6d6   :  { %5485 = vmatprep.subr.bf16.mxu0 %v7276_v41  ;;  %5517 = vmatprep.subr.bf16.mxu1 %v7278_v56  ;;  %v2440_v41 = vld [vmem:[#allocation9 + $0x8] sm:$0xff] }
 0x6d7   :  { %v2444_v56 = vld [vmem:[#allocation9 + $0x28] sm:$0xff] }
 0x6d9   :  { %5487 = vmatpush1.bf16.msra.mxu0 %v7280_v45  ;;  %5519 = vmatpush1.bf16.msra.mxu1 %v7283_v52  ;;  %v2442_v45 = vld [vmem:[#allocation9 + $0x18] sm:$0xff] }
 0x6da   :  { %5489 = vmatprep.subr.bf16.mxu0 %v7288_v7  ;;  %5521 = vmatprep.subr.bf16.mxu1 %v7290_v6  ;;  %v2446_v52 = vld [vmem:[#allocation9 + $0x38] sm:$0xff]  ;;  %v5540_v7 = vpack.c.bf16 %v2444_v56, %v2440_v41  ;;  %v2456_v41 = vld [vmem:[#allocation9 + $0x88] sm:$0xff] }
 0x6db   :  { %v5572_v6 = vpack.c.bf16 %v2446_v52, %v2442_v45  ;;  %v2460_v56 = vld [vmem:[#allocation9 + $0xa8] sm:$0xff]  ;;  %v2458_v45 = vld [vmem:[#allocation9 + $0x98] sm:$0xff] }
 0x6dc   :  { %v2462_v52 = vld [vmem:[#allocation9 + $0xb8] sm:$0xff] }
 0x6dd   :  { %5491 = vmatpush1.bf16.msra.mxu0 %v7292_v10  ;;  %5523 = vmatpush1.bf16.msra.mxu1 %v7295_v19 }
 0x6de   :  { %5493 = vmatprep.subr.bf16.mxu0 %v7300_v32  ;;  %5525 = vmatprep.subr.bf16.mxu1 %v7302_v48 }
 0x6e1   :  { %5495 = vmatpush1.bf16.msra.mxu0 %v7304_v54  ;;  %5527 = vmatpush1.bf16.msra.mxu1 %v7307_v4 }
 0x6e2   :  { %5497 = vmatprep.subr.bf16.mxu0 %v7311_v22  ;;  %5529 = vmatprep.subr.bf16.mxu1 %v7314_v28 }
 0x6e5   :  { %5499 = vmatpush1.bf16.msra.mxu0 %v7316_v42  ;;  %5531 = vmatpush1.bf16.msra.mxu1 %v7319_v46 }
 0x6e6   :  { %5501 = vmatprep.subr.bf16.mxu0 %v7322_v5  ;;  %5533 = vmatprep.subr.bf16.mxu1 %v7324_v12 }
 0x6e9   :  { %5503 = vmatpush1.bf16.msra.mxu0 %v7327_v16  ;;  %5535 = vmatpush1.bf16.msra.mxu1 %v7331_v36 }
 0x6ea   :  { %5505 = vmatprep.subr.bf16.mxu0 %v7333_v40  ;;  %5537 = vmatprep.subr.bf16.mxu1 %v7336_v9 }
 0x6ed   :  { %5507 = vmatpush1.bf16.msra.mxu0 %v7339_v20  ;;  %5539 = vmatpush1.bf16.msra.mxu1 %v7343_v21 }
 0x6ee   :  { %5541 = vmatprep.subr.bf16.mxu0 %v5540_v7  ;;  %5573 = vmatprep.subr.bf16.mxu1 %v5572_v6  ;;  %v5546_v7 = vpack.c.bf16 %v2451_v23, %v2447_v25  ;;  %v5578_v6 = vpack.c.bf16 %v2453_v1, %v2449_v63  ;;  %v5558_v25 = vpack.c.bf16 %v2475_v27, %v2471_v18  ;;  %v2795_v27 = vld [vmem:[#allocation10 + $0x210] sm:$0xff] }
 0x6ef   :  { %v5590_v23 = vpack.c.bf16 %v2477_v53, %v2473_v60  ;;  %v2806_v60 = vld [vmem:[#allocation10 + $0x268] sm:$0xff]  ;;  %v2804_v53 = vld [vmem:[#allocation10 + $0x258] sm:$0xff] }
 0x7a2   :  { %v2080_v10 = vpop.f32.mrb[12].mxu0  ;;  %v2151_v19 = vpop.f32.mrb[12].mxu1 }
 0x7a3   :  { %v6152_v32 = vadd.f32 %v2080_v10, %v7133_v37  ;;  %v2082_v48 = vpop.f32.mrb[13].mxu0  ;;  %v2153_v54 = vpop.f32.mrb[13].mxu1  ;;  %v6168_v5 = vadd.f32 %v2151_v19, %v7150_v61  ;;  %v2455_v10 = vld [vmem:[#allocation9 + $0x80] sm:$0xff] }
 0x7a4   :  { %v6153_v4 = vadd.f32 %v2082_v48, %v7137_v39  ;;  %v6169_v42 = vadd.f32 %v2153_v54, %v7144_v55  ;;  %v2459_v19 = vld [vmem:[#allocation9 + $0xa0] sm:$0xff]  ;;  %v5580_v48 = vpack.c.bf16 %v2462_v52, %v2458_v45  ;;  %v2457_v54 = vld [vmem:[#allocation9 + $0x90] sm:$0xff]  ;;  %v2488_v45 = vld [vmem:[#allocation9 + $0x188] sm:$0xff] }
 0x7a5   :  { %v4879_v22 = vmul.f32 -1.442695, %v6152_v32  ;;  %v5548_v32 = vpack.c.bf16 %v2460_v56, %v2456_v41  ;;  %v2481_v41 = vld [vmem:[#allocation9 + $0x150] sm:$0xff]  ;;  %v2492_v52 = vld [vmem:[#allocation9 + $0x1a8] sm:$0xff] }
 0x7a6   :  { %v4880_v28 = vmul.f32 -1.442695, %v6153_v4  ;;  %v4881_v46 = vmul.f32 -1.442695, %v6169_v42  ;;  %v2461_v4 = vld [vmem:[#allocation9 + $0xb0] sm:$0xff]  ;;  %v2466_v42 = vld [vmem:[#allocation9 + $0xd8] sm:$0xff] }
 0x7a7   :  { %6383 = vpow2.f32 %v4879_v22  ;;  %v2464_v22 = vld [vmem:[#allocation9 + $0xc8] sm:$0xff]  ;;  %v2485_v56 = vld [vmem:[#allocation9 + $0x170] sm:$0xff] }
 0x7a8   :  { %6385 = vpow2.f32 %v4880_v28  ;;  %v2468_v28 = vld [vmem:[#allocation9 + $0xe8] sm:$0xff] }
 0x7a9   :  { %6387 = vpow2.f32 %v4881_v46  ;;  %v2470_v46 = vld [vmem:[#allocation9 + $0xf8] sm:$0xff] }
 0x7aa   :  { %6389 = vtanh.f32 %v6168_v5  ;;  %v5550_v5 = vpack.c.bf16 %v2459_v19, %v2455_v10  ;;  %v5594_v19 = vpack.c.bf16 %v2485_v56, %v2481_v41  ;;  %v2814_v41 = vld [vmem:[#allocation10 + $0x2a8] sm:$0xff]  ;;  %v2812_v56 = vld [vmem:[#allocation10 + $0x298] sm:$0xff] }
 0x7b1   :  { %v6384_v12 = vpop.eup %6383 }
 0x7b2   :  { %v6386_v16 = vpop.eup %6385  ;;  %v2163_v36 = vadd.f32 1.0, %v6384_v12  ;;  %v5582_v12 = vpack.c.bf16 %v2461_v4, %v2457_v54  ;;  %v5564_v54 = vpack.c.bf16 %v2492_v52, %v2488_v45  ;;  %v2816_v52 = vld [vmem:[#allocation10 + $0x2b8] sm:$0xff] }
 0x7b3   :  { %v2169_v40 = vadd.f32 1.0, %v6386_v16  ;;  %v6388_v9 = vpop.eup %6387  ;;  %v2463_v16 = vld [vmem:[#allocation9 + $0xc0] sm:$0xff] }
 0x7b4   :  { %6391 = vrcp.f32 %v2163_v36  ;;  %v6390_v20 = vpop.eup %6389  ;;  %v2176_v11 = vadd.f32 1.0, %v6388_v9  ;;  %v2467_v36 = vld [vmem:[#allocation9 + $0xe0] sm:$0xff]  ;;  %v5584_v9 = vpack.c.bf16 %v2470_v46, %v2466_v42  ;;  %v2496_v42 = vld [vmem:[#allocation9 + $0x1c8] sm:$0xff] }
 0x7b5   :  { %6393 = vrcp.f32 %v2169_v40  ;;  %v5552_v40 = vpack.c.bf16 %v2468_v28, %v2464_v22  ;;  %v5554_v62 = vpack.c.bf16 %v2467_v36, %v2463_v16  ;;  %v2489_v22 = vld [vmem:[#allocation9 + $0x190] sm:$0xff]  ;;  %v2500_v46 = vld [vmem:[#allocation9 + $0x1e8] sm:$0xff] }
 0x7b6   :  { %6395 = vrcp.f32 %v2176_v11  ;;  %v2474_v11 = vld [vmem:[#allocation9 + $0x118] sm:$0xff]  ;;  %v2493_v28 = vld [vmem:[#allocation9 + $0x1b0] sm:$0xff] }
 0x7b7   :  { %v5598_v36 = vpack.c.bf16 %v2493_v28, %v2489_v22  ;;  %v2822_v22 = vld [vmem:[#allocation10 + $0x2e8] sm:$0xff]  ;;  %v2820_v28 = vld [vmem:[#allocation10 + $0x2d8] sm:$0xff] }
 0x7be   :  { %v6392_v21 = vpop.eup %6391 }
 0x7bf   :  { %v6394_v8 = vpop.eup %6393  ;;  %v2180_v29 = vmul.f32 %v6392_v21, %v6390_v20  ;;  %v2465_v20 = vld [vmem:[#allocation9 + $0xd0] sm:$0xff] }
 0x7c0   :  { %v2179_v17 = vmul.f32 %v6394_v8, %v7445_v13  ;;  %v6396_v51 = vpop.eup %6395  ;;  %v2469_v21 = vld [vmem:[#allocation9 + $0xf0] sm:$0xff]  ;;  %v2472_v8 = vld [vmem:[#allocation9 + $0x108] sm:$0xff] }
 0x7c1   :  { %v5586_v14 = vpack.c.bf16 %v2469_v21, %v2465_v20  ;;  %v2499_v21 = vld [vmem:[#allocation9 + $0x1e0] sm:$0xff] }
 0x7c2   :  { %v7483_v59 = vadd.f32 %v2180_v29, %v2179_v17  ;;  %v2476_v29 = vld [vmem:[#allocation9 + $0x128] sm:$0xff]  ;;  %v2478_v17 = vld [vmem:[#allocation9 + $0x138] sm:$0xff] }
 0x7c3   :  { %v5556_v47 = vpack.c.bf16 %v2476_v29, %v2472_v8  ;;  %v5588_v34 = vpack.c.bf16 %v2478_v17, %v2474_v11  ;;  %v2497_v8 = vld [vmem:[#allocation9 + $0x1d0] sm:$0xff] }
 0x7c4   :  { %6397 = vtanh.f32 %v7483_v59  ;;  %v2501_v29 = vld [vmem:[#allocation9 + $0x1f0] sm:$0xff] }
 0x7c5   :  { %v5602_v17 = vpack.c.bf16 %v2501_v29, %v2497_v8  ;;  %v2830_v8 = vld [vmem:[#allocation10 + $0x328] sm:$0xff]  ;;  %v2828_v29 = vld [vmem:[#allocation10 + $0x318] sm:$0xff] }
 0x7ce   :  { %v6398_v2 = vpop.eup %6397 }
 0x7cf   :  { %v7486_v13 = vmul.f32 %v6398_v2, %v6396_v51  ;;  %v2480_v51 = vld [vmem:[#allocation9 + $0x148] sm:$0xff] }
 0x7d0   :  { %v2484_v2 = vld [vmem:[#allocation9 + $0x168] sm:$0xff] }
 0x7d1   :  { %2322 = vmatmul.mubr.f32.vlgmr.msra.gmra.mrb[14].mxu0 %v7486_v13  ;;  %2393 = vmatmul.mubr.f32.vlgmr.msra.gmra.mrb[14].mxu1 %v7486_v13  ;;  %v5560_v63 = vpack.c.bf16 %v2484_v2, %v2480_v51  ;;  %v2808_v2 = vld [vmem:[#allocation10 + $0x278] sm:$0xff] }
 0x7d2   :  { %5543 = vmatpush1.bf16.msra.mxu0 %v5542_v50  ;;  %5575 = vmatpush1.bf16.msra.mxu1 %v5574_v15  ;;  %v2482_v50 = vld [vmem:[#allocation9 + $0x158] sm:$0xff] }
 0x7d3   :  { %5545 = vmatprep.subr.bf16.mxu0 %v5544_v26  ;;  %5577 = vmatprep.subr.bf16.mxu1 %v5576_v44  ;;  %v2486_v15 = vld [vmem:[#allocation9 + $0x178] sm:$0xff]  ;;  %v2479_v26 = vld [vmem:[#allocation9 + $0x140] sm:$0xff] }
 0x7d4   :  { %2590 = vmatprep.mubr.f32.mxu0 %v6792_v0  ;;  %2703 = vmatprep.mubr.f32.mxu1 %v6792_v0  ;;  %v2483_v44 = vld [vmem:[#allocation9 + $0x160] sm:$0xff]  ;;  %v5592_v1 = vpack.c.bf16 %v2486_v15, %v2482_v50 }
 0x7d5   :  { %v5562_v10 = vpack.c.bf16 %v2483_v44, %v2479_v26  ;;  %v2801_v50 = vld [vmem:[#allocation10 + $0x240] sm:$0xff]  ;;  %v2803_v26 = vld [vmem:[#allocation10 + $0x250] sm:$0xff] }
 0x7d6   :  { %5547 = vmatpush1.bf16.msra.mxu0 %v5546_v7  ;;  %5579 = vmatpush1.bf16.msra.mxu1 %v5578_v6  ;;  %v2490_v7 = vld [vmem:[#allocation9 + $0x198] sm:$0xff]  ;;  %v2805_v15 = vld [vmem:[#allocation10 + $0x260] sm:$0xff]  ;;  %v2807_v44 = vld [vmem:[#allocation10 + $0x270] sm:$0xff] }
 0x7d7   :  { %5549 = vmatprep.subr.bf16.mxu0 %v5548_v32  ;;  %5581 = vmatprep.subr.bf16.mxu1 %v5580_v48  ;;  %v2494_v6 = vld [vmem:[#allocation9 + $0x1b8] sm:$0xff]  ;;  %v2487_v32 = vld [vmem:[#allocation9 + $0x180] sm:$0xff] }
 0x7d8   :  { %v2491_v48 = vld [vmem:[#allocation9 + $0x1a0] sm:$0xff]  ;;  %v5596_v4 = vpack.c.bf16 %v2494_v6, %v2490_v7 }
 0x7d9   :  { %v5566_v16 = vpack.c.bf16 %v2491_v48, %v2487_v32  ;;  %v2809_v7 = vld [vmem:[#allocation10 + $0x280] sm:$0xff]  ;;  %v2811_v32 = vld [vmem:[#allocation10 + $0x290] sm:$0xff] }
 0x7da   :  { %5551 = vmatpush1.bf16.msra.mxu0 %v5550_v5  ;;  %5583 = vmatpush1.bf16.msra.mxu1 %v5582_v12  ;;  %v2498_v5 = vld [vmem:[#allocation9 + $0x1d8] sm:$0xff]  ;;  %v2813_v6 = vld [vmem:[#allocation10 + $0x2a0] sm:$0xff]  ;;  %v2815_v48 = vld [vmem:[#allocation10 + $0x2b0] sm:$0xff] }
 0x7db   :  { %5553 = vmatprep.subr.bf16.mxu0 %v5552_v40  ;;  %5585 = vmatprep.subr.bf16.mxu1 %v5584_v9  ;;  %v2502_v12 = vld [vmem:[#allocation9 + $0x1f8] sm:$0xff]  ;;  %v2495_v40 = vld [vmem:[#allocation9 + $0x1c0] sm:$0xff]  ;;  %v5568_v9 = vpack.c.bf16 %v2500_v46, %v2496_v42 }
 0x7dc   :  { %v5600_v20 = vpack.c.bf16 %v2502_v12, %v2498_v5  ;;  %v5570_v11 = vpack.c.bf16 %v2499_v21, %v2495_v40  ;;  %v2824_v46 = vld [vmem:[#allocation10 + $0x2f8] sm:$0xff]  ;;  %v2817_v5 = vld [vmem:[#allocation10 + $0x2c0] sm:$0xff]  ;;  %v2819_v40 = vld [vmem:[#allocation10 + $0x2d0] sm:$0xff] }
 0x7dd   :  { %v2821_v12 = vld [vmem:[#allocation10 + $0x2e0] sm:$0xff] }
 0x7de   :  { %5555 = vmatpush1.bf16.msra.mxu0 %v5554_v62  ;;  %5587 = vmatpush1.bf16.msra.mxu1 %v5586_v14  ;;  %v2793_v62 = vld [vmem:[#allocation10 + $0x200] sm:$0xff] }
 0x7df   :  { %5557 = vmatprep.subr.bf16.mxu0 %v5556_v47  ;;  %5589 = vmatprep.subr.bf16.mxu1 %v5588_v34  ;;  %v2799_v47 = vld [vmem:[#allocation10 + $0x230] sm:$0xff]  ;;  %v2802_v34 = vld [vmem:[#allocation10 + $0x248] sm:$0xff] }
 0x7e0   :  { %v7532_v51 = vpack.c.bf16 %v2806_v60, %v2802_v34 }
 0x7e2   :  { %5559 = vmatpush1.bf16.msra.mxu0 %v5558_v25  ;;  %5591 = vmatpush1.bf16.msra.mxu1 %v5590_v23  ;;  %v7534_v25 = vpack.c.bf16 %v2808_v2, %v2804_v53  ;;  %v7536_v23 = vpack.c.bf16 %v2805_v15, %v2801_v50  ;;  %v2836_v53 = vld [vmem:[#allocation10 + $0x358] sm:$0xff]  ;;  %v2833_v50 = vld [vmem:[#allocation10 + $0x340] sm:$0xff] }
 0x7e3   :  { %5561 = vmatprep.subr.bf16.mxu0 %v5560_v63  ;;  %5593 = vmatprep.subr.bf16.mxu1 %v5592_v1  ;;  %v7539_v63 = vpack.c.bf16 %v2807_v44, %v2803_v26  ;;  %v2810_v1 = vld [vmem:[#allocation10 + $0x288] sm:$0xff]  ;;  %v2840_v2 = vld [vmem:[#allocation10 + $0x378] sm:$0xff]  ;;  %v2837_v26 = vld [vmem:[#allocation10 + $0x360] sm:$0xff] }
 0x7e4   :  { %v7544_v45 = vpack.c.bf16 %v2814_v41, %v2810_v1  ;;  %v7580_v15 = vpack.c.bf16 %v2840_v2, %v2836_v53  ;;  %v2835_v44 = vld [vmem:[#allocation10 + $0x350] sm:$0xff]  ;;  %v7583_v41 = vpack.c.bf16 %v2837_v26, %v2833_v50 }
 0x7e5   :  { %v2839_v1 = vld [vmem:[#allocation10 + $0x370] sm:$0xff] }
 0x7e6   :  { %5563 = vmatpush1.bf16.msra.mxu0 %v5562_v10  ;;  %5595 = vmatpush1.bf16.msra.mxu1 %v5594_v19  ;;  %v7546_v10 = vpack.c.bf16 %v2816_v52, %v2812_v56  ;;  %v7548_v19 = vpack.c.bf16 %v2813_v6, %v2809_v7  ;;  %v2842_v56 = vld [vmem:[#allocation10 + $0x388] sm:$0xff]  ;;  %v2844_v7 = vld [vmem:[#allocation10 + $0x398] sm:$0xff]  ;;  %v7587_v6 = vpack.c.bf16 %v2839_v1, %v2835_v44 }
 0x7e7   :  { %5565 = vmatprep.subr.bf16.mxu0 %v5564_v54  ;;  %5597 = vmatprep.subr.bf16.mxu1 %v5596_v4  ;;  %v7551_v54 = vpack.c.bf16 %v2815_v48, %v2811_v32  ;;  %v2818_v4 = vld [vmem:[#allocation10 + $0x2c8] sm:$0xff]  ;;  %v2848_v48 = vld [vmem:[#allocation10 + $0x3b8] sm:$0xff] }
 0x7e8   :  { %v7556_v42 = vpack.c.bf16 %v2822_v22, %v2818_v4  ;;  %v2846_v52 = vld [vmem:[#allocation10 + $0x3a8] sm:$0xff]  ;;  %v2841_v4 = vld [vmem:[#allocation10 + $0x380] sm:$0xff] }
 0x7e9   :  { %v7589_v32 = vpack.c.bf16 %v2846_v52, %v2842_v56  ;;  %v2845_v22 = vld [vmem:[#allocation10 + $0x3a0] sm:$0xff] }
 0x7ea   :  { %5567 = vmatpush1.bf16.msra.mxu0 %v5566_v16  ;;  %5599 = vmatpush1.bf16.msra.mxu1 %v5598_v36  ;;  %v7558_v16 = vpack.c.bf16 %v2824_v46, %v2820_v28  ;;  %v7560_v36 = vpack.c.bf16 %v2821_v12, %v2817_v5  ;;  %v7592_v28 = vpack.c.bf16 %v2848_v48, %v2844_v7  ;;  %v2843_v46 = vld [vmem:[#allocation10 + $0x390] sm:$0xff] }
 0x7eb   :  { %5569 = vmatprep.subr.bf16.mxu0 %v5568_v9  ;;  %5601 = vmatprep.subr.bf16.mxu1 %v5600_v20  ;;  %v2823_v9 = vld [vmem:[#allocation10 + $0x2f0] sm:$0xff]  ;;  %v2826_v20 = vld [vmem:[#allocation10 + $0x308] sm:$0xff]  ;;  %v7595_v12 = vpack.c.bf16 %v2845_v22, %v2841_v4 }
 0x7ec   :  { %v7563_v21 = vpack.c.bf16 %v2823_v9, %v2819_v40  ;;  %v2847_v5 = vld [vmem:[#allocation10 + $0x3b0] sm:$0xff]  ;;  %v2850_v9 = vld [vmem:[#allocation10 + $0x3c8] sm:$0xff] }
 0x7ed   :  { %v7599_v40 = vpack.c.bf16 %v2847_v5, %v2843_v46 }
 0x7ee   :  { %5571 = vmatpush1.bf16.msra.mxu0 %v5570_v11  ;;  %5603 = vmatpush1.bf16.msra.mxu1 %v5602_v17  ;;  %v2832_v11 = vld [vmem:[#allocation10 + $0x338] sm:$0xff]  ;;  %v7567_v17 = vpack.c.bf16 %v2830_v8, %v2826_v20  ;;  %v2854_v20 = vld [vmem:[#allocation10 + $0x3e8] sm:$0xff] }
 0x7ef   :  { %v2852_v8 = vld [vmem:[#allocation10 + $0x3d8] sm:$0xff] }
 0x7f1   :  { %2591 = vmatmul.mubr.f32.vlgmr.msra.gmra.mrb[16].mxu0 %v7156_v43  ;;  %2704 = vmatmul.mubr.f32.vlgmr.msra.gmra.mrb[16].mxu1 %v7156_v43  ;;  %v2794_v43 = vld [vmem:[#allocation10 + $0x208] sm:$0xff] }
 0x7f2   :  { %2596 = vmatprep.mubr.f32.mxu0 %v6792_v0  ;;  %2709 = vmatprep.mubr.f32.mxu1 %v6792_v0 }
 0x7f5   :  { %2597 = vmatmul.mubr.f32.gmra.mrb[18].mxu0 %v7200_v30  ;;  %2710 = vmatmul.mubr.f32.gmra.mrb[18].mxu1 %v7200_v30  ;;  %v2798_v30 = vld [vmem:[#allocation10 + $0x228] sm:$0xff] }
 0x7f6   :  { %2602 = vmatprep.mubr.f32.mxu0 %v6792_v0  ;;  %2715 = vmatprep.mubr.f32.mxu1 %v6792_v0 }
 0x7f9   :  { %2603 = vmatmul.mubr.f32.gmra.mrb[20].mxu0 %v7264_v24  ;;  %2716 = vmatmul.mubr.f32.gmra.mrb[20].mxu1 %v7264_v24  ;;  %v2796_v24 = vld [vmem:[#allocation10 + $0x218] sm:$0xff] }
 0x7fa   :  { %2608 = vmatprep.mubr.f32.mxu0 %v6792_v0  ;;  %2721 = vmatprep.mubr.f32.mxu1 %v6792_v0 }
 0x7fd   :  { %2609 = vmatmul.mubr.f32.gmra.mrb[22].mxu0 %v7358_v3  ;;  %2722 = vmatmul.mubr.f32.gmra.mrb[22].mxu1 %v7358_v3  ;;  %v7520_v3 = vpack.c.bf16 %v2798_v30, %v2794_v43  ;;  %v7569_v43 = vpack.c.bf16 %v2832_v11, %v2828_v29  ;;  %v2825_v30 = vld [vmem:[#allocation10 + $0x300] sm:$0xff]  ;;  %v7604_v29 = vpack.c.bf16 %v2854_v20, %v2850_v9  ;;  %v2856_v11 = vld [vmem:[#allocation10 + $0x3f8] sm:$0xff] }
 0x7fe   :  { %2614 = vmatprep.mubr.f32.mxu0 %v6792_v0  ;;  %2727 = vmatprep.mubr.f32.mxu1 %v6792_v0 }
 0x7ff   :  { %5605 = vmatprep.subr.bf16.mxu0 %v7520_v3 }
 0x801   :  { %2615 = vmatmul.mubr.f32.gmra.mrb[24].mxu0 %v7404_v58  ;;  %2728 = vmatmul.mubr.f32.gmra.mrb[24].mxu1 %v7404_v58  ;;  %v2800_v58 = vld [vmem:[#allocation10 + $0x238] sm:$0xff] }
 0x802   :  { %2620 = vmatprep.mubr.f32.mxu0 %v6792_v0  ;;  %2733 = vmatprep.mubr.f32.mxu1 %v6792_v0  ;;  %v7522_v14 = vpack.c.bf16 %v2800_v58, %v2796_v24  ;;  %v2829_v24 = vld [vmem:[#allocation10 + $0x320] sm:$0xff]  ;;  %v2827_v58 = vld [vmem:[#allocation10 + $0x310] sm:$0xff] }
 0x804   :  { %5637 = vmatprep.subr.bf16.mxu1 %v7522_v14 }
 0x805   :  { %2621 = vmatmul.mubr.f32.gmra.mrb[26].mxu0 %v7448_v49  ;;  %2734 = vmatmul.mubr.f32.gmra.mrb[26].mxu1 %v7448_v49  ;;  %v2797_v49 = vld [vmem:[#allocation10 + $0x220] sm:$0xff] }
 0x806   :  { %2626 = vmatprep.mubr.f32.mxu0 %v6792_v0  ;;  %2739 = vmatprep.mubr.f32.mxu1 %v6792_v0  ;;  %v7524_v18 = vpack.c.bf16 %v2797_v49, %v2793_v62  ;;  %v7572_v62 = vpack.c.bf16 %v2829_v24, %v2825_v30  ;;  %v2831_v49 = vld [vmem:[#allocation10 + $0x330] sm:$0xff]  ;;  %v2849_v30 = vld [vmem:[#allocation10 + $0x3c0] sm:$0xff] }
 0x807   :  { %v7576_v34 = vpack.c.bf16 %v2831_v49, %v2827_v58  ;;  %v2853_v24 = vld [vmem:[#allocation10 + $0x3e0] sm:$0xff]  ;;  %v7606_v58 = vpack.c.bf16 %v2856_v11, %v2852_v8 }
 0x808   :  { %5607 = vmatpush1.bf16.msra.mxu0 %v7524_v18  ;;  %v7608_v49 = vpack.c.bf16 %v2853_v24, %v2849_v30 }
 0x809   :  { %2627 = vmatmul.mubr.f32.gmra.mrb[28].mxu0 %v7486_v13  ;;  %2740 = vmatmul.mubr.f32.gmra.mrb[28].mxu1 %v7486_v13  ;;  %v7527_v13 = vpack.c.bf16 %v2799_v47, %v2795_v27  ;;  %v2834_v27 = vld [vmem:[#allocation10 + $0x348] sm:$0xff] }
 0x80a   :  { %2632 = vmatprep.mubr.f32.mxu0 %v6792_v0  ;;  %2745 = vmatprep.mubr.f32.mxu1 %v6792_v0  ;;  %v2838_v47 = vld [vmem:[#allocation10 + $0x368] sm:$0xff] }
 0x80b   :  { %5639 = vmatpush1.bf16.msra.mxu1 %v7527_v13  ;;  %5609 = vmatprep.subr.bf16.mxu0 %v7532_v51  ;;  %v7578_v60 = vpack.c.bf16 %v2838_v47, %v2834_v27  ;;  %v2851_v27 = vld [vmem:[#allocation10 + $0x3d0] sm:$0xff] }
 0x80c   :  { %5641 = vmatprep.subr.bf16.mxu1 %v7534_v25  ;;  %5611 = vmatpush1.bf16.msra.mxu0 %v7536_v23  ;;  %v2855_v47 = vld [vmem:[#allocation10 + $0x3f0] sm:$0xff] }
 0x80d   :  { %5613 = vmatprep.subr.bf16.mxu0 %v7544_v45  ;;  %v7611_v53 = vpack.c.bf16 %v2855_v47, %v2851_v27 }
 0x80f   :  { %5643 = vmatpush1.bf16.msra.mxu1 %v7539_v63 }
 0x810   :  { %5645 = vmatprep.subr.bf16.mxu1 %v7546_v10  ;;  %5615 = vmatpush1.bf16.msra.mxu0 %v7548_v19 }
 0x811   :  { %5617 = vmatprep.subr.bf16.mxu0 %v7556_v42 }
 0x813   :  { %5647 = vmatpush1.bf16.msra.mxu1 %v7551_v54 }
 0x814   :  { %5649 = vmatprep.subr.bf16.mxu1 %v7558_v16  ;;  %5619 = vmatpush1.bf16.msra.mxu0 %v7560_v36 }
 0x815   :  { %5621 = vmatprep.subr.bf16.mxu0 %v7567_v17 }
 0x817   :  { %5651 = vmatpush1.bf16.msra.mxu1 %v7563_v21 }
 0x818   :  { %5653 = vmatprep.subr.bf16.mxu1 %v7569_v43  ;;  %5623 = vmatpush1.bf16.msra.mxu0 %v7572_v62 }
 0x819   :  { %5625 = vmatprep.subr.bf16.mxu0 %v7578_v60 }
 0x81b   :  { %5655 = vmatpush1.bf16.msra.mxu1 %v7576_v34 }
 0x81c   :  { %5657 = vmatprep.subr.bf16.mxu1 %v7580_v15  ;;  %5627 = vmatpush1.bf16.msra.mxu0 %v7583_v41 }
 0x81d   :  { %5629 = vmatprep.subr.bf16.mxu0 %v7589_v32 }
 0x81f   :  { %5659 = vmatpush1.bf16.msra.mxu1 %v7587_v6 }
 0x820   :  { %5661 = vmatprep.subr.bf16.mxu1 %v7592_v28  ;;  %5631 = vmatpush1.bf16.msra.mxu0 %v7595_v12 }
 0x821   :  { %5633 = vmatprep.subr.bf16.mxu0 %v7604_v29 }
 0x823   :  { %5663 = vmatpush1.bf16.msra.mxu1 %v7599_v40 }
 0x824   :  { %5665 = vmatprep.subr.bf16.mxu1 %v7606_v58  ;;  %5635 = vmatpush1.bf16.msra.mxu0 %v7608_v49 }
 0x825   :  { %5669 = vmatprep.subr.bf16.mxu0 %v7520_v3 }
 0x827   :  { %5667 = vmatpush1.bf16.msra.mxu1 %v7611_v53 }
 0x828   :  { %5701 = vmatprep.subr.bf16.mxu1 %v7522_v14 }
 0x8a4   :  { %v2323_v2 = vpop.f32.mrb[14].mxu0  ;;  %v2394_v50 = vpop.f32.mrb[14].mxu1 }
 0x8a5   :  { %v6154_v26 = vadd.f32 %v2323_v2, %v7133_v37  ;;  %v2325_v44 = vpop.f32.mrb[15].mxu0  ;;  %v2396_v1 = vpop.f32.mrb[15].mxu1  ;;  %v6170_v22 = vadd.f32 %v2394_v50, %v7150_v61  ;;  %v4885_v50 = vld [vmem:[%s8055_s5 + $0x8] sm:$0xff]  ;;  %s6795_s5 = smov [#allocation17]  }
 0x8a6   :  { %v6155_v56 = vadd.f32 %v2325_v44, %v7137_v39  ;;  %v6171_v48 = vadd.f32 %v2396_v1, %v7144_v55  ;;  %s4820_s24 = sshll.u32 %s6795_s5, 4  ;;  %s4821_s24 = int_to_ptr.vmem [resolvable:$true] %s4820_s24 }
 0x8a7   :  { %v4882_v52 = vmul.f32 -1.442695, %v6154_v26  ;;  %s6701_s14 = scalar_lea.vmem %s4821_s24, 256  ;;  %p6706_p1 = scmp.lt.s32.totalorder %s4821_s24, %s4821_s24 }
 0x8a8   :  { %v4883_v7 = vmul.f32 -1.442695, %v6155_v56  ;;  %v4884_v4 = vmul.f32 -1.442695, %v6171_v48  ;;  %p6702_p0 = scmp.ne.s32.totalorder %s4821_s24, %s6701_s14  ;;  %p6707_p2 = scmp.lt.s32.totalorder %s6701_s14, %s6701_s14 }
 0x8a9   :  { %6399 = vpow2.f32 %v4882_v52 }
 0x8aa   :  { %6401 = vpow2.f32 %v4883_v7  ;;  %p6708_p3 = por %p6707_p2, %p6706_p1 }
 0x8ab   :  { %6403 = vpow2.f32 %v4884_v4 }
 0x8ac   :  { %6405 = vtanh.f32 %v6170_v22  ;;  %p6709_p4 = pnand %p6708_p3, %p6702_p0 }
 0x8b3   :  { %v6400_v46 = vpop.eup %6399 }
 0x8b4   :  { %v6402_v5 = vpop.eup %6401  ;;  %v2406_v9 = vadd.f32 1.0, %v6400_v46 }
 0x8b5   :  { %v2412_v20 = vadd.f32 1.0, %v6402_v5  ;;  %v6404_v37 = vpop.eup %6403 }
 0x8b6   :  { %6407 = vrcp.f32 %v2406_v9  ;;  %v6406_v8 = vpop.eup %6405  ;;  %v2419_v24 = vadd.f32 1.0, %v6404_v37 }
 0x8b7   :  { %6409 = vrcp.f32 %v2412_v20 }
 0x8b8   :  { %6411 = vrcp.f32 %v2419_v24  ;;  %v2787_v24 = vld [vmem:[#allocation13 + $0x8] sm:$0xff] }
 0x8c0   :  { %v6408_v39 = vpop.eup %6407 }
 0x8c1   :  { %v6410_v11 = vpop.eup %6409  ;;  %v2423_v30 = vmul.f32 %v6408_v39, %v6406_v8 }
 0x8c2   :  { %v2422_v27 = vmul.f32 %v6410_v11, %v7483_v59  ;;  %v6412_v61 = vpop.eup %6411  ;;  %v2504_v59 = vld [vmem:[#allocation12 + $0x4] sm:$0xf] }
 0x8c3   :  { %v7664_v26 = vrot.slane %v2504_v59, %v208_v33  ;;  %v7668_v44 = vrot.slane %v2504_v59, %v212_v35  ;;  %v7674_v5 = vrot.slane %v2504_v59, %v220_v38  ;;  %v7679_v35 = vrot.slane %v2504_v59, %v216_v57 }
 0x8c4   :  { %v2424_v55 = vadd.f32 %v2423_v30, %v2422_v27 }
 0x8c6   :  { %6413 = vtanh.f32 %v2424_v55  ;;  %2430 = vst [vmem:[#allocation19] sm:$0xff] %v2424_v55 }
 0x8d0   :  { %v6414_v47 = vpop.eup %6413 }
 0x8d1   :  { %v2426_v2 = vmul.f32 %v6414_v47, %v6412_v61 }
 0x8d3   :  { %2633 = vmatmul.mubr.f32.gmra.mrb[30].mxu0 %v2426_v2  ;;  %2429 = vst [vmem:[#allocation17] sm:$0xff] %v2426_v2  ;;  %2746 = vmatmul.mubr.f32.gmra.mrb[30].mxu1 %v2426_v2 }
 0x8d4   :  { %2921 = vmatprep.mubr.f32.mxu0 %v6792_v0  ;;  %2992 = vmatprep.mubr.f32.mxu1 %v6792_v0 }
 0x8d7   :  { %2922 = vmatmul.mubr.f32.vlgmr.msra.gmra.mrb[16].mxu0 %v4885_v50  ;;  %2993 = vmatmul.mubr.f32.vlgmr.msra.gmra.mrb[16].mxu1 %v4885_v50 }
 0x8d8   :  { %5671 = vmatpush1.bf16.msra.mxu0 %v7524_v18  ;;  %5703 = vmatpush1.bf16.msra.mxu1 %v7527_v13 }
 0x8d9   :  { %5673 = vmatprep.subr.bf16.mxu0 %v7532_v51  ;;  %5705 = vmatprep.subr.bf16.mxu1 %v7534_v25 }
 0x8da   :  { %3160 = vmatprep.mubr.f32.mxu0 %v6792_v0  ;;  %3231 = vmatprep.mubr.f32.mxu1 %v6792_v0 }
 0x8dc   :  { %5675 = vmatpush1.bf16.msra.mxu0 %v7536_v23  ;;  %5707 = vmatpush1.bf16.msra.mxu1 %v7539_v63 }
 0x8dd   :  { %5677 = vmatprep.subr.bf16.mxu0 %v7544_v45  ;;  %5709 = vmatprep.subr.bf16.mxu1 %v7546_v10 }
 0x8e0   :  { %5679 = vmatpush1.bf16.msra.mxu0 %v7548_v19  ;;  %5711 = vmatpush1.bf16.msra.mxu1 %v7551_v54 }
 0x8e1   :  { %5681 = vmatprep.subr.bf16.mxu0 %v7556_v42  ;;  %5713 = vmatprep.subr.bf16.mxu1 %v7558_v16 }
 0x8e4   :  { %5683 = vmatpush1.bf16.msra.mxu0 %v7560_v36  ;;  %5715 = vmatpush1.bf16.msra.mxu1 %v7563_v21 }
 0x8e5   :  { %5685 = vmatprep.subr.bf16.mxu0 %v7567_v17  ;;  %5717 = vmatprep.subr.bf16.mxu1 %v7569_v43 }
 0x8e8   :  { %5687 = vmatpush1.bf16.msra.mxu0 %v7572_v62  ;;  %5719 = vmatpush1.bf16.msra.mxu1 %v7576_v34 }
 0x8e9   :  { %5689 = vmatprep.subr.bf16.mxu0 %v7578_v60  ;;  %5721 = vmatprep.subr.bf16.mxu1 %v7580_v15 }
 0x8ec   :  { %5691 = vmatpush1.bf16.msra.mxu0 %v7583_v41  ;;  %5723 = vmatpush1.bf16.msra.mxu1 %v7587_v6 }
 0x8ed   :  { %5693 = vmatprep.subr.bf16.mxu0 %v7589_v32  ;;  %5725 = vmatprep.subr.bf16.mxu1 %v7592_v28 }
 0x8f0   :  { %5695 = vmatpush1.bf16.msra.mxu0 %v7595_v12  ;;  %5727 = vmatpush1.bf16.msra.mxu1 %v7599_v40 }
 0x8f1   :  { %5697 = vmatprep.subr.bf16.mxu0 %v7604_v29  ;;  %5729 = vmatprep.subr.bf16.mxu1 %v7606_v58 }
 0x8f4   :  { %5699 = vmatpush1.bf16.msra.mxu0 %v7608_v49  ;;  %5731 = vmatpush1.bf16.msra.mxu1 %v7611_v53 }
 0x8f5   :  { %5733 = vmatprep.subr.bf16.mxu0 %v7520_v3  ;;  %5765 = vmatprep.subr.bf16.mxu1 %v7522_v14 }
 0x9aa   :  { %v2923_v1 = vpop.f32.mrb[16].mxu0  ;;  %v2994_v56 = vpop.f32.mrb[16].mxu1 }
 0x9ab   :  { %v6172_v52 = vadd.f32 %v2923_v1, %v7664_v26  ;;  %v2925_v7 = vpop.f32.mrb[17].mxu0  ;;  %v2996_v48 = vpop.f32.mrb[17].mxu1  ;;  %v6188_v20 = vadd.f32 %v2994_v56, %v7679_v35 }
 0x9ac   :  { %v6173_v4 = vadd.f32 %v2925_v7, %v7668_v44  ;;  %v6189_v33 = vadd.f32 %v2996_v48, %v7674_v5 }
 0x9ad   :  { %v4886_v22 = vmul.f32 -1.442695, %v6172_v52 }
 0x9ae   :  { %v4887_v46 = vmul.f32 -1.442695, %v6173_v4  ;;  %v4888_v9 = vmul.f32 -1.442695, %v6189_v33 }
 0x9af   :  { %6415 = vpow2.f32 %v4886_v22 }
 0x9b0   :  { %6417 = vpow2.f32 %v4887_v46 }
 0x9b1   :  { %6419 = vpow2.f32 %v4888_v9 }
 0x9b2   :  { %6421 = vtanh.f32 %v6188_v20 }
 0x9b9   :  { %v6416_v37 = vpop.eup %6415 }
 0x9ba   :  { %v6418_v8 = vpop.eup %6417  ;;  %v3006_v39 = vadd.f32 1.0, %v6416_v37 }
 0x9bb   :  { %v3012_v11 = vadd.f32 1.0, %v6418_v8  ;;  %v6420_v38 = vpop.eup %6419 }
 0x9bc   :  { %6423 = vrcp.f32 %v3006_v39  ;;  %v6422_v30 = vpop.eup %6421  ;;  %v3019_v31 = vadd.f32 1.0, %v6420_v38 }
 0x9bd   :  { %6425 = vrcp.f32 %v3012_v11 }
 0x9be   :  { %6427 = vrcp.f32 %v3019_v31 }
 0x9c6   :  { %v6424_v27 = vpop.eup %6423 }
 0x9c7   :  { %v6426_v55 = vpop.eup %6425  ;;  %v3023_v61 = vmul.f32 %v6424_v27, %v6422_v30 }
 0x9c8   :  { %v3022_v57 = vmul.f32 %v6426_v55, %v2787_v24  ;;  %v6428_v2 = vpop.eup %6427 }
 0x9ca   :  { %v7682_v47 = vadd.f32 %v3023_v61, %v3022_v57 }
 0x9cc   :  { %6429 = vtanh.f32 %v7682_v47 }
 0x9d6   :  { %v6430_v50 = vpop.eup %6429 }
 0x9d7   :  { %v3026_v59 = vmul.f32 %v6430_v50, %v6428_v2  ;;  %v3749_v50 = vld [vmem:[#allocation10 + $0x200] sm:$0xff] }
 0x9d9   :  { %3161 = vmatmul.mubr.f32.vlgmr.msra.gmra.mrb[18].mxu0 %v3026_v59  ;;  %3232 = vmatmul.mubr.f32.vlgmr.msra.gmra.mrb[18].mxu1 %v3026_v59  ;;  %v3753_v59 = vld [vmem:[#allocation10 + $0x220] sm:$0xff] }
 0x9da   :  { %5735 = vmatpush1.bf16.msra.mxu0 %v7524_v18  ;;  %5767 = vmatpush1.bf16.msra.mxu1 %v7527_v13 }
 0x9db   :  { %5737 = vmatprep.subr.bf16.mxu0 %v7532_v51  ;;  %5769 = vmatprep.subr.bf16.mxu1 %v7534_v25 }
 0x9dc   :  { %3399 = vmatprep.mubr.f32.mxu0 %v6792_v0  ;;  %3470 = vmatprep.mubr.f32.mxu1 %v6792_v0 }
 0x9de   :  { %5739 = vmatpush1.bf16.msra.mxu0 %v7536_v23  ;;  %5771 = vmatpush1.bf16.msra.mxu1 %v7539_v63 }
 0x9df   :  { %5741 = vmatprep.subr.bf16.mxu0 %v7544_v45  ;;  %5773 = vmatprep.subr.bf16.mxu1 %v7546_v10 }
 0x9e2   :  { %5743 = vmatpush1.bf16.msra.mxu0 %v7548_v19  ;;  %5775 = vmatpush1.bf16.msra.mxu1 %v7551_v54 }
 0x9e3   :  { %5745 = vmatprep.subr.bf16.mxu0 %v7556_v42  ;;  %5777 = vmatprep.subr.bf16.mxu1 %v7558_v16 }
 0x9e6   :  { %5747 = vmatpush1.bf16.msra.mxu0 %v7560_v36  ;;  %5779 = vmatpush1.bf16.msra.mxu1 %v7563_v21 }
 0x9e7   :  { %5749 = vmatprep.subr.bf16.mxu0 %v7567_v17  ;;  %5781 = vmatprep.subr.bf16.mxu1 %v7569_v43 }
 0x9ea   :  { %5751 = vmatpush1.bf16.msra.mxu0 %v7572_v62  ;;  %5783 = vmatpush1.bf16.msra.mxu1 %v7576_v34 }
 0x9eb   :  { %5753 = vmatprep.subr.bf16.mxu0 %v7578_v60  ;;  %5785 = vmatprep.subr.bf16.mxu1 %v7580_v15 }
 0x9ee   :  { %5755 = vmatpush1.bf16.msra.mxu0 %v7583_v41  ;;  %5787 = vmatpush1.bf16.msra.mxu1 %v7587_v6 }
 0x9ef   :  { %5757 = vmatprep.subr.bf16.mxu0 %v7589_v32  ;;  %5789 = vmatprep.subr.bf16.mxu1 %v7592_v28 }
 0x9f2   :  { %5759 = vmatpush1.bf16.msra.mxu0 %v7595_v12  ;;  %5791 = vmatpush1.bf16.msra.mxu1 %v7599_v40 }
 0x9f3   :  { %5761 = vmatprep.subr.bf16.mxu0 %v7604_v29  ;;  %5793 = vmatprep.subr.bf16.mxu1 %v7606_v58 }
 0x9f6   :  { %5763 = vmatpush1.bf16.msra.mxu0 %v7608_v49  ;;  %5795 = vmatpush1.bf16.msra.mxu1 %v7611_v53 }
 0x9f7   :  { %5797 = vmatprep.subr.bf16.mxu0 %v7520_v3  ;;  %5829 = vmatprep.subr.bf16.mxu1 %v7522_v14 }
 0xaac   :  { %v3162_v1 = vpop.f32.mrb[18].mxu0  ;;  %v3233_v56 = vpop.f32.mrb[18].mxu1 }
 0xaad   :  { %v6174_v52 = vadd.f32 %v3162_v1, %v7664_v26  ;;  %v3164_v7 = vpop.f32.mrb[19].mxu0  ;;  %v3235_v48 = vpop.f32.mrb[19].mxu1  ;;  %v6190_v20 = vadd.f32 %v3233_v56, %v7679_v35  ;;  %v7773_v56 = vpack.c.bf16 %v3753_v59, %v3749_v50  ;;  %v3792_v50 = vld [vmem:[#allocation10 + $0x358] sm:$0xff] }
 0xaae   :  { %v6175_v4 = vadd.f32 %v3164_v7, %v7668_v44  ;;  %v6191_v33 = vadd.f32 %v3235_v48, %v7674_v5  ;;  %v3755_v7 = vld [vmem:[#allocation10 + $0x230] sm:$0xff] }
 0xaaf   :  { %v4889_v22 = vmul.f32 -1.442695, %v6174_v52  ;;  %v3751_v52 = vld [vmem:[#allocation10 + $0x210] sm:$0xff] }
 0xab0   :  { %v4890_v46 = vmul.f32 -1.442695, %v6175_v4  ;;  %v4891_v9 = vmul.f32 -1.442695, %v6191_v33  ;;  %v7776_v48 = vpack.c.bf16 %v3755_v7, %v3751_v52  ;;  %v3758_v4 = vld [vmem:[#allocation10 + $0x248] sm:$0xff]  ;;  %v3796_v52 = vld [vmem:[#allocation10 + $0x378] sm:$0xff] }
 0xab1   :  { %6431 = vpow2.f32 %v4889_v22  ;;  %v3762_v22 = vld [vmem:[#allocation10 + $0x268] sm:$0xff]  ;;  %v3789_v7 = vld [vmem:[#allocation10 + $0x340] sm:$0xff] }
 0xab2   :  { %6433 = vpow2.f32 %v4890_v46  ;;  %v3760_v46 = vld [vmem:[#allocation10 + $0x258] sm:$0xff]  ;;  %v7781_v33 = vpack.c.bf16 %v3762_v22, %v3758_v4  ;;  %v3793_v4 = vld [vmem:[#allocation10 + $0x360] sm:$0xff]  ;;  %v7831_v22 = vpack.c.bf16 %v3796_v52, %v3792_v50 }
 0xab3   :  { %6435 = vpow2.f32 %v4891_v9  ;;  %v3764_v9 = vld [vmem:[#allocation10 + $0x278] sm:$0xff] }
 0xab4   :  { %6437 = vtanh.f32 %v6190_v20  ;;  %v3757_v20 = vld [vmem:[#allocation10 + $0x240] sm:$0xff] }
 0xabb   :  { %v6432_v3 = vpop.eup %6431 }
 0xabc   :  { %v6434_v37 = vpop.eup %6433  ;;  %v3245_v14 = vadd.f32 1.0, %v6432_v3  ;;  %v3761_v3 = vld [vmem:[#allocation10 + $0x260] sm:$0xff] }
 0xabd   :  { %v3251_v8 = vadd.f32 1.0, %v6434_v37  ;;  %v6436_v39 = vpop.eup %6435  ;;  %v7783_v37 = vpack.c.bf16 %v3764_v9, %v3760_v46  ;;  %v7833_v46 = vpack.c.bf16 %v3793_v4, %v3789_v7  ;;  %v3791_v9 = vld [vmem:[#allocation10 + $0x350] sm:$0xff] }
 0xabe   :  { %6439 = vrcp.f32 %v3245_v14  ;;  %v6438_v11 = vpop.eup %6437  ;;  %v3258_v27 = vadd.f32 1.0, %v6436_v39  ;;  %v7785_v14 = vpack.c.bf16 %v3761_v3, %v3757_v20  ;;  %v3763_v39 = vld [vmem:[#allocation10 + $0x270] sm:$0xff]  ;;  %v3798_v3 = vld [vmem:[#allocation10 + $0x388] sm:$0xff] }
 0xabf   :  { %6441 = vrcp.f32 %v3251_v8  ;;  %v3759_v8 = vld [vmem:[#allocation10 + $0x250] sm:$0xff] }
 0xac0   :  { %6443 = vrcp.f32 %v3258_v27  ;;  %v3795_v20 = vld [vmem:[#allocation10 + $0x370] sm:$0xff] }
 0xac8   :  { %v6440_v38 = vpop.eup %6439 }
 0xac9   :  { %v6442_v30 = vpop.eup %6441  ;;  %v3262_v24 = vmul.f32 %v6440_v38, %v6438_v11  ;;  %v7788_v11 = vpack.c.bf16 %v3763_v39, %v3759_v8  ;;  %v3766_v38 = vld [vmem:[#allocation10 + $0x288] sm:$0xff]  ;;  %v7836_v8 = vpack.c.bf16 %v3795_v20, %v3791_v9 }
 0xaca   :  { %v3261_v55 = vmul.f32 %v6442_v30, %v7682_v47  ;;  %v6444_v31 = vpop.eup %6443  ;;  %v3756_v47 = vld [vmem:[#allocation10 + $0x238] sm:$0xff]  ;;  %v3770_v30 = vld [vmem:[#allocation10 + $0x2a8] sm:$0xff] }
 0xacb   :  { %v7793_v27 = vpack.c.bf16 %v3770_v30, %v3766_v38  ;;  %v3802_v39 = vld [vmem:[#allocation10 + $0x3a8] sm:$0xff]  ;;  %v3800_v38 = vld [vmem:[#allocation10 + $0x398] sm:$0xff] }
 0xacc   :  { %v7724_v61 = vadd.f32 %v3262_v24, %v3261_v55  ;;  %v3768_v24 = vld [vmem:[#allocation10 + $0x298] sm:$0xff] }
 0xacd   :  { %v3772_v55 = vld [vmem:[#allocation10 + $0x2b8] sm:$0xff] }
 0xace   :  { %6445 = vtanh.f32 %v7724_v61  ;;  %v3804_v30 = vld [vmem:[#allocation10 + $0x3b8] sm:$0xff] }
 0xad8   :  { %v6446_v57 = vpop.eup %6445 }
 0xad9   :  { %v3265_v2 = vmul.f32 %v6446_v57, %v6444_v31  ;;  %v3769_v31 = vld [vmem:[#allocation10 + $0x2a0] sm:$0xff]  ;;  %v7795_v57 = vpack.c.bf16 %v3772_v55, %v3768_v24  ;;  %v7839_v24 = vpack.c.bf16 %v3802_v39, %v3798_v3  ;;  %v7841_v55 = vpack.c.bf16 %v3804_v30, %v3800_v38 }
 0xadb   :  { %3400 = vmatmul.mubr.f32.vlgmr.msra.gmra.mrb[20].mxu0 %v3265_v2  ;;  %3471 = vmatmul.mubr.f32.vlgmr.msra.gmra.mrb[20].mxu1 %v3265_v2 }
 0xadc   :  { %5799 = vmatpush1.bf16.msra.mxu0 %v7524_v18  ;;  %5831 = vmatpush1.bf16.msra.mxu1 %v7527_v13 }
 0xadd   :  { %5801 = vmatprep.subr.bf16.mxu0 %v7532_v51  ;;  %5833 = vmatprep.subr.bf16.mxu1 %v7534_v25 }
 0xade   :  { %3638 = vmatprep.mubr.f32.mxu0 %v6792_v0  ;;  %3709 = vmatprep.mubr.f32.mxu1 %v6792_v0 }
 0xae0   :  { %5803 = vmatpush1.bf16.msra.mxu0 %v7536_v23  ;;  %5835 = vmatpush1.bf16.msra.mxu1 %v7539_v63 }
 0xae1   :  { %5805 = vmatprep.subr.bf16.mxu0 %v7544_v45  ;;  %5837 = vmatprep.subr.bf16.mxu1 %v7546_v10 }
 0xae4   :  { %5807 = vmatpush1.bf16.msra.mxu0 %v7548_v19  ;;  %5839 = vmatpush1.bf16.msra.mxu1 %v7551_v54 }
 0xae5   :  { %5809 = vmatprep.subr.bf16.mxu0 %v7556_v42  ;;  %5841 = vmatprep.subr.bf16.mxu1 %v7558_v16 }
 0xae8   :  { %5811 = vmatpush1.bf16.msra.mxu0 %v7560_v36  ;;  %5843 = vmatpush1.bf16.msra.mxu1 %v7563_v21 }
 0xae9   :  { %5813 = vmatprep.subr.bf16.mxu0 %v7567_v17  ;;  %5845 = vmatprep.subr.bf16.mxu1 %v7569_v43 }
 0xaec   :  { %5815 = vmatpush1.bf16.msra.mxu0 %v7572_v62  ;;  %5847 = vmatpush1.bf16.msra.mxu1 %v7576_v34 }
 0xaed   :  { %5817 = vmatprep.subr.bf16.mxu0 %v7578_v60  ;;  %5849 = vmatprep.subr.bf16.mxu1 %v7580_v15 }
 0xaf0   :  { %5819 = vmatpush1.bf16.msra.mxu0 %v7583_v41  ;;  %5851 = vmatpush1.bf16.msra.mxu1 %v7587_v6 }
 0xaf1   :  { %5821 = vmatprep.subr.bf16.mxu0 %v7589_v32  ;;  %5853 = vmatprep.subr.bf16.mxu1 %v7592_v28 }
 0xaf4   :  { %5823 = vmatpush1.bf16.msra.mxu0 %v7595_v12  ;;  %5855 = vmatpush1.bf16.msra.mxu1 %v7599_v40 }
 0xaf5   :  { %5825 = vmatprep.subr.bf16.mxu0 %v7604_v29  ;;  %5857 = vmatprep.subr.bf16.mxu1 %v7606_v58  ;;  %v3750_v29 = vld [vmem:[#allocation10 + $0x208] sm:$0xff] }
 0xaf6   :  { %v3754_v58 = vld [vmem:[#allocation10 + $0x228] sm:$0xff] }
 0xaf8   :  { %5827 = vmatpush1.bf16.msra.mxu0 %v7608_v49  ;;  %5859 = vmatpush1.bf16.msra.mxu1 %v7611_v53  ;;  %v3752_v49 = vld [vmem:[#allocation10 + $0x218] sm:$0xff]  ;;  %v7769_v53 = vpack.c.bf16 %v3754_v58, %v3750_v29  ;;  %v3787_v29 = vld [vmem:[#allocation10 + $0x330] sm:$0xff] }
 0xaf9   :  { %v7771_v1 = vpack.c.bf16 %v3756_v47, %v3752_v49  ;;  %v3790_v49 = vld [vmem:[#allocation10 + $0x348] sm:$0xff] }
 0xafa   :  { %5861 = vmatprep.subr.bf16.mxu0 %v7769_v53  ;;  %v3794_v47 = vld [vmem:[#allocation10 + $0x368] sm:$0xff] }
 0xafb   :  { %5893 = vmatprep.subr.bf16.mxu1 %v7771_v1  ;;  %v7828_v59 = vpack.c.bf16 %v3794_v47, %v3790_v49 }
 0xbae   :  { %v3401_v18 = vpop.f32.mrb[20].mxu0  ;;  %v3472_v13 = vpop.f32.mrb[20].mxu1 }
 0xbaf   :  { %v6176_v51 = vadd.f32 %v3401_v18, %v7664_v26  ;;  %v3403_v25 = vpop.f32.mrb[21].mxu0  ;;  %v3474_v23 = vpop.f32.mrb[21].mxu1  ;;  %v6192_v42 = vadd.f32 %v3472_v13, %v7679_v35  ;;  %v3767_v18 = vld [vmem:[#allocation10 + $0x290] sm:$0xff] }
 0xbb0   :  { %v6177_v63 = vadd.f32 %v3403_v25, %v7668_v44  ;;  %v6193_v19 = vadd.f32 %v3474_v23, %v7674_v5  ;;  %v3771_v13 = vld [vmem:[#allocation10 + $0x2b0] sm:$0xff]  ;;  %v3774_v25 = vld [vmem:[#allocation10 + $0x2c8] sm:$0xff] }
 0xbb1   :  { %v4892_v45 = vmul.f32 -1.442695, %v6176_v51  ;;  %v7800_v51 = vpack.c.bf16 %v3771_v13, %v3767_v18  ;;  %v3778_v23 = vld [vmem:[#allocation10 + $0x2e8] sm:$0xff]  ;;  %v3799_v18 = vld [vmem:[#allocation10 + $0x390] sm:$0xff] }
 0xbb2   :  { %v4893_v10 = vmul.f32 -1.442695, %v6177_v63  ;;  %v4894_v54 = vmul.f32 -1.442695, %v6193_v19  ;;  %v3776_v63 = vld [vmem:[#allocation10 + $0x2d8] sm:$0xff]  ;;  %v3773_v19 = vld [vmem:[#allocation10 + $0x2c0] sm:$0xff] }
 0xbb3   :  { %6447 = vpow2.f32 %v4892_v45  ;;  %v7805_v45 = vpack.c.bf16 %v3778_v23, %v3774_v25  ;;  %v3803_v25 = vld [vmem:[#allocation10 + $0x3b0] sm:$0xff]  ;;  %v3806_v23 = vld [vmem:[#allocation10 + $0x3c8] sm:$0xff] }
 0xbb4   :  { %6449 = vpow2.f32 %v4893_v10  ;;  %v3780_v10 = vld [vmem:[#allocation10 + $0x2f8] sm:$0xff] }
 0xbb5   :  { %6451 = vpow2.f32 %v4894_v54  ;;  %v3777_v54 = vld [vmem:[#allocation10 + $0x2e0] sm:$0xff] }
 0xbb6   :  { %6453 = vtanh.f32 %v6192_v42  ;;  %v7807_v42 = vpack.c.bf16 %v3780_v10, %v3776_v63  ;;  %v3810_v63 = vld [vmem:[#allocation10 + $0x3e8] sm:$0xff]  ;;  %v7848_v10 = vpack.c.bf16 %v3803_v25, %v3799_v18 }
 0xbbd   :  { %v6448_v16 = vpop.eup %6447 }
 0xbbe   :  { %v6450_v36 = vpop.eup %6449  ;;  %v3484_v21 = vadd.f32 1.0, %v6448_v16  ;;  %v7809_v16 = vpack.c.bf16 %v3777_v54, %v3773_v19  ;;  %v7850_v19 = vpack.c.bf16 %v3810_v63, %v3806_v23  ;;  %v3808_v54 = vld [vmem:[#allocation10 + $0x3d8] sm:$0xff] }
 0xbbf   :  { %v3490_v17 = vadd.f32 1.0, %v6450_v36  ;;  %v6452_v43 = vpop.eup %6451  ;;  %v3775_v36 = vld [vmem:[#allocation10 + $0x2d0] sm:$0xff] }
 0xbc0   :  { %6455 = vrcp.f32 %v3484_v21  ;;  %v6454_v62 = vpop.eup %6453  ;;  %v3497_v41 = vadd.f32 1.0, %v6452_v43  ;;  %v3779_v21 = vld [vmem:[#allocation10 + $0x2f0] sm:$0xff]  ;;  %v3782_v43 = vld [vmem:[#allocation10 + $0x308] sm:$0xff] }
 0xbc1   :  { %6457 = vrcp.f32 %v3490_v17  ;;  %v7812_v17 = vpack.c.bf16 %v3779_v21, %v3775_v36  ;;  %v3812_v36 = vld [vmem:[#allocation10 + $0x3f8] sm:$0xff]  ;;  %v3805_v21 = vld [vmem:[#allocation10 + $0x3c0] sm:$0xff] }
 0xbc2   :  { %6459 = vrcp.f32 %v3497_v41  ;;  %v3781_v41 = vld [vmem:[#allocation10 + $0x300] sm:$0xff] }
 0xbca   :  { %v6456_v34 = vpop.eup %6455 }
 0xbcb   :  { %v6458_v60 = vpop.eup %6457  ;;  %v3501_v15 = vmul.f32 %v6456_v34, %v6454_v62  ;;  %v3786_v62 = vld [vmem:[#allocation10 + $0x328] sm:$0xff]  ;;  %v3784_v34 = vld [vmem:[#allocation10 + $0x318] sm:$0xff] }
 0xbcc   :  { %v3500_v6 = vmul.f32 %v6458_v60, %v7724_v61  ;;  %v6460_v28 = vpop.eup %6459  ;;  %v3765_v61 = vld [vmem:[#allocation10 + $0x280] sm:$0xff]  ;;  %v7817_v60 = vpack.c.bf16 %v3786_v62, %v3782_v43  ;;  %v7853_v43 = vpack.c.bf16 %v3812_v36, %v3808_v54 }
 0xbcd   :  { %v7797_v2 = vpack.c.bf16 %v3769_v31, %v3765_v61  ;;  %v3797_v61 = vld [vmem:[#allocation10 + $0x380] sm:$0xff] }
 0xbce   :  { %v7764_v32 = vadd.f32 %v3501_v15, %v3500_v6  ;;  %v3788_v15 = vld [vmem:[#allocation10 + $0x338] sm:$0xff]  ;;  %v3785_v6 = vld [vmem:[#allocation10 + $0x320] sm:$0xff] }
 0xbcf   :  { %v3801_v31 = vld [vmem:[#allocation10 + $0x3a0] sm:$0xff] }
 0xbd0   :  { %6461 = vtanh.f32 %v7764_v32  ;;  %v7844_v13 = vpack.c.bf16 %v3801_v31, %v3797_v61  ;;  %v3809_v62 = vld [vmem:[#allocation10 + $0x3e0] sm:$0xff] }
 0xbda   :  { %v6462_v12 = vpop.eup %6461 }
 0xbdb   :  { %v3504_v40 = vmul.f32 %v6462_v12, %v6460_v28  ;;  %v7819_v28 = vpack.c.bf16 %v3788_v15, %v3784_v34  ;;  %v7821_v12 = vpack.c.bf16 %v3785_v6, %v3781_v41  ;;  %v3807_v34 = vld [vmem:[#allocation10 + $0x3d0] sm:$0xff]  ;;  %v7856_v41 = vpack.c.bf16 %v3809_v62, %v3805_v21 }
 0xbdc   :  { %v3811_v15 = vld [vmem:[#allocation10 + $0x3f0] sm:$0xff] }
 0xbdd   :  { %3639 = vmatmul.mubr.f32.vlgmr.msra.gmra.mrb[22].mxu0 %v3504_v40  ;;  %3710 = vmatmul.mubr.f32.vlgmr.msra.gmra.mrb[22].mxu1 %v3504_v40  ;;  %v3783_v40 = vld [vmem:[#allocation10 + $0x310] sm:$0xff]  ;;  %v7860_v6 = vpack.c.bf16 %v3811_v15, %v3807_v34 }
 0xbde   :  { %3877 = vmatprep.mubr.f32.mxu0 %v6792_v0  ;;  %3948 = vmatprep.mubr.f32.mxu1 %v6792_v0  ;;  %v7824_v58 = vpack.c.bf16 %v3787_v29, %v3783_v40 }
 0xbdf   :  { %5863 = vmatpush1.bf16.msra.mxu0 %v7773_v56  ;;  %5895 = vmatpush1.bf16.msra.mxu1 %v7776_v48 }
 0xbe0   :  { %5865 = vmatprep.subr.bf16.mxu0 %v7781_v33  ;;  %5897 = vmatprep.subr.bf16.mxu1 %v7783_v37 }
 0xbe3   :  { %5867 = vmatpush1.bf16.msra.mxu0 %v7785_v14  ;;  %5899 = vmatpush1.bf16.msra.mxu1 %v7788_v11 }
 0xbe4   :  { %5869 = vmatprep.subr.bf16.mxu0 %v7793_v27  ;;  %5901 = vmatprep.subr.bf16.mxu1 %v7795_v57 }
 0xbe7   :  { %5871 = vmatpush1.bf16.msra.mxu0 %v7797_v2  ;;  %5903 = vmatpush1.bf16.msra.mxu1 %v7800_v51 }
 0xbe8   :  { %5873 = vmatprep.subr.bf16.mxu0 %v7805_v45  ;;  %5905 = vmatprep.subr.bf16.mxu1 %v7807_v42 }
 0xbeb   :  { %5875 = vmatpush1.bf16.msra.mxu0 %v7809_v16  ;;  %5907 = vmatpush1.bf16.msra.mxu1 %v7812_v17 }
 0xbec   :  { %5877 = vmatprep.subr.bf16.mxu0 %v7817_v60  ;;  %5909 = vmatprep.subr.bf16.mxu1 %v7819_v28 }
 0xbef   :  { %5879 = vmatpush1.bf16.msra.mxu0 %v7821_v12  ;;  %5911 = vmatpush1.bf16.msra.mxu1 %v7824_v58 }
 0xbf0   :  { %5881 = vmatprep.subr.bf16.mxu0 %v7828_v59  ;;  %5913 = vmatprep.subr.bf16.mxu1 %v7831_v22 }
 0xbf3   :  { %5883 = vmatpush1.bf16.msra.mxu0 %v7833_v46  ;;  %5915 = vmatpush1.bf16.msra.mxu1 %v7836_v8 }
 0xbf4   :  { %5885 = vmatprep.subr.bf16.mxu0 %v7839_v24  ;;  %5917 = vmatprep.subr.bf16.mxu1 %v7841_v55 }
 0xbf7   :  { %5887 = vmatpush1.bf16.msra.mxu0 %v7844_v13  ;;  %5919 = vmatpush1.bf16.msra.mxu1 %v7848_v10 }
 0xbf8   :  { %5889 = vmatprep.subr.bf16.mxu0 %v7850_v19  ;;  %5921 = vmatprep.subr.bf16.mxu1 %v7853_v43 }
 0xbfb   :  { %5891 = vmatpush1.bf16.msra.mxu0 %v7856_v41  ;;  %5923 = vmatpush1.bf16.msra.mxu1 %v7860_v6 }
 0xbfc   :  { %5925 = vmatprep.subr.bf16.mxu0 %v7769_v53  ;;  %5957 = vmatprep.subr.bf16.mxu1 %v7771_v1 }
 0xcb0   :  { %v3640_v40 = vpop.f32.mrb[22].mxu0  ;;  %v3711_v29 = vpop.f32.mrb[22].mxu1 }
 0xcb1   :  { %v6178_v49 = vadd.f32 %v3640_v40, %v7664_v26  ;;  %v3642_v47 = vpop.f32.mrb[23].mxu0  ;;  %v3713_v50 = vpop.f32.mrb[23].mxu1  ;;  %v6194_v3 = vadd.f32 %v3711_v29, %v7679_v35 }
 0xcb2   :  { %v6179_v52 = vadd.f32 %v3642_v47, %v7668_v44  ;;  %v6195_v9 = vadd.f32 %v3713_v50, %v7674_v5 }
 0xcb3   :  { %v4895_v7 = vmul.f32 -1.442695, %v6178_v49 }
 0xcb4   :  { %v4896_v4 = vmul.f32 -1.442695, %v6179_v52  ;;  %v4897_v20 = vmul.f32 -1.442695, %v6195_v9 }
 0xcb5   :  { %6463 = vpow2.f32 %v4895_v7 }
 0xcb6   :  { %6465 = vpow2.f32 %v4896_v4 }
 0xcb7   :  { %6467 = vpow2.f32 %v4897_v20 }
 0xcb8   :  { %6469 = vtanh.f32 %v6194_v3 }
 0xcbf   :  { %v6464_v39 = vpop.eup %6463 }
 0xcc0   :  { %v6466_v38 = vpop.eup %6465  ;;  %v3723_v30 = vadd.f32 1.0, %v6464_v39 }
 0xcc1   :  { %v3729_v61 = vadd.f32 1.0, %v6466_v38  ;;  %v6468_v31 = vpop.eup %6467 }
 0xcc2   :  { %6471 = vrcp.f32 %v3723_v30  ;;  %v6470_v18 = vpop.eup %6469  ;;  %v3736_v54 = vadd.f32 1.0, %v6468_v31 }
 0xcc3   :  { %6473 = vrcp.f32 %v3729_v61 }
 0xcc4   :  { %6475 = vrcp.f32 %v3736_v54 }
 0xccc   :  { %v6472_v25 = vpop.eup %6471 }
 0xccd   :  { %v6474_v23 = vpop.eup %6473  ;;  %v3740_v63 = vmul.f32 %v6472_v25, %v6470_v18 }
 0xcce   :  { %v3739_v36 = vmul.f32 %v6474_v23, %v7764_v32  ;;  %v6476_v62 = vpop.eup %6475 }
 0xcd0   :  { %v7872_v21 = vadd.f32 %v3740_v63, %v3739_v36 }
 0xcd2   :  { %6477 = vtanh.f32 %v7872_v21 }
 0xcdc   :  { %v6478_v34 = vpop.eup %6477 }
 0xcdd   :  { %v3743_v15 = vmul.f32 %v6478_v34, %v6476_v62 }
 0xcdf   :  { %3878 = vmatmul.mubr.f32.vlgmr.msra.gmra.mrb[24].mxu0 %v3743_v15  ;;  %3949 = vmatmul.mubr.f32.vlgmr.msra.gmra.mrb[24].mxu1 %v3743_v15 }
 0xce0   :  { %5927 = vmatpush1.bf16.msra.mxu0 %v7773_v56  ;;  %5959 = vmatpush1.bf16.msra.mxu1 %v7776_v48 }
 0xce1   :  { %5929 = vmatprep.subr.bf16.mxu0 %v7781_v33  ;;  %5961 = vmatprep.subr.bf16.mxu1 %v7783_v37 }
 0xce2   :  { %4116 = vmatprep.mubr.f32.mxu0 %v6792_v0  ;;  %4187 = vmatprep.mubr.f32.mxu1 %v6792_v0 }
 0xce4   :  { %5931 = vmatpush1.bf16.msra.mxu0 %v7785_v14  ;;  %5963 = vmatpush1.bf16.msra.mxu1 %v7788_v11 }
 0xce5   :  { %5933 = vmatprep.subr.bf16.mxu0 %v7793_v27  ;;  %5965 = vmatprep.subr.bf16.mxu1 %v7795_v57 }
 0xce8   :  { %5935 = vmatpush1.bf16.msra.mxu0 %v7797_v2  ;;  %5967 = vmatpush1.bf16.msra.mxu1 %v7800_v51 }
 0xce9   :  { %5937 = vmatprep.subr.bf16.mxu0 %v7805_v45  ;;  %5969 = vmatprep.subr.bf16.mxu1 %v7807_v42 }
 0xcec   :  { %5939 = vmatpush1.bf16.msra.mxu0 %v7809_v16  ;;  %5971 = vmatpush1.bf16.msra.mxu1 %v7812_v17 }
 0xced   :  { %5941 = vmatprep.subr.bf16.mxu0 %v7817_v60  ;;  %5973 = vmatprep.subr.bf16.mxu1 %v7819_v28 }
 0xcf0   :  { %5943 = vmatpush1.bf16.msra.mxu0 %v7821_v12  ;;  %5975 = vmatpush1.bf16.msra.mxu1 %v7824_v58 }
 0xcf1   :  { %5945 = vmatprep.subr.bf16.mxu0 %v7828_v59  ;;  %5977 = vmatprep.subr.bf16.mxu1 %v7831_v22 }
 0xcf4   :  { %5947 = vmatpush1.bf16.msra.mxu0 %v7833_v46  ;;  %5979 = vmatpush1.bf16.msra.mxu1 %v7836_v8 }
 0xcf5   :  { %5949 = vmatprep.subr.bf16.mxu0 %v7839_v24  ;;  %5981 = vmatprep.subr.bf16.mxu1 %v7841_v55 }
 0xcf8   :  { %5951 = vmatpush1.bf16.msra.mxu0 %v7844_v13  ;;  %5983 = vmatpush1.bf16.msra.mxu1 %v7848_v10 }
 0xcf9   :  { %5953 = vmatprep.subr.bf16.mxu0 %v7850_v19  ;;  %5985 = vmatprep.subr.bf16.mxu1 %v7853_v43 }
 0xcfc   :  { %5955 = vmatpush1.bf16.msra.mxu0 %v7856_v41  ;;  %5987 = vmatpush1.bf16.msra.mxu1 %v7860_v6 }
 0xcfd   :  { %5989 = vmatprep.subr.bf16.mxu0 %v7769_v53  ;;  %6021 = vmatprep.subr.bf16.mxu1 %v7771_v1 }
 0xdb2   :  { %v3879_v32 = vpop.f32.mrb[24].mxu0  ;;  %v3950_v40 = vpop.f32.mrb[24].mxu1 }
 0xdb3   :  { %v6180_v29 = vadd.f32 %v3879_v32, %v7664_v26  ;;  %v3881_v49 = vpop.f32.mrb[25].mxu0  ;;  %v3952_v47 = vpop.f32.mrb[25].mxu1  ;;  %v6196_v20 = vadd.f32 %v3950_v40, %v7679_v35 }
 0xdb4   :  { %v6181_v50 = vadd.f32 %v3881_v49, %v7668_v44  ;;  %v6197_v4 = vadd.f32 %v3952_v47, %v7674_v5 }
 0xdb5   :  { %v4898_v52 = vmul.f32 -1.442695, %v6180_v29 }
 0xdb6   :  { %v4899_v7 = vmul.f32 -1.442695, %v6181_v50  ;;  %v4900_v9 = vmul.f32 -1.442695, %v6197_v4 }
 0xdb7   :  { %6479 = vpow2.f32 %v4898_v52 }
 0xdb8   :  { %6481 = vpow2.f32 %v4899_v7 }
 0xdb9   :  { %6483 = vpow2.f32 %v4900_v9 }
 0xdba   :  { %6485 = vtanh.f32 %v6196_v20 }
 0xdc1   :  { %v6480_v3 = vpop.eup %6479 }
 0xdc2   :  { %v6482_v39 = vpop.eup %6481  ;;  %v3962_v38 = vadd.f32 1.0, %v6480_v3 }
 0xdc3   :  { %v3968_v30 = vadd.f32 1.0, %v6482_v39  ;;  %v6484_v61 = vpop.eup %6483 }
 0xdc4   :  { %6487 = vrcp.f32 %v3962_v38  ;;  %v6486_v31 = vpop.eup %6485  ;;  %v3975_v63 = vadd.f32 1.0, %v6484_v61 }
 0xdc5   :  { %6489 = vrcp.f32 %v3968_v30 }
 0xdc6   :  { %6491 = vrcp.f32 %v3975_v63 }
 0xdce   :  { %v6488_v18 = vpop.eup %6487 }
 0xdcf   :  { %v6490_v25 = vpop.eup %6489  ;;  %v3979_v23 = vmul.f32 %v6488_v18, %v6486_v31 }
 0xdd0   :  { %v3978_v54 = vmul.f32 %v6490_v25, %v7872_v21  ;;  %v6492_v62 = vpop.eup %6491 }
 0xdd2   :  { %v7914_v36 = vadd.f32 %v3979_v23, %v3978_v54 }
 0xdd4   :  { %6493 = vtanh.f32 %v7914_v36 }
 0xdde   :  { %v6494_v34 = vpop.eup %6493 }
 0xddf   :  { %v3982_v15 = vmul.f32 %v6494_v34, %v6492_v62  ;;  %v4708_v34 = vld [vmem:[#allocation15 + $0x18] sm:$0xff] }
 0xde1   :  { %4117 = vmatmul.mubr.f32.vlgmr.msra.gmra.mrb[26].mxu0 %v3982_v15  ;;  %4188 = vmatmul.mubr.f32.vlgmr.msra.gmra.mrb[26].mxu1 %v3982_v15 }
 0xde2   :  { %5991 = vmatpush1.bf16.msra.mxu0 %v7773_v56  ;;  %6023 = vmatpush1.bf16.msra.mxu1 %v7776_v48 }
 0xde3   :  { %5993 = vmatprep.subr.bf16.mxu0 %v7781_v33  ;;  %6025 = vmatprep.subr.bf16.mxu1 %v7783_v37 }
 0xde4   :  { %4355 = vmatprep.mubr.f32.mxu0 %v6792_v0  ;;  %4426 = vmatprep.mubr.f32.mxu1 %v6792_v0 }
 0xde6   :  { %5995 = vmatpush1.bf16.msra.mxu0 %v7785_v14  ;;  %6027 = vmatpush1.bf16.msra.mxu1 %v7788_v11 }
 0xde7   :  { %5997 = vmatprep.subr.bf16.mxu0 %v7793_v27  ;;  %6029 = vmatprep.subr.bf16.mxu1 %v7795_v57 }
 0xdea   :  { %5999 = vmatpush1.bf16.msra.mxu0 %v7797_v2  ;;  %6031 = vmatpush1.bf16.msra.mxu1 %v7800_v51 }
 0xdeb   :  { %6001 = vmatprep.subr.bf16.mxu0 %v7805_v45  ;;  %6033 = vmatprep.subr.bf16.mxu1 %v7807_v42 }
 0xdee   :  { %6003 = vmatpush1.bf16.msra.mxu0 %v7809_v16  ;;  %6035 = vmatpush1.bf16.msra.mxu1 %v7812_v17 }
 0xdef   :  { %6005 = vmatprep.subr.bf16.mxu0 %v7817_v60  ;;  %6037 = vmatprep.subr.bf16.mxu1 %v7819_v28 }
 0xdf2   :  { %6007 = vmatpush1.bf16.msra.mxu0 %v7821_v12  ;;  %6039 = vmatpush1.bf16.msra.mxu1 %v7824_v58 }
 0xdf3   :  { %6009 = vmatprep.subr.bf16.mxu0 %v7828_v59  ;;  %6041 = vmatprep.subr.bf16.mxu1 %v7831_v22 }
 0xdf6   :  { %6011 = vmatpush1.bf16.msra.mxu0 %v7833_v46  ;;  %6043 = vmatpush1.bf16.msra.mxu1 %v7836_v8 }
 0xdf7   :  { %6013 = vmatprep.subr.bf16.mxu0 %v7839_v24  ;;  %6045 = vmatprep.subr.bf16.mxu1 %v7841_v55 }
 0xdfa   :  { %6015 = vmatpush1.bf16.msra.mxu0 %v7844_v13  ;;  %6047 = vmatpush1.bf16.msra.mxu1 %v7848_v10 }
 0xdfb   :  { %6017 = vmatprep.subr.bf16.mxu0 %v7850_v19  ;;  %6049 = vmatprep.subr.bf16.mxu1 %v7853_v43 }
 0xdfe   :  { %6019 = vmatpush1.bf16.msra.mxu0 %v7856_v41  ;;  %6051 = vmatpush1.bf16.msra.mxu1 %v7860_v6 }
 0xdff   :  { %6053 = vmatprep.subr.bf16.mxu0 %v7769_v53  ;;  %6085 = vmatprep.subr.bf16.mxu1 %v7771_v1 }
 0xeb4   :  { %v4118_v21 = vpop.f32.mrb[26].mxu0  ;;  %v4189_v32 = vpop.f32.mrb[26].mxu1 }
 0xeb5   :  { %v6182_v40 = vadd.f32 %v4118_v21, %v7664_v26  ;;  %v4120_v29 = vpop.f32.mrb[27].mxu0  ;;  %v4191_v49 = vpop.f32.mrb[27].mxu1  ;;  %v6198_v9 = vadd.f32 %v4189_v32, %v7679_v35  ;;  %v4709_v21 = vld [vmem:[#allocation15 + $0x20] sm:$0xff]  ;;  %v4710_v32 = vld [vmem:[#allocation15 + $0x28] sm:$0xff] }
 0xeb6   :  { %v6183_v47 = vadd.f32 %v4120_v29, %v7668_v44  ;;  %v6199_v7 = vadd.f32 %v4191_v49, %v7674_v5  ;;  %v4711_v29 = vld [vmem:[#allocation15 + $0x30] sm:$0xff]  ;;  %v4712_v49 = vld [vmem:[#allocation15 + $0x38] sm:$0xff] }
 0xeb7   :  { %v4901_v50 = vmul.f32 -1.442695, %v6182_v40  ;;  %v6123_v40 = vpack.c.bf16 %v4710_v32, %v4709_v21 }
 0xeb8   :  { %v4902_v52 = vmul.f32 -1.442695, %v6183_v47  ;;  %v4903_v4 = vmul.f32 -1.442695, %v6199_v7  ;;  %v6126_v47 = vpack.c.bf16 %v4712_v49, %v4711_v29 }
 0xeb9   :  { %6495 = vpow2.f32 %v4901_v50  ;;  %v4713_v50 = vld [vmem:[#allocation15 + $0x40] sm:$0xff] }
 0xeba   :  { %6497 = vpow2.f32 %v4902_v52  ;;  %v4714_v52 = vld [vmem:[#allocation15 + $0x48] sm:$0xff] }
 0xebb   :  { %6499 = vpow2.f32 %v4903_v4  ;;  %v6129_v7 = vpack.c.bf16 %v4714_v52, %v4713_v50  ;;  %v4715_v4 = vld [vmem:[#allocation15 + $0x50] sm:$0xff] }
 0xebc   :  { %6501 = vtanh.f32 %v6198_v9  ;;  %v4716_v9 = vld [vmem:[#allocation15 + $0x58] sm:$0xff] }
 0xec3   :  { %v6496_v53 = vpop.eup %6495 }
 0xec4   :  { %v6498_v20 = vpop.eup %6497  ;;  %v4201_v1 = vadd.f32 1.0, %v6496_v53  ;;  %v4717_v53 = vld [vmem:[#allocation15 + $0x60] sm:$0xff] }
 0xec5   :  { %v4207_v3 = vadd.f32 1.0, %v6498_v20  ;;  %v6500_v39 = vpop.eup %6499  ;;  %v6132_v20 = vpack.c.bf16 %v4716_v9, %v4715_v4 }
 0xec6   :  { %6503 = vrcp.f32 %v4201_v1  ;;  %v6502_v38 = vpop.eup %6501  ;;  %v4214_v18 = vadd.f32 1.0, %v6500_v39  ;;  %v4718_v1 = vld [vmem:[#allocation15 + $0x68] sm:$0xff]  ;;  %v4719_v39 = vld [vmem:[#allocation15 + $0x70] sm:$0xff] }
 0xec7   :  { %6505 = vrcp.f32 %v4207_v3  ;;  %v6135_v3 = vpack.c.bf16 %v4718_v1, %v4717_v53 }
 0xec8   :  { %6507 = vrcp.f32 %v4214_v18 }
 0xed0   :  { %v6504_v30 = vpop.eup %6503 }
 0xed1   :  { %v6506_v61 = vpop.eup %6505  ;;  %v4218_v31 = vmul.f32 %v6504_v30, %v6502_v38  ;;  %v4720_v38 = vld [vmem:[#allocation15 + $0x78] sm:$0xff] }
 0xed2   :  { %v4217_v25 = vmul.f32 %v6506_v61, %v7914_v36  ;;  %v6508_v63 = vpop.eup %6507  ;;  %v4707_v36 = vld [vmem:[#allocation15 + $0x10] sm:$0xff]  ;;  %v6138_v30 = vpack.c.bf16 %v4720_v38, %v4719_v39 }
 0xed3   :  { %v6120_v15 = vpack.c.bf16 %v4708_v34, %v4707_v36 }
 0xed4   :  { %v7956_v23 = vadd.f32 %v4218_v31, %v4217_v25 }
 0xed6   :  { %6509 = vtanh.f32 %v7956_v23 }
 0xee0   :  { %v6510_v54 = vpop.eup %6509 }
 0xee1   :  { %v4221_v62 = vmul.f32 %v6510_v54, %v6508_v63 }
 0xee3   :  { %4356 = vmatmul.mubr.f32.vlgmr.msra.gmra.mrb[28].mxu0 %v4221_v62  ;;  %4427 = vmatmul.mubr.f32.vlgmr.msra.gmra.mrb[28].mxu1 %v4221_v62 }
 0xee4   :  { %6055 = vmatpush1.bf16.msra.mxu0 %v7773_v56  ;;  %6087 = vmatpush1.bf16.msra.mxu1 %v7776_v48 }
 0xee5   :  { %6057 = vmatprep.subr.bf16.mxu0 %v7781_v33  ;;  %6089 = vmatprep.subr.bf16.mxu1 %v7783_v37 }
 0xee6   :  { %4594 = vmatprep.mubr.f32.mxu0 %v6792_v0  ;;  %4665 = vmatprep.mubr.f32.mxu1 %v6792_v0 }
 0xee8   :  { %6059 = vmatpush1.bf16.msra.mxu0 %v7785_v14  ;;  %6091 = vmatpush1.bf16.msra.mxu1 %v7788_v11 }
 0xee9   :  { %6061 = vmatprep.subr.bf16.mxu0 %v7793_v27  ;;  %6093 = vmatprep.subr.bf16.mxu1 %v7795_v57 }
 0xeec   :  { %6063 = vmatpush1.bf16.msra.mxu0 %v7797_v2  ;;  %6095 = vmatpush1.bf16.msra.mxu1 %v7800_v51 }
 0xeed   :  { %6065 = vmatprep.subr.bf16.mxu0 %v7805_v45  ;;  %6097 = vmatprep.subr.bf16.mxu1 %v7807_v42 }
 0xef0   :  { %6067 = vmatpush1.bf16.msra.mxu0 %v7809_v16  ;;  %6099 = vmatpush1.bf16.msra.mxu1 %v7812_v17 }
 0xef1   :  { %6069 = vmatprep.subr.bf16.mxu0 %v7817_v60  ;;  %6101 = vmatprep.subr.bf16.mxu1 %v7819_v28 }
 0xef4   :  { %6071 = vmatpush1.bf16.msra.mxu0 %v7821_v12  ;;  %6103 = vmatpush1.bf16.msra.mxu1 %v7824_v58 }
 0xef5   :  { %6073 = vmatprep.subr.bf16.mxu0 %v7828_v59  ;;  %6105 = vmatprep.subr.bf16.mxu1 %v7831_v22 }
 0xef8   :  { %6075 = vmatpush1.bf16.msra.mxu0 %v7833_v46  ;;  %6107 = vmatpush1.bf16.msra.mxu1 %v7836_v8 }
 0xef9   :  { %6077 = vmatprep.subr.bf16.mxu0 %v7839_v24  ;;  %6109 = vmatprep.subr.bf16.mxu1 %v7841_v55 }
 0xefc   :  { %6079 = vmatpush1.bf16.msra.mxu0 %v7844_v13  ;;  %6111 = vmatpush1.bf16.msra.mxu1 %v7848_v10 }
 0xefd   :  { %6081 = vmatprep.subr.bf16.mxu0 %v7850_v19  ;;  %6113 = vmatprep.subr.bf16.mxu1 %v7853_v43  ;;  %v4705_v19 = vld [vmem:[#allocation15] sm:$0xff]  ;;  %v4706_v43 = vld [vmem:[#allocation15 + $0x8] sm:$0xff] }
 0xf00   :  { %6083 = vmatpush1.bf16.msra.mxu0 %v7856_v41  ;;  %6115 = vmatpush1.bf16.msra.mxu1 %v7860_v6  ;;  %v6117_v41 = vpack.c.bf16 %v4706_v43, %v4705_v19  ;;  %v6793_v6 = vmov 0.0|0.0  }
 0xf01   :  { %6116 = vmatprep.subr.bf16.mxu0 %v6793_v6 }
 0xfb6   :  { %v4357_v56 = vpop.f32.mrb[28].mxu0  ;;  %v4428_v48 = vpop.f32.mrb[28].mxu1 }
 0xfb7   :  { %v6184_v33 = vadd.f32 %v4357_v56, %v7664_v26  ;;  %v4359_v37 = vpop.f32.mrb[29].mxu0  ;;  %v4430_v14 = vpop.f32.mrb[29].mxu1  ;;  %v6200_v45 = vadd.f32 %v4428_v48, %v7679_v35 }
 0xfb8   :  { %v6185_v11 = vadd.f32 %v4359_v37, %v7668_v44  ;;  %v6201_v2 = vadd.f32 %v4430_v14, %v7674_v5 }
 0xfb9   :  { %v4904_v27 = vmul.f32 -1.442695, %v6184_v33 }
 0xfba   :  { %v4905_v57 = vmul.f32 -1.442695, %v6185_v11  ;;  %v4906_v51 = vmul.f32 -1.442695, %v6201_v2 }
 0xfbb   :  { %6511 = vpow2.f32 %v4904_v27 }
 0xfbc   :  { %6513 = vpow2.f32 %v4905_v57 }
 0xfbd   :  { %6515 = vpow2.f32 %v4906_v51 }
 0xfbe   :  { %6517 = vtanh.f32 %v6200_v45 }
 0xfc5   :  { %v6512_v42 = vpop.eup %6511 }
 0xfc6   :  { %v6514_v16 = vpop.eup %6513  ;;  %v4440_v17 = vadd.f32 1.0, %v6512_v42 }
 0xfc7   :  { %v4446_v60 = vadd.f32 1.0, %v6514_v16  ;;  %v6516_v28 = vpop.eup %6515 }
 0xfc8   :  { %6519 = vrcp.f32 %v4440_v17  ;;  %v6518_v12 = vpop.eup %6517  ;;  %v4453_v46 = vadd.f32 1.0, %v6516_v28 }
 0xfc9   :  { %6521 = vrcp.f32 %v4446_v60 }
 0xfca   :  { %6523 = vrcp.f32 %v4453_v46 }
 0xfd2   :  { %v6520_v58 = vpop.eup %6519 }
 0xfd3   :  { %v6522_v59 = vpop.eup %6521  ;;  %v4457_v22 = vmul.f32 %v6520_v58, %v6518_v12 }
 0xfd4   :  { %v4456_v8 = vmul.f32 %v6522_v59, %v7956_v23  ;;  %v6524_v55 = vpop.eup %6523 }
 0xfd6   :  { %v7996_v24 = vadd.f32 %v4457_v22, %v4456_v8 }
 0xfd8   :  { %6525 = vtanh.f32 %v7996_v24 }
 0xfe2   :  { %v6526_v13 = vpop.eup %6525 }
 0xfe3   :  { %v4460_v10 = vmul.f32 %v6526_v13, %v6524_v55 }
 0xfe5   :  { %4595 = vmatmul.mubr.f32.vlgmr.msra.gmra.mrb[30].mxu0 %v4460_v10  ;;  %4666 = vmatmul.mubr.f32.vlgmr.msra.gmra.mrb[30].mxu1 %v4460_v10 }
 0xfe6   :  { %6118 = vmatpush3.bf16.msra.mxu0 %v6117_v41  ;;  %4961 = vmatprep.mubr.msk.f32.mxu0 %vm6794_vm0, %v6792_v0 }
 0xfe7   :  { %6119 = vmatprep.subr.bf16.mxu0 %v6793_v6 }
 0xfea   :  { %6121 = vmatpush3.bf16.msra.mxu0 %v6120_v15 }
 0xfeb   :  { %6122 = vmatprep.subr.bf16.mxu0 %v6793_v6 }
 0xfee   :  { %6124 = vmatpush3.bf16.msra.mxu0 %v6123_v40 }
 0xfef   :  { %6125 = vmatprep.subr.bf16.mxu0 %v6793_v6 }
 0xff2   :  { %6127 = vmatpush3.bf16.msra.mxu0 %v6126_v47 }
 0xff3   :  { %6128 = vmatprep.subr.bf16.mxu0 %v6793_v6 }
 0xff6   :  { %6130 = vmatpush3.bf16.msra.mxu0 %v6129_v7 }
 0xff7   :  { %6131 = vmatprep.subr.bf16.mxu0 %v6793_v6 }
 0xffa   :  { %6133 = vmatpush3.bf16.msra.mxu0 %v6132_v20 }
 0xffb   :  { %6134 = vmatprep.subr.bf16.mxu0 %v6793_v6 }
 0xffe   :  { %6136 = vmatpush3.bf16.msra.mxu0 %v6135_v3 }
 0xfff   :  { %6137 = vmatprep.subr.bf16.mxu0 %v6793_v6 }
0x1002   :  { %6139 = vmatpush3.bf16.msra.mxu0 %v6138_v30 }
0x10b8   :  { %v4596_v61 = vpop.f32.mrb[30].mxu0  ;;  %v4667_v31 = vpop.f32.mrb[30].mxu1 }
0x10b9   :  { %v6186_v18 = vadd.f32 %v4596_v61, %v7664_v26  ;;  %v4598_v25 = vpop.f32.mrb[31].mxu0  ;;  %v4669_v23 = vpop.f32.mrb[31].mxu1  ;;  %v6202_v48 = vadd.f32 %v4667_v31, %v7679_v35 }
0x10ba   :  { %v6187_v63 = vadd.f32 %v4598_v25, %v7668_v44  ;;  %v6203_v0 = vadd.f32 %v4669_v23, %v7674_v5 }
0x10bb   :  { %v4907_v54 = vmul.f32 -1.442695, %v6186_v18 }
0x10bc   :  { %v4908_v62 = vmul.f32 -1.442695, %v6187_v63  ;;  %v4909_v56 = vmul.f32 -1.442695, %v6203_v0 }
0x10bd   :  { %6527 = vpow2.f32 %v4907_v54 }
0x10be   :  { %6529 = vpow2.f32 %v4908_v62 }
0x10bf   :  { %6531 = vpow2.f32 %v4909_v56 }
0x10c0   :  { %6533 = vtanh.f32 %v6202_v48 }
0x10c7   :  { %v6528_v33 = vpop.eup %6527 }
0x10c8   :  { %v6530_v37 = vpop.eup %6529  ;;  %v4679_v14 = vadd.f32 1.0, %v6528_v33 }
0x10c9   :  { %v4685_v11 = vadd.f32 1.0, %v6530_v37  ;;  %v6532_v26 = vpop.eup %6531 }
0x10ca   :  { %6535 = vrcp.f32 %v4679_v14  ;;  %v6534_v27 = vpop.eup %6533  ;;  %v4692_v51 = vadd.f32 1.0, %v6532_v26 }
0x10cb   :  { %6537 = vrcp.f32 %v4685_v11 }
0x10cc   :  { %6539 = vrcp.f32 %v4692_v51 }
0x10d4   :  { %v6536_v44 = vpop.eup %6535 }
0x10d5   :  { %v6538_v57 = vpop.eup %6537  ;;  %v4696_v2 = vmul.f32 %v6536_v44, %v6534_v27 }
0x10d6   :  { %v4695_v45 = vmul.f32 %v6538_v57, %v7996_v24  ;;  %v6540_v35 = vpop.eup %6539 }
0x10d8   :  { %v4697_v5 = vadd.f32 %v4696_v2, %v4695_v45 }
0x10da   :  { %4704 = vst [vmem:[#allocation19 + $0x8] sm:$0xff] %v4697_v5  ;;  %6541 = vtanh.f32 %v4697_v5 }
0x10e4   :  { %v6542_v42 = vpop.eup %6541 }
0x10e5   :  { %v4699_v16 = vmul.f32 %v6542_v42, %v6540_v35 }
0x10e7   :  { %4962 = vmatmul.mubr.f32.vlgmr.msra.gmra.mrb[32].mxu0 %v4699_v16  ;;  %4702 = vst [vmem:[#allocation17 + $0x8] sm:$0xff] %v4699_v16 }
0x10e8   :  { %6712 = shalt.err (!%p6709_p4)
}
0x10e9   :  { %s6713_s2 = scalar_lea.hbm %s8060_s10, 256 }
0x10ea   :  { %p6714_p5 = scmp.ne.s32.totalorder %s8060_s10, %s6713_s2  ;;  %p6717_p6 = scmp.lt.u32.totalorder %s6713_s2, %s8060_s10 }
0x10ec   :  { %p6719_p7 = pnand %p6717_p6, %p6714_p5 }
0x10ee   :  { %6722 = shalt.err (!%p6719_p7)
}
0x10ef   :  { %4826 = dma.vmem_to_hbm [thread:$0]  %s4821_s24, 256, %s8060_s10, [#allocation18], %s6785_s13, %s6785_s13, %s6786_s19  }
0x10f0   :  { %s6796_s1 = smov [#allocation19]  }
0x10f1   :  { %s4832_s18 = sshll.u32 %s6796_s1, 4  ;;  %s4833_s18 = int_to_ptr.vmem [resolvable:$true] %s4832_s18 }
0x10f2   :  { %s6723_s23 = scalar_lea.vmem %s4833_s18, 256  ;;  %p6728_p9 = scmp.lt.s32.totalorder %s4833_s18, %s4833_s18 }
0x10f3   :  { %p6724_p8 = scmp.ne.s32.totalorder %s4833_s18, %s6723_s23  ;;  %p6729_p10 = scmp.lt.s32.totalorder %s6723_s23, %s6723_s23 }
0x10f5   :  { %p6730_p11 = por %p6729_p10, %p6728_p9 }
0x10f7   :  { %p6731_p12 = pnand %p6730_p11, %p6724_p8 }
0x10f9   :  { %6734 = shalt.err (!%p6731_p12)
}
0x10fa   :  { %s6735_s25 = scalar_lea.hbm %s8061_s11, 256 }
0x10fb   :  { %p6736_p13 = scmp.ne.s32.totalorder %s8061_s11, %s6735_s25  ;;  %p6739_p0 = scmp.lt.u32.totalorder %s6735_s25, %s8061_s11 }
0x10fd   :  { %p6741_p1 = pnand %p6739_p0, %p6736_p13 }
0x10ff   :  { %6744 = shalt.err (!%p6741_p1)
}
0x1100   :  { %4838 = dma.vmem_to_hbm [thread:$0]  %s4833_s18, 256, %s8061_s11, [#allocation18], %s6785_s13, %s6785_s13, %s6786_s19  }
0x1101   :  { %v4910_v17 = vld [vmem:[%s8058_s8] ss:$0 sm:$0xff]  ;;  %s6797_s5 = smov [#allocation16]  }
0x1102   :  { %s4811_s24 = sshll.u32 %s6797_s5, 4  ;;  %s4812_s24 = int_to_ptr.vmem [resolvable:$true] %s4811_s24 }
0x1103   :  { %s6745_s14 = scalar_lea.vmem %s4812_s24, 128  ;;  %p6750_p3 = scmp.lt.s32.totalorder %s4812_s24, %s4812_s24 }
0x1104   :  { %p6746_p2 = scmp.ne.s32.totalorder %s4812_s24, %s6745_s14  ;;  %p6751_p4 = scmp.lt.s32.totalorder %s6745_s14, %s6745_s14 }
0x1106   :  { %p6752_p5 = por %p6751_p4, %p6750_p3 }
0x1108   :  { %p6753_p6 = pnand %p6752_p5, %p6746_p2 }
0x11ba   :  { %v4794_v60 = vpop.f32.mrb[32].mxu0 }
0x11bb   :  { %v4795_v28 = vadd.f32 %v4910_v17, %v4794_v60  ;;  %v4963_v12 = vpop.f32.mrb[33].mxu0 }
0x11bd   :  { %v4911_v58 = vmul.f32 -1.442695, %v4795_v28 }
0x11bf   :  { %6543 = vpow2.f32 %v4911_v58 }
0x11c9   :  { %v6544_v59 = vpop.eup %6543 }
0x11ca   :  { %v4801_v22 = vadd.f32 1.0, %v6544_v59 }
0x11cc   :  { %6545 = vrcp.f32 %v4801_v22 }
0x11d6   :  { %v6546_v46 = vpop.eup %6545 }
0x11d7   :  { %4804 = vst [vmem:[#allocation16] sm:$0xff] %v6546_v46 }
0x11d8   :  { %6756 = shalt.err (!%p6753_p6)
}
0x11d9   :  { %s6757_s13 = scalar_lea.hbm %s8059_s9, 128 }
0x11da   :  { %p6758_p7 = scmp.ne.s32.totalorder %s8059_s9, %s6757_s13  ;;  %p6761_p8 = scmp.lt.u32.totalorder %s6757_s13, %s8059_s9 }
0x11dc   :  { %p6763_p9 = pnand %p6761_p8, %p6758_p7 }
0x11de   :  { %6766 = shalt.err (!%p6763_p9)
}
0x11df   :  { %4814 = dma.vmem_to_hbm [thread:$0]  %s4812_s24, 128, %s8059_s9, [#allocation6]  }
0x11e0   :  { %6775 = dma.done.wait [#allocation6], 128  }
0x11e1   :  { %6776 = vsyncadd [#allocation6], 4294967168 }
0x11e2   :  { %6777 = dma.done.wait [#allocation18], 512  }
0x11e3   :  { %6778 = vsyncadd [#allocation18], 4294966784 }
0x11e4   :  { %4848 = vsyncpa [#allocation5], 1 }
0x11e5   :  { %4849 = vsyncpa [#allocation8], 1 }
0x11e6   :  { %4850 = vsyncpa [#allocation11], 1 }
0x11e7   :  { %4851 = vsyncpa [#allocation14], 1 }
0x11e8   :  { %4852 = vsyncpa [#allocation6], 1 }
0x11e9   :  { %4853 = vsyncpa [#allocation18], 1 }

</bundles_post_ra>
